<compile_context>
chip_gen: v7x
topology: tpu7x:2x2x1
jax: 0.10.0
libtpu: 0.0.40
codegen_flags: <defaults>
</compile_context>

<pallas_src>
import numpy as np
import jax
import jax.numpy as jnp
from jax import lax
from jax.experimental import pallas as pl
from jax.experimental.pallas import tpu as pltpu

# ---------------- model hyperparameters (small, consistent with the module) ----------------
VOCAB_IN   = 32   # encoder_sizes (encoder vocab)
VOCAB_OUT  = 32   # decoder_sizes (decoder vocab)
LATENT     = 32   # latent_size
COND       = 8    # condition_size
LINEAR     = 32   # seq2seqCVAE.linear_size
SEQ_LEN    = 8    # encoder input sequence length
MAX_LENGTH = 8    # decoder max length
SOS_TOKEN  = 0
EOS_TOKEN  = 1

HPAD = 128        # padded hidden width (one full vreg of lanes)
GPAD = 4 * HPAD   # padded gates width: four lane-aligned 128-wide blocks (i, f, g, o)

assert LATENT + VOCAB_IN <= HPAD and LATENT + VOCAB_OUT <= HPAD


# ---------------------------------- kernel helpers ----------------------------------
def _gate_update(gates, c):
    """PyTorch LSTM cell update from pre-activations.

    gates: [1, GPAD]; gate g occupies lanes [g*HPAD, g*HPAD+LATENT), rest is 0.
    c:     [1, HPAD]; lanes LATENT.. are 0 and stay 0 (0.5*0 + 0.5*tanh(0) = 0),
           hence h's lanes LATENT.. also stay 0 — they are free to carry the one-hot.
    """
    i = jax.nn.sigmoid(gates[:, 0 * HPAD:1 * HPAD])
    f = jax.nn.sigmoid(gates[:, 1 * HPAD:2 * HPAD])
    g = jnp.tanh(      gates[:, 2 * HPAD:3 * HPAD])
    o = jax.nn.sigmoid(gates[:, 3 * HPAD:4 * HPAD])
    c_new = f * c + i * g
    h_new = o * jnp.tanh(c_new)
    return h_new, c_new


# ---------------------------------- the Pallas kernel ----------------------------------
def cvae_kernel(
    x_tok_ref,                          # VMEM int32 [SEQ_LEN, 1]
    h0_ref, eps_ref, c2_ref,            # [1,HPAD], [1,LINEAR], [1,COND]
    enc_wfull_ref,                      # [HPAD, GPAD] fused: rows 0..31 W_hh, rows 32..63 token-gate table
    wm_ref, bm_ref, wv_ref, bv_ref,     # means / log_var heads
    l1_wz_ref, l1_wc_ref, l1_b_ref,     # decoder l1 split for cat(z, c)
    dec_wfull_hbm,                      # ANY  [HPAD, GPAD] fused decoder table (manual DMA)
    fc_w_hbm,                           # ANY  [HPAD, VOCAB_OUT]               (manual DMA)
    fc_b_ref,                           # [1, VOCAB_OUT]
    logits_out_ref, means_out_ref, logvar_out_ref,
    dec_w_scr, fc_w_scr, dma_sem,       # VMEM scratch + DMA semaphores
):
    # -------- prologue: kick off decoder-weight DMA; it overlaps the encoder recurrence --------
    dec_cp = pltpu.make_async_copy(dec_wfull_hbm, dec_w_scr, dma_sem.at[0])
    fc_cp = pltpu.make_async_copy(fc_w_hbm, fc_w_scr, dma_sem.at[1])
    dec_cp.start()
    fc_cp.start()

    # ---------------- Encoder ----------------
    # All token one-hots, pre-shifted into lanes [LATENT, LATENT+VOCAB_IN), built with one
    # broadcasted compare (no SMEM scalar reads / sreg->vreg splats). [SEQ_LEN, HPAD] = 1 vreg.
    lane_iota_seq = lax.broadcasted_iota(jnp.int32, (SEQ_LEN, HPAD), 1)
    onehot_all = (lane_iota_seq == (x_tok_ref[...] + LATENT)).astype(jnp.float32)

    h = h0_ref[...]                                                  # [1, HPAD]
    c = jnp.zeros((1, HPAD), jnp.float32)
    for t in range(SEQ_LEN):                                         # fully unrolled
        # single fused matmul: (h | token one-hot) @ (W_hh | emb@W_ih+b) — weight re-read
        # from the ref each step so it is never held live across the unrolled loop.
        gates = jnp.dot(h + onehot_all[t:t + 1, :], enc_wfull_ref[...],
                        preferred_element_type=jnp.float32)
        h, c = _gate_update(gates, c)

    means = jnp.dot(h, wm_ref[...], preferred_element_type=jnp.float32) + bm_ref[...]
    log_var = jnp.dot(h, wv_ref[...], preferred_element_type=jnp.float32) + bv_ref[...]
    means_out_ref[...] = means
    logvar_out_ref[...] = log_var

    # ---------------- Reparameterization: z = eps * exp(0.5*log_var) + means ----------------
    z = eps_ref[...] * jnp.exp(0.5 * log_var) + means                # [1, LINEAR]

    # ---------------- Decoder: l1(cat(z, c2)) then greedy LSTM ----------------
    h = (jnp.dot(z, l1_wz_ref[...], preferred_element_type=jnp.float32)
         + jnp.dot(c2_ref[...], l1_wc_ref[...], preferred_element_type=jnp.float32)
         + l1_b_ref[...])                                            # [1, HPAD], lanes 32.. are 0
    c = jnp.zeros((1, HPAD), jnp.float32)

    hpad_iota = lax.broadcasted_iota(jnp.int32, (1, HPAD), 1)        # hoisted
    out_iota = lax.broadcasted_iota(jnp.int32, (1, VOCAB_OUT), 1)    # hoisted
    onehot_h = (hpad_iota == (SOS_TOKEN + LATENT)).astype(jnp.float32)

    # decoder weights must be resident now
    dec_cp.wait()
    fc_cp.wait()

    # TODO(synk): teacher-forcing branch (target + random.random() < tf_ratio) not
    # implemented; with the module default tf_ratio=0 this greedy path is exact.
    rows = []
    for _ in range(MAX_LENGTH):                                      # fully unrolled
        # ONE fused matmul per step (one-hot lives in h's dead lanes; x-gate table baked
        # into rows 32..63 of dec_w in prepare_params).  Weights re-read from scratch refs
        # each step (vld slots have slack; avoids holding 272 KB live across the unroll).
        gates = jnp.dot(h + onehot_h, dec_w_scr[...],
                        preferred_element_type=jnp.float32)
        h, c = _gate_update(gates, c)
        logits = jnp.dot(h, fc_w_scr[...], preferred_element_type=jnp.float32) + fc_b_ref[...]
        rows.append(logits)
        # greedy argmax, fully vectorized (no rank-0 / sreg round trip); lowest index on ties
        mx = jnp.max(logits, axis=-1, keepdims=True)                 # [1,1]
        tok = jnp.min(jnp.where(logits == mx, out_iota, VOCAB_OUT),
                      axis=-1, keepdims=True)                        # [1,1] int32
        onehot_h = (hpad_iota == (tok + LATENT)).astype(jnp.float32) # one-hot in lanes [32,64)

    # single full-block store; no per-step read-modify-write of the output
    logits_out_ref[...] = jnp.concatenate(rows, axis=0)
    # NOTE: early break on EOS_TOKEN is data-dependent; the kernel computes all
    # MAX_LENGTH steps and the host truncates afterwards (kept rows are identical).


# ---------------------------------- parameters ----------------------------------
PARAM_ORDER = ["enc_emb", "enc_wih", "enc_whh", "enc_b",
               "wm", "bm", "wv", "bv",
               "l1_wz", "l1_wc", "l1_b",
               "dec_emb", "dec_wih", "dec_whh", "dec_b",
               "fc_w", "fc_b"]


def init_params(key):
    def normal(k, shape, scale=0.1):
        return (scale * jax.random.normal(k, shape)).astype(jnp.float32)

    ks = jax.random.split(key, len(PARAM_ORDER))
    p = {}
    p["enc_emb"] = normal(ks[0],  (VOCAB_IN, LATENT), 1.0)          # nn.Embedding
    p["enc_wih"] = normal(ks[1],  (LATENT, 4 * LATENT))             # LSTM W_ih^T
    p["enc_whh"] = normal(ks[2],  (LATENT, 4 * LATENT))             # LSTM W_hh^T
    p["enc_b"]   = normal(ks[3],  (1, 4 * LATENT))                  # b_ih + b_hh
    p["wm"]      = normal(ks[4],  (LATENT, LINEAR))                 # linear_means
    p["bm"]      = normal(ks[5],  (1, LINEAR))
    p["wv"]      = normal(ks[6],  (LATENT, LINEAR))                 # linear_log_var
    p["bv"]      = normal(ks[7],  (1, LINEAR))
    p["l1_wz"]   = normal(ks[8],  (LINEAR, LATENT))                 # l1 weight, z part
    p["l1_wc"]   = normal(ks[9],  (COND, LATENT))                   # l1 weight, c part
    p["l1_b"]    = normal(ks[10], (1, LATENT))
    p["dec_emb"] = normal(ks[11], (VOCAB_OUT, LATENT), 1.0)
    p["dec_wih"] = normal(ks[12], (LATENT, 4 * LATENT))
    p["dec_whh"] = normal(ks[13], (LATENT, 4 * LATENT))
    p["dec_b"]   = normal(ks[14], (1, 4 * LATENT))
    p["fc_w"]    = normal(ks[15], (LATENT, VOCAB_OUT))
    p["fc_b"]    = normal(ks[16], (1, VOCAB_OUT))
    return p


def _pad_gate_cols(w):
    """[*, 4*LATENT] -> [*, GPAD]; gate g moves to lanes [g*HPAD, g*HPAD+LATENT)."""
    zeros = jnp.zeros(w.shape[:-1] + (HPAD - LATENT,), w.dtype)
    blocks = [jnp.concatenate([w[..., g * LATENT:(g + 1) * LATENT], zeros], axis=-1)
              for g in range(4)]
    return jnp.concatenate(blocks, axis=-1)


def _pad_rows(w, rows=HPAD):
    return jnp.concatenate(
        [w, jnp.zeros((rows - w.shape[0],) + w.shape[1:], w.dtype)], axis=0)


def _pad_cols(w, cols=HPAD):
    return jnp.concatenate(
        [w, jnp.zeros(w.shape[:-1] + (cols - w.shape[-1],), w.dtype)], axis=-1)


def _fuse_recurrent_table(whh, x_gate_table):
    """Build the fused [HPAD, GPAD] recurrent weight:
       rows [0, LATENT)            : W_hh (gate-padded)   -> multiplied by h lanes,
       rows [LATENT, LATENT+VOCAB) : per-token x-gate+bias table -> multiplied by the
                                     token one-hot living in h's dead lanes,
       rows [LATENT+VOCAB, HPAD)   : zeros."""
    top = _pad_gate_cols(whh)                                        # [LATENT, GPAD]
    mid = _pad_gate_cols(x_gate_table)                               # [VOCAB,  GPAD]
    used = top.shape[0] + mid.shape[0]
    bot = jnp.zeros((HPAD - used, GPAD), jnp.float32)
    return jnp.concatenate([top, mid, bot], axis=0)


def prepare_params(p):
    """One-time (host/XLA-side) transform: fold embedding [+ReLU] + W_ih + bias into the
    dead-lane rows of the recurrent weight so every LSTM step is a single matmul, and pad
    the gate layout to four lane-aligned 128-wide blocks (no sub-vreg lane extraction)."""
    kp = {}
    kp["enc_wfull"] = _fuse_recurrent_table(
        p["enc_whh"], jnp.dot(p["enc_emb"], p["enc_wih"]) + p["enc_b"])
    kp["wm"], kp["bm"] = _pad_rows(p["wm"]), p["bm"]
    kp["wv"], kp["bv"] = _pad_rows(p["wv"]), p["bv"]
    kp["l1_wz"] = _pad_cols(p["l1_wz"])
    kp["l1_wc"] = _pad_cols(p["l1_wc"])
    kp["l1_b"]  = _pad_cols(p["l1_b"])
    kp["dec_wfull"] = _fuse_recurrent_table(
        p["dec_whh"], jnp.dot(jnp.maximum(p["dec_emb"], 0.0), p["dec_wih"]) + p["dec_b"])
    kp["fc_w"], kp["fc_b"] = _pad_rows(p["fc_w"]), p["fc_b"]
    return kp


# ---------------------------------- wrapper ----------------------------------
@jax.jit
def cvae_forward(x_tokens, c1, c2, eps, kparams):
    # glue: encoder initial hidden = cat(zeros(latent - cond), c1), zero-padded to HPAD
    h0 = jnp.zeros((1, HPAD), jnp.float32)
    h0 = h0.at[:, LATENT - COND:LATENT].set(c1.reshape(1, COND).astype(jnp.float32))
    eps2 = eps.reshape(1, LINEAR).astype(jnp.float32)
    c2r = c2.reshape(1, COND).astype(jnp.float32)
    x2 = x_tokens.reshape(SEQ_LEN, 1).astype(jnp.int32)

    vmem = pl.BlockSpec(memory_space=pltpu.MemorySpace.VMEM)
    hbm = pl.BlockSpec(memory_space=pl.ANY)                # decoder weights: manual DMA
    in_specs = [vmem] * 12 + [hbm, hbm, vmem]

    logits, means, log_var = pl.pallas_call(
        cvae_kernel,
        out_shape=(
            jax.ShapeDtypeStruct((MAX_LENGTH, VOCAB_OUT), jnp.float32),
            jax.ShapeDtypeStruct((1, LINEAR), jnp.float32),
            jax.ShapeDtypeStruct((1, LINEAR), jnp.float32),
        ),
        in_specs=in_specs,
        out_specs=(vmem, vmem, vmem),
        scratch_shapes=[
            pltpu.VMEM((HPAD, GPAD), jnp.float32),         # dec_w_scr
            pltpu.VMEM((HPAD, VOCAB_OUT), jnp.float32),    # fc_w_scr
            pltpu.SemaphoreType.DMA((2,)),                 # one sem per async copy
        ],
    )(x2, h0, eps2, c2r,
      kparams["enc_wfull"], kparams["wm"], kparams["bm"], kparams["wv"], kparams["bv"],
      kparams["l1_wz"], kparams["l1_wc"], kparams["l1_b"],
      kparams["dec_wfull"], kparams["fc_w"], kparams["fc_b"])
    return logits, means, log_var


# ---------------------------------- demo ----------------------------------
if __name__ == "__main__":
    key = jax.random.PRNGKey(0)
    k_param, k_x, k_c1, k_c2, k_eps = jax.random.split(key, 5)

    params = init_params(k_param)
    kparams = prepare_params(params)        # one-time layout/precompute transform
    x_tokens = jax.random.randint(k_x, (SEQ_LEN,), 0, VOCAB_IN, dtype=jnp.int32)
    c1 = jax.random.normal(k_c1, (COND,), dtype=jnp.float32)
    c2 = jax.random.normal(k_c2, (COND,), dtype=jnp.float32)
    eps = jax.random.normal(k_eps, (LINEAR,), dtype=jnp.float32)   # torch.randn(linear_size)

    logits, means, log_var = cvae_forward(x_tokens, c1, c2, eps, kparams)
    jax.block_until_ready((logits, means, log_var))

    # host-side: emulate the PyTorch decode loop's early break on EOS_token
    greedy = np.asarray(jnp.argmax(logits, axis=-1))
    T = MAX_LENGTH
    for t in range(MAX_LENGTH):
        if int(greedy[t]) == EOS_TOKEN:
            T = t + 1
            break
    output = np.asarray(logits)[:T].reshape(T, 1, VOCAB_OUT)       # torch.stack(decoder_output)
    means_out = np.asarray(means).reshape(1, 1, LINEAR)            # encoder hidden shape (1,1,32)
    log_var_out = np.asarray(log_var).reshape(1, 1, LINEAR)

    assert output.shape == (T, 1, VOCAB_OUT)
    assert means_out.shape == (1, 1, LINEAR)
    assert log_var_out.shape == (1, 1, LINEAR)
    assert np.all(np.isfinite(output)) and np.all(np.isfinite(means_out)) and np.all(np.isfinite(log_var_out))
    print("KERNEL_OK")
</pallas_src>

<mosaic_0001>
module attributes {stable_mosaic.version = 11 : i64} {
  func.func @cvae_kernel(%arg0: memref<8x1xi32, #tpu.memory_space<vmem>>, %arg1: memref<1x128xf32, #tpu.memory_space<vmem>>, %arg2: memref<1x32xf32, #tpu.memory_space<vmem>>, %arg3: memref<1x8xf32, #tpu.memory_space<vmem>>, %arg4: memref<128x512xf32, #tpu.memory_space<vmem>>, %arg5: memref<128x32xf32, #tpu.memory_space<vmem>>, %arg6: memref<1x32xf32, #tpu.memory_space<vmem>>, %arg7: memref<128x32xf32, #tpu.memory_space<vmem>>, %arg8: memref<1x32xf32, #tpu.memory_space<vmem>>, %arg9: memref<32x128xf32, #tpu.memory_space<vmem>>, %arg10: memref<8x128xf32, #tpu.memory_space<vmem>>, %arg11: memref<1x128xf32, #tpu.memory_space<vmem>>, %arg12: memref<128x512xf32, #tpu.memory_space<any>>, %arg13: memref<128x32xf32, #tpu.memory_space<any>>, %arg14: memref<1x32xf32, #tpu.memory_space<vmem>>, %arg15: memref<8x32xf32, #tpu.memory_space<vmem>>, %arg16: memref<1x32xf32, #tpu.memory_space<vmem>>, %arg17: memref<1x32xf32, #tpu.memory_space<vmem>>, %arg18: memref<128x512xf32, #tpu.memory_space<vmem>>, %arg19: memref<128x32xf32, #tpu.memory_space<vmem>>, %arg20: memref<2x!tpu.dma_semaphore, #tpu.memory_space<semaphore_mem>>) attributes {dimension_semantics = [], scalar_prefetch = 0 : i64, scratch_operands = 3 : i64, tpu.core_type = #tpu.core_type<tc>} {
    %c0_i32 = arith.constant 0 : i32
    %0 = tpu.memref_slice %arg20[%c0_i32] : memref<2x!tpu.dma_semaphore, #tpu.memory_space<semaphore_mem>> -> memref<1x!tpu.dma_semaphore, #tpu.memory_space<semaphore_mem>>
    %1 = tpu.memref_squeeze %0 : memref<1x!tpu.dma_semaphore, #tpu.memory_space<semaphore_mem>> -> memref<!tpu.dma_semaphore, #tpu.memory_space<semaphore_mem>>
    tpu.enqueue_dma source(%arg12 : memref<128x512xf32, #tpu.memory_space<any>>) target(%arg18 : memref<128x512xf32, #tpu.memory_space<vmem>>) target_semaphore(%1 : memref<!tpu.dma_semaphore, #tpu.memory_space<semaphore_mem>>)
    %c1_i32 = arith.constant 1 : i32
    %2 = tpu.memref_slice %arg20[%c1_i32] : memref<2x!tpu.dma_semaphore, #tpu.memory_space<semaphore_mem>> -> memref<1x!tpu.dma_semaphore, #tpu.memory_space<semaphore_mem>>
    %3 = tpu.memref_squeeze %2 : memref<1x!tpu.dma_semaphore, #tpu.memory_space<semaphore_mem>> -> memref<!tpu.dma_semaphore, #tpu.memory_space<semaphore_mem>>
    tpu.enqueue_dma source(%arg13 : memref<128x32xf32, #tpu.memory_space<any>>) target(%arg19 : memref<128x32xf32, #tpu.memory_space<vmem>>) target_semaphore(%3 : memref<!tpu.dma_semaphore, #tpu.memory_space<semaphore_mem>>)
    %4 = tpu.iota {dimensions = array<i32: 1>} : vector<8x128xi32>
    %c0 = arith.constant 0 : index
    %c0_0 = arith.constant 0 : index
    %5 = vector.load %arg0[%c0, %c0_0] : memref<8x1xi32, #tpu.memory_space<vmem>>, vector<8x1xi32>
    %c32_i32 = arith.constant 32 : i32
    %6 = vector.broadcast %c32_i32 : i32 to vector<8x1xi32>
    %7 = arith.addi %5, %6 : vector<8x1xi32>
    %8 = vector.broadcast %7 : vector<8x1xi32> to vector<8x128xi32>
    %9 = arith.cmpi eq, %4, %8 : vector<8x128xi32>
    %10 = arith.extui %9 : vector<8x128xi1> to vector<8x128xi32>
    %11 = arith.sitofp %10 : vector<8x128xi32> to vector<8x128xf32>
    %c0_1 = arith.constant 0 : index
    %c0_2 = arith.constant 0 : index
    %12 = vector.load %arg1[%c0_1, %c0_2] : memref<1x128xf32, #tpu.memory_space<vmem>>, vector<1x128xf32>
    %cst = arith.constant 0.000000e+00 : f32
    %13 = vector.broadcast %cst : f32 to vector<1x128xf32>
    %14 = vector.extract_strided_slice %11 {offsets = [0, 0], sizes = [1, 128], strides = [1, 1]} : vector<8x128xf32> to vector<1x128xf32>
    %15 = arith.addf %12, %14 : vector<1x128xf32>
    %c0_3 = arith.constant 0 : index
    %c0_4 = arith.constant 0 : index
    %16 = vector.load %arg4[%c0_3, %c0_4] : memref<128x512xf32, #tpu.memory_space<vmem>>, vector<128x512xf32>
    %cst_5 = arith.constant dense<0.000000e+00> : vector<1x512xf32>
    %17 = tpu.matmul %15, %16, %cst_5 {dimension_numbers = #tpu.dot_dimension_numbers<[1], [0], [0], [1], [0, 0, 1, 1], [], []>} : vector<1x128xf32>, vector<128x512xf32>, vector<1x512xf32> -> vector<1x512xf32>
    %18 = vector.extract_strided_slice %17 {offsets = [0, 0], sizes = [1, 128], strides = [1, 1]} : vector<1x512xf32> to vector<1x128xf32>
    %19 = arith.negf %18 : vector<1x128xf32>
    %20 = math.exp %19 : vector<1x128xf32>
    %cst_6 = arith.constant 1.000000e+00 : f32
    %21 = vector.broadcast %cst_6 : f32 to vector<1x128xf32>
    %22 = arith.addf %21, %20 : vector<1x128xf32>
    %23 = arith.divf %21, %22 : vector<1x128xf32>
    %24 = vector.extract_strided_slice %17 {offsets = [0, 128], sizes = [1, 128], strides = [1, 1]} : vector<1x512xf32> to vector<1x128xf32>
    %25 = arith.negf %24 : vector<1x128xf32>
    %26 = math.exp %25 : vector<1x128xf32>
    %cst_7 = arith.constant 1.000000e+00 : f32
    %27 = vector.broadcast %cst_7 : f32 to vector<1x128xf32>
    %28 = arith.addf %27, %26 : vector<1x128xf32>
    %29 = arith.divf %27, %28 : vector<1x128xf32>
    %30 = vector.extract_strided_slice %17 {offsets = [0, 256], sizes = [1, 128], strides = [1, 1]} : vector<1x512xf32> to vector<1x128xf32>
    %31 = math.tanh %30 : vector<1x128xf32>
    %32 = vector.extract_strided_slice %17 {offsets = [0, 384], sizes = [1, 128], strides = [1, 1]} : vector<1x512xf32> to vector<1x128xf32>
    %33 = arith.negf %32 : vector<1x128xf32>
    %34 = math.exp %33 : vector<1x128xf32>
    %cst_8 = arith.constant 1.000000e+00 : f32
    %35 = vector.broadcast %cst_8 : f32 to vector<1x128xf32>
    %36 = arith.addf %35, %34 : vector<1x128xf32>
    %37 = arith.divf %35, %36 : vector<1x128xf32>
    %38 = arith.mulf %29, %13 : vector<1x128xf32>
    %39 = arith.mulf %23, %31 : vector<1x128xf32>
    %40 = arith.addf %38, %39 : vector<1x128xf32>
    %41 = math.tanh %40 : vector<1x128xf32>
    %42 = arith.mulf %37, %41 : vector<1x128xf32>
    %43 = vector.extract_strided_slice %11 {offsets = [1, 0], sizes = [1, 128], strides = [1, 1]} : vector<8x128xf32> to vector<1x128xf32>
    %44 = arith.addf %42, %43 : vector<1x128xf32>
    %c0_9 = arith.constant 0 : index
    %c0_10 = arith.constant 0 : index
    %45 = vector.load %arg4[%c0_9, %c0_10] : memref<128x512xf32, #tpu.memory_space<vmem>>, vector<128x512xf32>
    %cst_11 = arith.constant dense<0.000000e+00> : vector<1x512xf32>
    %46 = tpu.matmul %44, %45, %cst_11 {dimension_numbers = #tpu.dot_dimension_numbers<[1], [0], [0], [1], [0, 0, 1, 1], [], []>} : vector<1x128xf32>, vector<128x512xf32>, vector<1x512xf32> -> vector<1x512xf32>
    %47 = vector.extract_strided_slice %46 {offsets = [0, 0], sizes = [1, 128], strides = [1, 1]} : vector<1x512xf32> to vector<1x128xf32>
    %48 = arith.negf %47 : vector<1x128xf32>
    %49 = math.exp %48 : vector<1x128xf32>
    %cst_12 = arith.constant 1.000000e+00 : f32
    %50 = vector.broadcast %cst_12 : f32 to vector<1x128xf32>
    %51 = arith.addf %50, %49 : vector<1x128xf32>
    %52 = arith.divf %50, %51 : vector<1x128xf32>
    %53 = vector.extract_strided_slice %46 {offsets = [0, 128], sizes = [1, 128], strides = [1, 1]} : vector<1x512xf32> to vector<1x128xf32>
    %54 = arith.negf %53 : vector<1x128xf32>
    %55 = math.exp %54 : vector<1x128xf32>
    %cst_13 = arith.constant 1.000000e+00 : f32
    %56 = vector.broadcast %cst_13 : f32 to vector<1x128xf32>
    %57 = arith.addf %56, %55 : vector<1x128xf32>
    %58 = arith.divf %56, %57 : vector<1x128xf32>
    %59 = vector.extract_strided_slice %46 {offsets = [0, 256], sizes = [1, 128], strides = [1, 1]} : vector<1x512xf32> to vector<1x128xf32>
    %60 = math.tanh %59 : vector<1x128xf32>
    %61 = vector.extract_strided_slice %46 {offsets = [0, 384], sizes = [1, 128], strides = [1, 1]} : vector<1x512xf32> to vector<1x128xf32>
    %62 = arith.negf %61 : vector<1x128xf32>
    %63 = math.exp %62 : vector<1x128xf32>
    %cst_14 = arith.constant 1.000000e+00 : f32
    %64 = vector.broadcast %cst_14 : f32 to vector<1x128xf32>
    %65 = arith.addf %64, %63 : vector<1x128xf32>
    %66 = arith.divf %64, %65 : vector<1x128xf32>
    %67 = arith.mulf %58, %40 : vector<1x128xf32>
    %68 = arith.mulf %52, %60 : vector<1x128xf32>
    %69 = arith.addf %67, %68 : vector<1x128xf32>
    %70 = math.tanh %69 : vector<1x128xf32>
    %71 = arith.mulf %66, %70 : vector<1x128xf32>
    %72 = vector.extract_strided_slice %11 {offsets = [2, 0], sizes = [1, 128], strides = [1, 1]} : vector<8x128xf32> to vector<1x128xf32>
    %73 = arith.addf %71, %72 : vector<1x128xf32>
    %c0_15 = arith.constant 0 : index
    %c0_16 = arith.constant 0 : index
    %74 = vector.load %arg4[%c0_15, %c0_16] : memref<128x512xf32, #tpu.memory_space<vmem>>, vector<128x512xf32>
    %cst_17 = arith.constant dense<0.000000e+00> : vector<1x512xf32>
    %75 = tpu.matmul %73, %74, %cst_17 {dimension_numbers = #tpu.dot_dimension_numbers<[1], [0], [0], [1], [0, 0, 1, 1], [], []>} : vector<1x128xf32>, vector<128x512xf32>, vector<1x512xf32> -> vector<1x512xf32>
    %76 = vector.extract_strided_slice %75 {offsets = [0, 0], sizes = [1, 128], strides = [1, 1]} : vector<1x512xf32> to vector<1x128xf32>
    %77 = arith.negf %76 : vector<1x128xf32>
    %78 = math.exp %77 : vector<1x128xf32>
    %cst_18 = arith.constant 1.000000e+00 : f32
    %79 = vector.broadcast %cst_18 : f32 to vector<1x128xf32>
    %80 = arith.addf %79, %78 : vector<1x128xf32>
    %81 = arith.divf %79, %80 : vector<1x128xf32>
    %82 = vector.extract_strided_slice %75 {offsets = [0, 128], sizes = [1, 128], strides = [1, 1]} : vector<1x512xf32> to vector<1x128xf32>
    %83 = arith.negf %82 : vector<1x128xf32>
    %84 = math.exp %83 : vector<1x128xf32>
    %cst_19 = arith.constant 1.000000e+00 : f32
    %85 = vector.broadcast %cst_19 : f32 to vector<1x128xf32>
    %86 = arith.addf %85, %84 : vector<1x128xf32>
    %87 = arith.divf %85, %86 : vector<1x128xf32>
    %88 = vector.extract_strided_slice %75 {offsets = [0, 256], sizes = [1, 128], strides = [1, 1]} : vector<1x512xf32> to vector<1x128xf32>
    %89 = math.tanh %88 : vector<1x128xf32>
    %90 = vector.extract_strided_slice %75 {offsets = [0, 384], sizes = [1, 128], strides = [1, 1]} : vector<1x512xf32> to vector<1x128xf32>
    %91 = arith.negf %90 : vector<1x128xf32>
    %92 = math.exp %91 : vector<1x128xf32>
    %cst_20 = arith.constant 1.000000e+00 : f32
    %93 = vector.broadcast %cst_20 : f32 to vector<1x128xf32>
    %94 = arith.addf %93, %92 : vector<1x128xf32>
    %95 = arith.divf %93, %94 : vector<1x128xf32>
    %96 = arith.mulf %87, %69 : vector<1x128xf32>
    %97 = arith.mulf %81, %89 : vector<1x128xf32>
    %98 = arith.addf %96, %97 : vector<1x128xf32>
    %99 = math.tanh %98 : vector<1x128xf32>
    %100 = arith.mulf %95, %99 : vector<1x128xf32>
    %101 = vector.extract_strided_slice %11 {offsets = [3, 0], sizes = [1, 128], strides = [1, 1]} : vector<8x128xf32> to vector<1x128xf32>
    %102 = arith.addf %100, %101 : vector<1x128xf32>
    %c0_21 = arith.constant 0 : index
    %c0_22 = arith.constant 0 : index
    %103 = vector.load %arg4[%c0_21, %c0_22] : memref<128x512xf32, #tpu.memory_space<vmem>>, vector<128x512xf32>
    %cst_23 = arith.constant dense<0.000000e+00> : vector<1x512xf32>
    %104 = tpu.matmul %102, %103, %cst_23 {dimension_numbers = #tpu.dot_dimension_numbers<[1], [0], [0], [1], [0, 0, 1, 1], [], []>} : vector<1x128xf32>, vector<128x512xf32>, vector<1x512xf32> -> vector<1x512xf32>
    %105 = vector.extract_strided_slice %104 {offsets = [0, 0], sizes = [1, 128], strides = [1, 1]} : vector<1x512xf32> to vector<1x128xf32>
    %106 = arith.negf %105 : vector<1x128xf32>
    %107 = math.exp %106 : vector<1x128xf32>
    %cst_24 = arith.constant 1.000000e+00 : f32
    %108 = vector.broadcast %cst_24 : f32 to vector<1x128xf32>
    %109 = arith.addf %108, %107 : vector<1x128xf32>
    %110 = arith.divf %108, %109 : vector<1x128xf32>
    %111 = vector.extract_strided_slice %104 {offsets = [0, 128], sizes = [1, 128], strides = [1, 1]} : vector<1x512xf32> to vector<1x128xf32>
    %112 = arith.negf %111 : vector<1x128xf32>
    %113 = math.exp %112 : vector<1x128xf32>
    %cst_25 = arith.constant 1.000000e+00 : f32
    %114 = vector.broadcast %cst_25 : f32 to vector<1x128xf32>
    %115 = arith.addf %114, %113 : vector<1x128xf32>
    %116 = arith.divf %114, %115 : vector<1x128xf32>
    %117 = vector.extract_strided_slice %104 {offsets = [0, 256], sizes = [1, 128], strides = [1, 1]} : vector<1x512xf32> to vector<1x128xf32>
    %118 = math.tanh %117 : vector<1x128xf32>
    %119 = vector.extract_strided_slice %104 {offsets = [0, 384], sizes = [1, 128], strides = [1, 1]} : vector<1x512xf32> to vector<1x128xf32>
    %120 = arith.negf %119 : vector<1x128xf32>
    %121 = math.exp %120 : vector<1x128xf32>
    %cst_26 = arith.constant 1.000000e+00 : f32
    %122 = vector.broadcast %cst_26 : f32 to vector<1x128xf32>
    %123 = arith.addf %122, %121 : vector<1x128xf32>
    %124 = arith.divf %122, %123 : vector<1x128xf32>
    %125 = arith.mulf %116, %98 : vector<1x128xf32>
    %126 = arith.mulf %110, %118 : vector<1x128xf32>
    %127 = arith.addf %125, %126 : vector<1x128xf32>
    %128 = math.tanh %127 : vector<1x128xf32>
    %129 = arith.mulf %124, %128 : vector<1x128xf32>
    %130 = vector.extract_strided_slice %11 {offsets = [4, 0], sizes = [1, 128], strides = [1, 1]} : vector<8x128xf32> to vector<1x128xf32>
    %131 = arith.addf %129, %130 : vector<1x128xf32>
    %c0_27 = arith.constant 0 : index
    %c0_28 = arith.constant 0 : index
    %132 = vector.load %arg4[%c0_27, %c0_28] : memref<128x512xf32, #tpu.memory_space<vmem>>, vector<128x512xf32>
    %cst_29 = arith.constant dense<0.000000e+00> : vector<1x512xf32>
    %133 = tpu.matmul %131, %132, %cst_29 {dimension_numbers = #tpu.dot_dimension_numbers<[1], [0], [0], [1], [0, 0, 1, 1], [], []>} : vector<1x128xf32>, vector<128x512xf32>, vector<1x512xf32> -> vector<1x512xf32>
    %134 = vector.extract_strided_slice %133 {offsets = [0, 0], sizes = [1, 128], strides = [1, 1]} : vector<1x512xf32> to vector<1x128xf32>
    %135 = arith.negf %134 : vector<1x128xf32>
    %136 = math.exp %135 : vector<1x128xf32>
    %cst_30 = arith.constant 1.000000e+00 : f32
    %137 = vector.broadcast %cst_30 : f32 to vector<1x128xf32>
    %138 = arith.addf %137, %136 : vector<1x128xf32>
    %139 = arith.divf %137, %138 : vector<1x128xf32>
    %140 = vector.extract_strided_slice %133 {offsets = [0, 128], sizes = [1, 128], strides = [1, 1]} : vector<1x512xf32> to vector<1x128xf32>
    %141 = arith.negf %140 : vector<1x128xf32>
    %142 = math.exp %141 : vector<1x128xf32>
    %cst_31 = arith.constant 1.000000e+00 : f32
    %143 = vector.broadcast %cst_31 : f32 to vector<1x128xf32>
    %144 = arith.addf %143, %142 : vector<1x128xf32>
    %145 = arith.divf %143, %144 : vector<1x128xf32>
    %146 = vector.extract_strided_slice %133 {offsets = [0, 256], sizes = [1, 128], strides = [1, 1]} : vector<1x512xf32> to vector<1x128xf32>
    %147 = math.tanh %146 : vector<1x128xf32>
    %148 = vector.extract_strided_slice %133 {offsets = [0, 384], sizes = [1, 128], strides = [1, 1]} : vector<1x512xf32> to vector<1x128xf32>
    %149 = arith.negf %148 : vector<1x128xf32>
    %150 = math.exp %149 : vector<1x128xf32>
    %cst_32 = arith.constant 1.000000e+00 : f32
    %151 = vector.broadcast %cst_32 : f32 to vector<1x128xf32>
    %152 = arith.addf %151, %150 : vector<1x128xf32>
    %153 = arith.divf %151, %152 : vector<1x128xf32>
    %154 = arith.mulf %145, %127 : vector<1x128xf32>
    %155 = arith.mulf %139, %147 : vector<1x128xf32>
    %156 = arith.addf %154, %155 : vector<1x128xf32>
    %157 = math.tanh %156 : vector<1x128xf32>
    %158 = arith.mulf %153, %157 : vector<1x128xf32>
    %159 = vector.extract_strided_slice %11 {offsets = [5, 0], sizes = [1, 128], strides = [1, 1]} : vector<8x128xf32> to vector<1x128xf32>
    %160 = arith.addf %158, %159 : vector<1x128xf32>
    %c0_33 = arith.constant 0 : index
    %c0_34 = arith.constant 0 : index
    %161 = vector.load %arg4[%c0_33, %c0_34] : memref<128x512xf32, #tpu.memory_space<vmem>>, vector<128x512xf32>
    %cst_35 = arith.constant dense<0.000000e+00> : vector<1x512xf32>
    %162 = tpu.matmul %160, %161, %cst_35 {dimension_numbers = #tpu.dot_dimension_numbers<[1], [0], [0], [1], [0, 0, 1, 1], [], []>} : vector<1x128xf32>, vector<128x512xf32>, vector<1x512xf32> -> vector<1x512xf32>
    %163 = vector.extract_strided_slice %162 {offsets = [0, 0], sizes = [1, 128], strides = [1, 1]} : vector<1x512xf32> to vector<1x128xf32>
    %164 = arith.negf %163 : vector<1x128xf32>
    %165 = math.exp %164 : vector<1x128xf32>
    %cst_36 = arith.constant 1.000000e+00 : f32
    %166 = vector.broadcast %cst_36 : f32 to vector<1x128xf32>
    %167 = arith.addf %166, %165 : vector<1x128xf32>
    %168 = arith.divf %166, %167 : vector<1x128xf32>
    %169 = vector.extract_strided_slice %162 {offsets = [0, 128], sizes = [1, 128], strides = [1, 1]} : vector<1x512xf32> to vector<1x128xf32>
    %170 = arith.negf %169 : vector<1x128xf32>
    %171 = math.exp %170 : vector<1x128xf32>
    %cst_37 = arith.constant 1.000000e+00 : f32
    %172 = vector.broadcast %cst_37 : f32 to vector<1x128xf32>
    %173 = arith.addf %172, %171 : vector<1x128xf32>
    %174 = arith.divf %172, %173 : vector<1x128xf32>
    %175 = vector.extract_strided_slice %162 {offsets = [0, 256], sizes = [1, 128], strides = [1, 1]} : vector<1x512xf32> to vector<1x128xf32>
    %176 = math.tanh %175 : vector<1x128xf32>
    %177 = vector.extract_strided_slice %162 {offsets = [0, 384], sizes = [1, 128], strides = [1, 1]} : vector<1x512xf32> to vector<1x128xf32>
    %178 = arith.negf %177 : vector<1x128xf32>
    %179 = math.exp %178 : vector<1x128xf32>
    %cst_38 = arith.constant 1.000000e+00 : f32
    %180 = vector.broadcast %cst_38 : f32 to vector<1x128xf32>
    %181 = arith.addf %180, %179 : vector<1x128xf32>
    %182 = arith.divf %180, %181 : vector<1x128xf32>
    %183 = arith.mulf %174, %156 : vector<1x128xf32>
    %184 = arith.mulf %168, %176 : vector<1x128xf32>
    %185 = arith.addf %183, %184 : vector<1x128xf32>
    %186 = math.tanh %185 : vector<1x128xf32>
    %187 = arith.mulf %182, %186 : vector<1x128xf32>
    %188 = vector.extract_strided_slice %11 {offsets = [6, 0], sizes = [1, 128], strides = [1, 1]} : vector<8x128xf32> to vector<1x128xf32>
    %189 = arith.addf %187, %188 : vector<1x128xf32>
    %c0_39 = arith.constant 0 : index
    %c0_40 = arith.constant 0 : index
    %190 = vector.load %arg4[%c0_39, %c0_40] : memref<128x512xf32, #tpu.memory_space<vmem>>, vector<128x512xf32>
    %cst_41 = arith.constant dense<0.000000e+00> : vector<1x512xf32>
    %191 = tpu.matmul %189, %190, %cst_41 {dimension_numbers = #tpu.dot_dimension_numbers<[1], [0], [0], [1], [0, 0, 1, 1], [], []>} : vector<1x128xf32>, vector<128x512xf32>, vector<1x512xf32> -> vector<1x512xf32>
    %192 = vector.extract_strided_slice %191 {offsets = [0, 0], sizes = [1, 128], strides = [1, 1]} : vector<1x512xf32> to vector<1x128xf32>
    %193 = arith.negf %192 : vector<1x128xf32>
    %194 = math.exp %193 : vector<1x128xf32>
    %cst_42 = arith.constant 1.000000e+00 : f32
    %195 = vector.broadcast %cst_42 : f32 to vector<1x128xf32>
    %196 = arith.addf %195, %194 : vector<1x128xf32>
    %197 = arith.divf %195, %196 : vector<1x128xf32>
    %198 = vector.extract_strided_slice %191 {offsets = [0, 128], sizes = [1, 128], strides = [1, 1]} : vector<1x512xf32> to vector<1x128xf32>
    %199 = arith.negf %198 : vector<1x128xf32>
    %200 = math.exp %199 : vector<1x128xf32>
    %cst_43 = arith.constant 1.000000e+00 : f32
    %201 = vector.broadcast %cst_43 : f32 to vector<1x128xf32>
    %202 = arith.addf %201, %200 : vector<1x128xf32>
    %203 = arith.divf %201, %202 : vector<1x128xf32>
    %204 = vector.extract_strided_slice %191 {offsets = [0, 256], sizes = [1, 128], strides = [1, 1]} : vector<1x512xf32> to vector<1x128xf32>
    %205 = math.tanh %204 : vector<1x128xf32>
    %206 = vector.extract_strided_slice %191 {offsets = [0, 384], sizes = [1, 128], strides = [1, 1]} : vector<1x512xf32> to vector<1x128xf32>
    %207 = arith.negf %206 : vector<1x128xf32>
    %208 = math.exp %207 : vector<1x128xf32>
    %cst_44 = arith.constant 1.000000e+00 : f32
    %209 = vector.broadcast %cst_44 : f32 to vector<1x128xf32>
    %210 = arith.addf %209, %208 : vector<1x128xf32>
    %211 = arith.divf %209, %210 : vector<1x128xf32>
    %212 = arith.mulf %203, %185 : vector<1x128xf32>
    %213 = arith.mulf %197, %205 : vector<1x128xf32>
    %214 = arith.addf %212, %213 : vector<1x128xf32>
    %215 = math.tanh %214 : vector<1x128xf32>
    %216 = arith.mulf %211, %215 : vector<1x128xf32>
    %217 = vector.extract_strided_slice %11 {offsets = [7, 0], sizes = [1, 128], strides = [1, 1]} : vector<8x128xf32> to vector<1x128xf32>
    %218 = arith.addf %216, %217 : vector<1x128xf32>
    %c0_45 = arith.constant 0 : index
    %c0_46 = arith.constant 0 : index
    %219 = vector.load %arg4[%c0_45, %c0_46] : memref<128x512xf32, #tpu.memory_space<vmem>>, vector<128x512xf32>
    %cst_47 = arith.constant dense<0.000000e+00> : vector<1x512xf32>
    %220 = tpu.matmul %218, %219, %cst_47 {dimension_numbers = #tpu.dot_dimension_numbers<[1], [0], [0], [1], [0, 0, 1, 1], [], []>} : vector<1x128xf32>, vector<128x512xf32>, vector<1x512xf32> -> vector<1x512xf32>
    %221 = vector.extract_strided_slice %220 {offsets = [0, 0], sizes = [1, 128], strides = [1, 1]} : vector<1x512xf32> to vector<1x128xf32>
    %222 = arith.negf %221 : vector<1x128xf32>
    %223 = math.exp %222 : vector<1x128xf32>
    %cst_48 = arith.constant 1.000000e+00 : f32
    %224 = vector.broadcast %cst_48 : f32 to vector<1x128xf32>
    %225 = arith.addf %224, %223 : vector<1x128xf32>
    %226 = arith.divf %224, %225 : vector<1x128xf32>
    %227 = vector.extract_strided_slice %220 {offsets = [0, 128], sizes = [1, 128], strides = [1, 1]} : vector<1x512xf32> to vector<1x128xf32>
    %228 = arith.negf %227 : vector<1x128xf32>
    %229 = math.exp %228 : vector<1x128xf32>
    %cst_49 = arith.constant 1.000000e+00 : f32
    %230 = vector.broadcast %cst_49 : f32 to vector<1x128xf32>
    %231 = arith.addf %230, %229 : vector<1x128xf32>
    %232 = arith.divf %230, %231 : vector<1x128xf32>
    %233 = vector.extract_strided_slice %220 {offsets = [0, 256], sizes = [1, 128], strides = [1, 1]} : vector<1x512xf32> to vector<1x128xf32>
    %234 = math.tanh %233 : vector<1x128xf32>
    %235 = vector.extract_strided_slice %220 {offsets = [0, 384], sizes = [1, 128], strides = [1, 1]} : vector<1x512xf32> to vector<1x128xf32>
    %236 = arith.negf %235 : vector<1x128xf32>
    %237 = math.exp %236 : vector<1x128xf32>
    %cst_50 = arith.constant 1.000000e+00 : f32
    %238 = vector.broadcast %cst_50 : f32 to vector<1x128xf32>
    %239 = arith.addf %238, %237 : vector<1x128xf32>
    %240 = arith.divf %238, %239 : vector<1x128xf32>
    %241 = arith.mulf %232, %214 : vector<1x128xf32>
    %242 = arith.mulf %226, %234 : vector<1x128xf32>
    %243 = arith.addf %241, %242 : vector<1x128xf32>
    %244 = math.tanh %243 : vector<1x128xf32>
    %245 = arith.mulf %240, %244 : vector<1x128xf32>
    %c0_51 = arith.constant 0 : index
    %c0_52 = arith.constant 0 : index
    %246 = vector.load %arg5[%c0_51, %c0_52] : memref<128x32xf32, #tpu.memory_space<vmem>>, vector<128x32xf32>
    %cst_53 = arith.constant dense<0.000000e+00> : vector<1x32xf32>
    %247 = tpu.matmul %245, %246, %cst_53 {dimension_numbers = #tpu.dot_dimension_numbers<[1], [0], [0], [1], [0, 0, 1, 1], [], []>} : vector<1x128xf32>, vector<128x32xf32>, vector<1x32xf32> -> vector<1x32xf32>
    %c0_54 = arith.constant 0 : index
    %c0_55 = arith.constant 0 : index
    %248 = vector.load %arg6[%c0_54, %c0_55] : memref<1x32xf32, #tpu.memory_space<vmem>>, vector<1x32xf32>
    %249 = arith.addf %247, %248 : vector<1x32xf32>
    %c0_56 = arith.constant 0 : index
    %c0_57 = arith.constant 0 : index
    %250 = vector.load %arg7[%c0_56, %c0_57] : memref<128x32xf32, #tpu.memory_space<vmem>>, vector<128x32xf32>
    %cst_58 = arith.constant dense<0.000000e+00> : vector<1x32xf32>
    %251 = tpu.matmul %245, %250, %cst_58 {dimension_numbers = #tpu.dot_dimension_numbers<[1], [0], [0], [1], [0, 0, 1, 1], [], []>} : vector<1x128xf32>, vector<128x32xf32>, vector<1x32xf32> -> vector<1x32xf32>
    %c0_59 = arith.constant 0 : index
    %c0_60 = arith.constant 0 : index
    %252 = vector.load %arg8[%c0_59, %c0_60] : memref<1x32xf32, #tpu.memory_space<vmem>>, vector<1x32xf32>
    %253 = arith.addf %251, %252 : vector<1x32xf32>
    %c0_61 = arith.constant 0 : index
    %c0_62 = arith.constant 0 : index
    %254 = vector.load %arg16[%c0_61, %c0_62] : memref<1x32xf32, #tpu.memory_space<vmem>>, vector<1x32xf32>
    tpu.vector_store %arg16[%c0_61, %c0_62], %249 {strides = array<i32>} : memref<1x32xf32, #tpu.memory_space<vmem>>, vector<1x32xf32>,
    %c0_63 = arith.constant 0 : index
    %c0_64 = arith.constant 0 : index
    %255 = vector.load %arg17[%c0_63, %c0_64] : memref<1x32xf32, #tpu.memory_space<vmem>>, vector<1x32xf32>
    tpu.vector_store %arg17[%c0_63, %c0_64], %253 {strides = array<i32>} : memref<1x32xf32, #tpu.memory_space<vmem>>, vector<1x32xf32>,
    %c0_65 = arith.constant 0 : index
    %c0_66 = arith.constant 0 : index
    %256 = vector.load %arg2[%c0_65, %c0_66] : memref<1x32xf32, #tpu.memory_space<vmem>>, vector<1x32xf32>
    %cst_67 = arith.constant 5.000000e-01 : f32
    %257 = vector.broadcast %cst_67 : f32 to vector<1x32xf32>
    %258 = arith.mulf %257, %253 : vector<1x32xf32>
    %259 = math.exp %258 : vector<1x32xf32>
    %260 = arith.mulf %256, %259 : vector<1x32xf32>
    %261 = arith.addf %260, %249 : vector<1x32xf32>
    %c0_68 = arith.constant 0 : index
    %c0_69 = arith.constant 0 : index
    %262 = vector.load %arg9[%c0_68, %c0_69] : memref<32x128xf32, #tpu.memory_space<vmem>>, vector<32x128xf32>
    %cst_70 = arith.constant dense<0.000000e+00> : vector<1x128xf32>
    %263 = tpu.matmul %261, %262, %cst_70 {dimension_numbers = #tpu.dot_dimension_numbers<[1], [0], [0], [1], [0, 0, 1, 1], [], []>} : vector<1x32xf32>, vector<32x128xf32>, vector<1x128xf32> -> vector<1x128xf32>
    %c0_71 = arith.constant 0 : index
    %c0_72 = arith.constant 0 : index
    %264 = vector.load %arg3[%c0_71, %c0_72] : memref<1x8xf32, #tpu.memory_space<vmem>>, vector<1x8xf32>
    %c0_73 = arith.constant 0 : index
    %c0_74 = arith.constant 0 : index
    %265 = vector.load %arg10[%c0_73, %c0_74] : memref<8x128xf32, #tpu.memory_space<vmem>>, vector<8x128xf32>
    %cst_75 = arith.constant dense<0.000000e+00> : vector<1x128xf32>
    %266 = tpu.matmul %264, %265, %cst_75 {dimension_numbers = #tpu.dot_dimension_numbers<[1], [0], [0], [1], [0, 0, 1, 1], [], []>} : vector<1x8xf32>, vector<8x128xf32>, vector<1x128xf32> -> vector<1x128xf32>
    %267 = arith.addf %263, %266 : vector<1x128xf32>
    %c0_76 = arith.constant 0 : index
    %c0_77 = arith.constant 0 : index
    %268 = vector.load %arg11[%c0_76, %c0_77] : memref<1x128xf32, #tpu.memory_space<vmem>>, vector<1x128xf32>
    %269 = arith.addf %267, %268 : vector<1x128xf32>
    %cst_78 = arith.constant 0.000000e+00 : f32
    %270 = vector.broadcast %cst_78 : f32 to vector<1x128xf32>
    %271 = tpu.iota {dimensions = array<i32: 1>} : vector<1x128xi32>
    %272 = tpu.iota {dimensions = array<i32: 1>} : vector<1x32xi32>
    %c32_i32_79 = arith.constant 32 : i32
    %273 = vector.broadcast %c32_i32_79 : i32 to vector<1x128xi32>
    %274 = arith.cmpi eq, %271, %273 : vector<1x128xi32>
    %275 = arith.extui %274 : vector<1x128xi1> to vector<1x128xi32>
    %276 = arith.sitofp %275 : vector<1x128xi32> to vector<1x128xf32>
    %c0_i32_80 = arith.constant 0 : i32
    %277 = tpu.memref_slice %arg20[%c0_i32_80] : memref<2x!tpu.dma_semaphore, #tpu.memory_space<semaphore_mem>> -> memref<1x!tpu.dma_semaphore, #tpu.memory_space<semaphore_mem>>
    %278 = tpu.memref_squeeze %277 : memref<1x!tpu.dma_semaphore, #tpu.memory_space<semaphore_mem>> -> memref<!tpu.dma_semaphore, #tpu.memory_space<semaphore_mem>>
    tpu.wait_dma2 semaphore(%278 : memref<!tpu.dma_semaphore, #tpu.memory_space<semaphore_mem>>) src(%arg12 : memref<128x512xf32, #tpu.memory_space<any>>) dst(%arg18 : memref<128x512xf32, #tpu.memory_space<vmem>>)
    %c1_i32_81 = arith.constant 1 : i32
    %279 = tpu.memref_slice %arg20[%c1_i32_81] : memref<2x!tpu.dma_semaphore, #tpu.memory_space<semaphore_mem>> -> memref<1x!tpu.dma_semaphore, #tpu.memory_space<semaphore_mem>>
    %280 = tpu.memref_squeeze %279 : memref<1x!tpu.dma_semaphore, #tpu.memory_space<semaphore_mem>> -> memref<!tpu.dma_semaphore, #tpu.memory_space<semaphore_mem>>
    tpu.wait_dma2 semaphore(%280 : memref<!tpu.dma_semaphore, #tpu.memory_space<semaphore_mem>>) src(%arg13 : memref<128x32xf32, #tpu.memory_space<any>>) dst(%arg19 : memref<128x32xf32, #tpu.memory_space<vmem>>)
    %281 = arith.addf %269, %276 : vector<1x128xf32>
    %c0_82 = arith.constant 0 : index
    %c0_83 = arith.constant 0 : index
    %282 = vector.load %arg18[%c0_82, %c0_83] : memref<128x512xf32, #tpu.memory_space<vmem>>, vector<128x512xf32>
    %cst_84 = arith.constant dense<0.000000e+00> : vector<1x512xf32>
    %283 = tpu.matmul %281, %282, %cst_84 {dimension_numbers = #tpu.dot_dimension_numbers<[1], [0], [0], [1], [0, 0, 1, 1], [], []>} : vector<1x128xf32>, vector<128x512xf32>, vector<1x512xf32> -> vector<1x512xf32>
    %284 = vector.extract_strided_slice %283 {offsets = [0, 0], sizes = [1, 128], strides = [1, 1]} : vector<1x512xf32> to vector<1x128xf32>
    %285 = arith.negf %284 : vector<1x128xf32>
    %286 = math.exp %285 : vector<1x128xf32>
    %cst_85 = arith.constant 1.000000e+00 : f32
    %287 = vector.broadcast %cst_85 : f32 to vector<1x128xf32>
    %288 = arith.addf %287, %286 : vector<1x128xf32>
    %289 = arith.divf %287, %288 : vector<1x128xf32>
    %290 = vector.extract_strided_slice %283 {offsets = [0, 128], sizes = [1, 128], strides = [1, 1]} : vector<1x512xf32> to vector<1x128xf32>
    %291 = arith.negf %290 : vector<1x128xf32>
    %292 = math.exp %291 : vector<1x128xf32>
    %cst_86 = arith.constant 1.000000e+00 : f32
    %293 = vector.broadcast %cst_86 : f32 to vector<1x128xf32>
    %294 = arith.addf %293, %292 : vector<1x128xf32>
    %295 = arith.divf %293, %294 : vector<1x128xf32>
    %296 = vector.extract_strided_slice %283 {offsets = [0, 256], sizes = [1, 128], strides = [1, 1]} : vector<1x512xf32> to vector<1x128xf32>
    %297 = math.tanh %296 : vector<1x128xf32>
    %298 = vector.extract_strided_slice %283 {offsets = [0, 384], sizes = [1, 128], strides = [1, 1]} : vector<1x512xf32> to vector<1x128xf32>
    %299 = arith.negf %298 : vector<1x128xf32>
    %300 = math.exp %299 : vector<1x128xf32>
    %cst_87 = arith.constant 1.000000e+00 : f32
    %301 = vector.broadcast %cst_87 : f32 to vector<1x128xf32>
    %302 = arith.addf %301, %300 : vector<1x128xf32>
    %303 = arith.divf %301, %302 : vector<1x128xf32>
    %304 = arith.mulf %295, %270 : vector<1x128xf32>
    %305 = arith.mulf %289, %297 : vector<1x128xf32>
    %306 = arith.addf %304, %305 : vector<1x128xf32>
    %307 = math.tanh %306 : vector<1x128xf32>
    %308 = arith.mulf %303, %307 : vector<1x128xf32>
    %c0_88 = arith.constant 0 : index
    %c0_89 = arith.constant 0 : index
    %309 = vector.load %arg19[%c0_88, %c0_89] : memref<128x32xf32, #tpu.memory_space<vmem>>, vector<128x32xf32>
    %cst_90 = arith.constant dense<0.000000e+00> : vector<1x32xf32>
    %310 = tpu.matmul %308, %309, %cst_90 {dimension_numbers = #tpu.dot_dimension_numbers<[1], [0], [0], [1], [0, 0, 1, 1], [], []>} : vector<1x128xf32>, vector<128x32xf32>, vector<1x32xf32> -> vector<1x32xf32>
    %c0_91 = arith.constant 0 : index
    %c0_92 = arith.constant 0 : index
    %311 = vector.load %arg14[%c0_91, %c0_92] : memref<1x32xf32, #tpu.memory_space<vmem>>, vector<1x32xf32>
    %312 = arith.addf %310, %311 : vector<1x32xf32>
    %cst_93 = arith.constant dense<0xFF800000> : vector<1xf32>
    %313 = vector.multi_reduction <maximumf>, %312, %cst_93 [1] : vector<1x32xf32> to vector<1xf32>
    %314 = vector.shape_cast %313 : vector<1xf32> to vector<1x1xf32>
    %315 = vector.broadcast %314 : vector<1x1xf32> to vector<1x32xf32>
    %316 = arith.cmpf oeq, %312, %315 : vector<1x32xf32>
    %c32_i32_94 = arith.constant 32 : i32
    %317 = vector.broadcast %c32_i32_94 : i32 to vector<1x32xi32>
    %318 = arith.select %316, %272, %317 : vector<1x32xi1>, vector<1x32xi32>
    %cst_95 = arith.constant dense<2147483647> : vector<1xi32>
    %319 = vector.multi_reduction <minsi>, %318, %cst_95 [1] : vector<1x32xi32> to vector<1xi32>
    %320 = vector.shape_cast %319 : vector<1xi32> to vector<1x1xi32>
    %c32_i32_96 = arith.constant 32 : i32
    %321 = vector.broadcast %c32_i32_96 : i32 to vector<1x1xi32>
    %322 = arith.addi %320, %321 : vector<1x1xi32>
    %323 = vector.broadcast %322 : vector<1x1xi32> to vector<1x128xi32>
    %324 = arith.cmpi eq, %271, %323 : vector<1x128xi32>
    %325 = arith.extui %324 : vector<1x128xi1> to vector<1x128xi32>
    %326 = arith.sitofp %325 : vector<1x128xi32> to vector<1x128xf32>
    %327 = arith.addf %308, %326 : vector<1x128xf32>
    %c0_97 = arith.constant 0 : index
    %c0_98 = arith.constant 0 : index
    %328 = vector.load %arg18[%c0_97, %c0_98] : memref<128x512xf32, #tpu.memory_space<vmem>>, vector<128x512xf32>
    %cst_99 = arith.constant dense<0.000000e+00> : vector<1x512xf32>
    %329 = tpu.matmul %327, %328, %cst_99 {dimension_numbers = #tpu.dot_dimension_numbers<[1], [0], [0], [1], [0, 0, 1, 1], [], []>} : vector<1x128xf32>, vector<128x512xf32>, vector<1x512xf32> -> vector<1x512xf32>
    %330 = vector.extract_strided_slice %329 {offsets = [0, 0], sizes = [1, 128], strides = [1, 1]} : vector<1x512xf32> to vector<1x128xf32>
    %331 = arith.negf %330 : vector<1x128xf32>
    %332 = math.exp %331 : vector<1x128xf32>
    %cst_100 = arith.constant 1.000000e+00 : f32
    %333 = vector.broadcast %cst_100 : f32 to vector<1x128xf32>
    %334 = arith.addf %333, %332 : vector<1x128xf32>
    %335 = arith.divf %333, %334 : vector<1x128xf32>
    %336 = vector.extract_strided_slice %329 {offsets = [0, 128], sizes = [1, 128], strides = [1, 1]} : vector<1x512xf32> to vector<1x128xf32>
    %337 = arith.negf %336 : vector<1x128xf32>
    %338 = math.exp %337 : vector<1x128xf32>
    %cst_101 = arith.constant 1.000000e+00 : f32
    %339 = vector.broadcast %cst_101 : f32 to vector<1x128xf32>
    %340 = arith.addf %339, %338 : vector<1x128xf32>
    %341 = arith.divf %339, %340 : vector<1x128xf32>
    %342 = vector.extract_strided_slice %329 {offsets = [0, 256], sizes = [1, 128], strides = [1, 1]} : vector<1x512xf32> to vector<1x128xf32>
    %343 = math.tanh %342 : vector<1x128xf32>
    %344 = vector.extract_strided_slice %329 {offsets = [0, 384], sizes = [1, 128], strides = [1, 1]} : vector<1x512xf32> to vector<1x128xf32>
    %345 = arith.negf %344 : vector<1x128xf32>
    %346 = math.exp %345 : vector<1x128xf32>
    %cst_102 = arith.constant 1.000000e+00 : f32
    %347 = vector.broadcast %cst_102 : f32 to vector<1x128xf32>
    %348 = arith.addf %347, %346 : vector<1x128xf32>
    %349 = arith.divf %347, %348 : vector<1x128xf32>
    %350 = arith.mulf %341, %306 : vector<1x128xf32>
    %351 = arith.mulf %335, %343 : vector<1x128xf32>
    %352 = arith.addf %350, %351 : vector<1x128xf32>
    %353 = math.tanh %352 : vector<1x128xf32>
    %354 = arith.mulf %349, %353 : vector<1x128xf32>
    %c0_103 = arith.constant 0 : index
    %c0_104 = arith.constant 0 : index
    %355 = vector.load %arg19[%c0_103, %c0_104] : memref<128x32xf32, #tpu.memory_space<vmem>>, vector<128x32xf32>
    %cst_105 = arith.constant dense<0.000000e+00> : vector<1x32xf32>
    %356 = tpu.matmul %354, %355, %cst_105 {dimension_numbers = #tpu.dot_dimension_numbers<[1], [0], [0], [1], [0, 0, 1, 1], [], []>} : vector<1x128xf32>, vector<128x32xf32>, vector<1x32xf32> -> vector<1x32xf32>
    %c0_106 = arith.constant 0 : index
    %c0_107 = arith.constant 0 : index
    %357 = vector.load %arg14[%c0_106, %c0_107] : memref<1x32xf32, #tpu.memory_space<vmem>>, vector<1x32xf32>
    %358 = arith.addf %356, %357 : vector<1x32xf32>
    %cst_108 = arith.constant dense<0xFF800000> : vector<1xf32>
    %359 = vector.multi_reduction <maximumf>, %358, %cst_108 [1] : vector<1x32xf32> to vector<1xf32>
    %360 = vector.shape_cast %359 : vector<1xf32> to vector<1x1xf32>
    %361 = vector.broadcast %360 : vector<1x1xf32> to vector<1x32xf32>
    %362 = arith.cmpf oeq, %358, %361 : vector<1x32xf32>
    %c32_i32_109 = arith.constant 32 : i32
    %363 = vector.broadcast %c32_i32_109 : i32 to vector<1x32xi32>
    %364 = arith.select %362, %272, %363 : vector<1x32xi1>, vector<1x32xi32>
    %cst_110 = arith.constant dense<2147483647> : vector<1xi32>
    %365 = vector.multi_reduction <minsi>, %364, %cst_110 [1] : vector<1x32xi32> to vector<1xi32>
    %366 = vector.shape_cast %365 : vector<1xi32> to vector<1x1xi32>
    %c32_i32_111 = arith.constant 32 : i32
    %367 = vector.broadcast %c32_i32_111 : i32 to vector<1x1xi32>
    %368 = arith.addi %366, %367 : vector<1x1xi32>
    %369 = vector.broadcast %368 : vector<1x1xi32> to vector<1x128xi32>
    %370 = arith.cmpi eq, %271, %369 : vector<1x128xi32>
    %371 = arith.extui %370 : vector<1x128xi1> to vector<1x128xi32>
    %372 = arith.sitofp %371 : vector<1x128xi32> to vector<1x128xf32>
    %373 = arith.addf %354, %372 : vector<1x128xf32>
    %c0_112 = arith.constant 0 : index
    %c0_113 = arith.constant 0 : index
    %374 = vector.load %arg18[%c0_112, %c0_113] : memref<128x512xf32, #tpu.memory_space<vmem>>, vector<128x512xf32>
    %cst_114 = arith.constant dense<0.000000e+00> : vector<1x512xf32>
    %375 = tpu.matmul %373, %374, %cst_114 {dimension_numbers = #tpu.dot_dimension_numbers<[1], [0], [0], [1], [0, 0, 1, 1], [], []>} : vector<1x128xf32>, vector<128x512xf32>, vector<1x512xf32> -> vector<1x512xf32>
    %376 = vector.extract_strided_slice %375 {offsets = [0, 0], sizes = [1, 128], strides = [1, 1]} : vector<1x512xf32> to vector<1x128xf32>
    %377 = arith.negf %376 : vector<1x128xf32>
    %378 = math.exp %377 : vector<1x128xf32>
    %cst_115 = arith.constant 1.000000e+00 : f32
    %379 = vector.broadcast %cst_115 : f32 to vector<1x128xf32>
    %380 = arith.addf %379, %378 : vector<1x128xf32>
    %381 = arith.divf %379, %380 : vector<1x128xf32>
    %382 = vector.extract_strided_slice %375 {offsets = [0, 128], sizes = [1, 128], strides = [1, 1]} : vector<1x512xf32> to vector<1x128xf32>
    %383 = arith.negf %382 : vector<1x128xf32>
    %384 = math.exp %383 : vector<1x128xf32>
    %cst_116 = arith.constant 1.000000e+00 : f32
    %385 = vector.broadcast %cst_116 : f32 to vector<1x128xf32>
    %386 = arith.addf %385, %384 : vector<1x128xf32>
    %387 = arith.divf %385, %386 : vector<1x128xf32>
    %388 = vector.extract_strided_slice %375 {offsets = [0, 256], sizes = [1, 128], strides = [1, 1]} : vector<1x512xf32> to vector<1x128xf32>
    %389 = math.tanh %388 : vector<1x128xf32>
    %390 = vector.extract_strided_slice %375 {offsets = [0, 384], sizes = [1, 128], strides = [1, 1]} : vector<1x512xf32> to vector<1x128xf32>
    %391 = arith.negf %390 : vector<1x128xf32>
    %392 = math.exp %391 : vector<1x128xf32>
    %cst_117 = arith.constant 1.000000e+00 : f32
    %393 = vector.broadcast %cst_117 : f32 to vector<1x128xf32>
    %394 = arith.addf %393, %392 : vector<1x128xf32>
    %395 = arith.divf %393, %394 : vector<1x128xf32>
    %396 = arith.mulf %387, %352 : vector<1x128xf32>
    %397 = arith.mulf %381, %389 : vector<1x128xf32>
    %398 = arith.addf %396, %397 : vector<1x128xf32>
    %399 = math.tanh %398 : vector<1x128xf32>
    %400 = arith.mulf %395, %399 : vector<1x128xf32>
    %c0_118 = arith.constant 0 : index
    %c0_119 = arith.constant 0 : index
    %401 = vector.load %arg19[%c0_118, %c0_119] : memref<128x32xf32, #tpu.memory_space<vmem>>, vector<128x32xf32>
    %cst_120 = arith.constant dense<0.000000e+00> : vector<1x32xf32>
    %402 = tpu.matmul %400, %401, %cst_120 {dimension_numbers = #tpu.dot_dimension_numbers<[1], [0], [0], [1], [0, 0, 1, 1], [], []>} : vector<1x128xf32>, vector<128x32xf32>, vector<1x32xf32> -> vector<1x32xf32>
    %c0_121 = arith.constant 0 : index
    %c0_122 = arith.constant 0 : index
    %403 = vector.load %arg14[%c0_121, %c0_122] : memref<1x32xf32, #tpu.memory_space<vmem>>, vector<1x32xf32>
    %404 = arith.addf %402, %403 : vector<1x32xf32>
    %cst_123 = arith.constant dense<0xFF800000> : vector<1xf32>
    %405 = vector.multi_reduction <maximumf>, %404, %cst_123 [1] : vector<1x32xf32> to vector<1xf32>
    %406 = vector.shape_cast %405 : vector<1xf32> to vector<1x1xf32>
    %407 = vector.broadcast %406 : vector<1x1xf32> to vector<1x32xf32>
    %408 = arith.cmpf oeq, %404, %407 : vector<1x32xf32>
    %c32_i32_124 = arith.constant 32 : i32
    %409 = vector.broadcast %c32_i32_124 : i32 to vector<1x32xi32>
    %410 = arith.select %408, %272, %409 : vector<1x32xi1>, vector<1x32xi32>
    %cst_125 = arith.constant dense<2147483647> : vector<1xi32>
    %411 = vector.multi_reduction <minsi>, %410, %cst_125 [1] : vector<1x32xi32> to vector<1xi32>
    %412 = vector.shape_cast %411 : vector<1xi32> to vector<1x1xi32>
    %c32_i32_126 = arith.constant 32 : i32
    %413 = vector.broadcast %c32_i32_126 : i32 to vector<1x1xi32>
    %414 = arith.addi %412, %413 : vector<1x1xi32>
    %415 = vector.broadcast %414 : vector<1x1xi32> to vector<1x128xi32>
    %416 = arith.cmpi eq, %271, %415 : vector<1x128xi32>
    %417 = arith.extui %416 : vector<1x128xi1> to vector<1x128xi32>
    %418 = arith.sitofp %417 : vector<1x128xi32> to vector<1x128xf32>
    %419 = arith.addf %400, %418 : vector<1x128xf32>
    %c0_127 = arith.constant 0 : index
    %c0_128 = arith.constant 0 : index
    %420 = vector.load %arg18[%c0_127, %c0_128] : memref<128x512xf32, #tpu.memory_space<vmem>>, vector<128x512xf32>
    %cst_129 = arith.constant dense<0.000000e+00> : vector<1x512xf32>
    %421 = tpu.matmul %419, %420, %cst_129 {dimension_numbers = #tpu.dot_dimension_numbers<[1], [0], [0], [1], [0, 0, 1, 1], [], []>} : vector<1x128xf32>, vector<128x512xf32>, vector<1x512xf32> -> vector<1x512xf32>
    %422 = vector.extract_strided_slice %421 {offsets = [0, 0], sizes = [1, 128], strides = [1, 1]} : vector<1x512xf32> to vector<1x128xf32>
    %423 = arith.negf %422 : vector<1x128xf32>
    %424 = math.exp %423 : vector<1x128xf32>
    %cst_130 = arith.constant 1.000000e+00 : f32
    %425 = vector.broadcast %cst_130 : f32 to vector<1x128xf32>
    %426 = arith.addf %425, %424 : vector<1x128xf32>
    %427 = arith.divf %425, %426 : vector<1x128xf32>
    %428 = vector.extract_strided_slice %421 {offsets = [0, 128], sizes = [1, 128], strides = [1, 1]} : vector<1x512xf32> to vector<1x128xf32>
    %429 = arith.negf %428 : vector<1x128xf32>
    %430 = math.exp %429 : vector<1x128xf32>
    %cst_131 = arith.constant 1.000000e+00 : f32
    %431 = vector.broadcast %cst_131 : f32 to vector<1x128xf32>
    %432 = arith.addf %431, %430 : vector<1x128xf32>
    %433 = arith.divf %431, %432 : vector<1x128xf32>
    %434 = vector.extract_strided_slice %421 {offsets = [0, 256], sizes = [1, 128], strides = [1, 1]} : vector<1x512xf32> to vector<1x128xf32>
    %435 = math.tanh %434 : vector<1x128xf32>
    %436 = vector.extract_strided_slice %421 {offsets = [0, 384], sizes = [1, 128], strides = [1, 1]} : vector<1x512xf32> to vector<1x128xf32>
    %437 = arith.negf %436 : vector<1x128xf32>
    %438 = math.exp %437 : vector<1x128xf32>
    %cst_132 = arith.constant 1.000000e+00 : f32
    %439 = vector.broadcast %cst_132 : f32 to vector<1x128xf32>
    %440 = arith.addf %439, %438 : vector<1x128xf32>
    %441 = arith.divf %439, %440 : vector<1x128xf32>
    %442 = arith.mulf %433, %398 : vector<1x128xf32>
    %443 = arith.mulf %427, %435 : vector<1x128xf32>
    %444 = arith.addf %442, %443 : vector<1x128xf32>
    %445 = math.tanh %444 : vector<1x128xf32>
    %446 = arith.mulf %441, %445 : vector<1x128xf32>
    %c0_133 = arith.constant 0 : index
    %c0_134 = arith.constant 0 : index
    %447 = vector.load %arg19[%c0_133, %c0_134] : memref<128x32xf32, #tpu.memory_space<vmem>>, vector<128x32xf32>
    %cst_135 = arith.constant dense<0.000000e+00> : vector<1x32xf32>
    %448 = tpu.matmul %446, %447, %cst_135 {dimension_numbers = #tpu.dot_dimension_numbers<[1], [0], [0], [1], [0, 0, 1, 1], [], []>} : vector<1x128xf32>, vector<128x32xf32>, vector<1x32xf32> -> vector<1x32xf32>
    %c0_136 = arith.constant 0 : index
    %c0_137 = arith.constant 0 : index
    %449 = vector.load %arg14[%c0_136, %c0_137] : memref<1x32xf32, #tpu.memory_space<vmem>>, vector<1x32xf32>
    %450 = arith.addf %448, %449 : vector<1x32xf32>
    %cst_138 = arith.constant dense<0xFF800000> : vector<1xf32>
    %451 = vector.multi_reduction <maximumf>, %450, %cst_138 [1] : vector<1x32xf32> to vector<1xf32>
    %452 = vector.shape_cast %451 : vector<1xf32> to vector<1x1xf32>
    %453 = vector.broadcast %452 : vector<1x1xf32> to vector<1x32xf32>
    %454 = arith.cmpf oeq, %450, %453 : vector<1x32xf32>
    %c32_i32_139 = arith.constant 32 : i32
    %455 = vector.broadcast %c32_i32_139 : i32 to vector<1x32xi32>
    %456 = arith.select %454, %272, %455 : vector<1x32xi1>, vector<1x32xi32>
    %cst_140 = arith.constant dense<2147483647> : vector<1xi32>
    %457 = vector.multi_reduction <minsi>, %456, %cst_140 [1] : vector<1x32xi32> to vector<1xi32>
    %458 = vector.shape_cast %457 : vector<1xi32> to vector<1x1xi32>
    %c32_i32_141 = arith.constant 32 : i32
    %459 = vector.broadcast %c32_i32_141 : i32 to vector<1x1xi32>
    %460 = arith.addi %458, %459 : vector<1x1xi32>
    %461 = vector.broadcast %460 : vector<1x1xi32> to vector<1x128xi32>
    %462 = arith.cmpi eq, %271, %461 : vector<1x128xi32>
    %463 = arith.extui %462 : vector<1x128xi1> to vector<1x128xi32>
    %464 = arith.sitofp %463 : vector<1x128xi32> to vector<1x128xf32>
    %465 = arith.addf %446, %464 : vector<1x128xf32>
    %c0_142 = arith.constant 0 : index
    %c0_143 = arith.constant 0 : index
    %466 = vector.load %arg18[%c0_142, %c0_143] : memref<128x512xf32, #tpu.memory_space<vmem>>, vector<128x512xf32>
    %cst_144 = arith.constant dense<0.000000e+00> : vector<1x512xf32>
    %467 = tpu.matmul %465, %466, %cst_144 {dimension_numbers = #tpu.dot_dimension_numbers<[1], [0], [0], [1], [0, 0, 1, 1], [], []>} : vector<1x128xf32>, vector<128x512xf32>, vector<1x512xf32> -> vector<1x512xf32>
    %468 = vector.extract_strided_slice %467 {offsets = [0, 0], sizes = [1, 128], strides = [1, 1]} : vector<1x512xf32> to vector<1x128xf32>
    %469 = arith.negf %468 : vector<1x128xf32>
    %470 = math.exp %469 : vector<1x128xf32>
    %cst_145 = arith.constant 1.000000e+00 : f32
    %471 = vector.broadcast %cst_145 : f32 to vector<1x128xf32>
    %472 = arith.addf %471, %470 : vector<1x128xf32>
    %473 = arith.divf %471, %472 : vector<1x128xf32>
    %474 = vector.extract_strided_slice %467 {offsets = [0, 128], sizes = [1, 128], strides = [1, 1]} : vector<1x512xf32> to vector<1x128xf32>
    %475 = arith.negf %474 : vector<1x128xf32>
    %476 = math.exp %475 : vector<1x128xf32>
    %cst_146 = arith.constant 1.000000e+00 : f32
    %477 = vector.broadcast %cst_146 : f32 to vector<1x128xf32>
    %478 = arith.addf %477, %476 : vector<1x128xf32>
    %479 = arith.divf %477, %478 : vector<1x128xf32>
    %480 = vector.extract_strided_slice %467 {offsets = [0, 256], sizes = [1, 128], strides = [1, 1]} : vector<1x512xf32> to vector<1x128xf32>
    %481 = math.tanh %480 : vector<1x128xf32>
    %482 = vector.extract_strided_slice %467 {offsets = [0, 384], sizes = [1, 128], strides = [1, 1]} : vector<1x512xf32> to vector<1x128xf32>
    %483 = arith.negf %482 : vector<1x128xf32>
    %484 = math.exp %483 : vector<1x128xf32>
    %cst_147 = arith.constant 1.000000e+00 : f32
    %485 = vector.broadcast %cst_147 : f32 to vector<1x128xf32>
    %486 = arith.addf %485, %484 : vector<1x128xf32>
    %487 = arith.divf %485, %486 : vector<1x128xf32>
    %488 = arith.mulf %479, %444 : vector<1x128xf32>
    %489 = arith.mulf %473, %481 : vector<1x128xf32>
    %490 = arith.addf %488, %489 : vector<1x128xf32>
    %491 = math.tanh %490 : vector<1x128xf32>
    %492 = arith.mulf %487, %491 : vector<1x128xf32>
    %c0_148 = arith.constant 0 : index
    %c0_149 = arith.constant 0 : index
    %493 = vector.load %arg19[%c0_148, %c0_149] : memref<128x32xf32, #tpu.memory_space<vmem>>, vector<128x32xf32>
    %cst_150 = arith.constant dense<0.000000e+00> : vector<1x32xf32>
    %494 = tpu.matmul %492, %493, %cst_150 {dimension_numbers = #tpu.dot_dimension_numbers<[1], [0], [0], [1], [0, 0, 1, 1], [], []>} : vector<1x128xf32>, vector<128x32xf32>, vector<1x32xf32> -> vector<1x32xf32>
    %c0_151 = arith.constant 0 : index
    %c0_152 = arith.constant 0 : index
    %495 = vector.load %arg14[%c0_151, %c0_152] : memref<1x32xf32, #tpu.memory_space<vmem>>, vector<1x32xf32>
    %496 = arith.addf %494, %495 : vector<1x32xf32>
    %cst_153 = arith.constant dense<0xFF800000> : vector<1xf32>
    %497 = vector.multi_reduction <maximumf>, %496, %cst_153 [1] : vector<1x32xf32> to vector<1xf32>
    %498 = vector.shape_cast %497 : vector<1xf32> to vector<1x1xf32>
    %499 = vector.broadcast %498 : vector<1x1xf32> to vector<1x32xf32>
    %500 = arith.cmpf oeq, %496, %499 : vector<1x32xf32>
    %c32_i32_154 = arith.constant 32 : i32
    %501 = vector.broadcast %c32_i32_154 : i32 to vector<1x32xi32>
    %502 = arith.select %500, %272, %501 : vector<1x32xi1>, vector<1x32xi32>
    %cst_155 = arith.constant dense<2147483647> : vector<1xi32>
    %503 = vector.multi_reduction <minsi>, %502, %cst_155 [1] : vector<1x32xi32> to vector<1xi32>
    %504 = vector.shape_cast %503 : vector<1xi32> to vector<1x1xi32>
    %c32_i32_156 = arith.constant 32 : i32
    %505 = vector.broadcast %c32_i32_156 : i32 to vector<1x1xi32>
    %506 = arith.addi %504, %505 : vector<1x1xi32>
    %507 = vector.broadcast %506 : vector<1x1xi32> to vector<1x128xi32>
    %508 = arith.cmpi eq, %271, %507 : vector<1x128xi32>
    %509 = arith.extui %508 : vector<1x128xi1> to vector<1x128xi32>
    %510 = arith.sitofp %509 : vector<1x128xi32> to vector<1x128xf32>
    %511 = arith.addf %492, %510 : vector<1x128xf32>
    %c0_157 = arith.constant 0 : index
    %c0_158 = arith.constant 0 : index
    %512 = vector.load %arg18[%c0_157, %c0_158] : memref<128x512xf32, #tpu.memory_space<vmem>>, vector<128x512xf32>
    %cst_159 = arith.constant dense<0.000000e+00> : vector<1x512xf32>
    %513 = tpu.matmul %511, %512, %cst_159 {dimension_numbers = #tpu.dot_dimension_numbers<[1], [0], [0], [1], [0, 0, 1, 1], [], []>} : vector<1x128xf32>, vector<128x512xf32>, vector<1x512xf32> -> vector<1x512xf32>
    %514 = vector.extract_strided_slice %513 {offsets = [0, 0], sizes = [1, 128], strides = [1, 1]} : vector<1x512xf32> to vector<1x128xf32>
    %515 = arith.negf %514 : vector<1x128xf32>
    %516 = math.exp %515 : vector<1x128xf32>
    %cst_160 = arith.constant 1.000000e+00 : f32
    %517 = vector.broadcast %cst_160 : f32 to vector<1x128xf32>
    %518 = arith.addf %517, %516 : vector<1x128xf32>
    %519 = arith.divf %517, %518 : vector<1x128xf32>
    %520 = vector.extract_strided_slice %513 {offsets = [0, 128], sizes = [1, 128], strides = [1, 1]} : vector<1x512xf32> to vector<1x128xf32>
    %521 = arith.negf %520 : vector<1x128xf32>
    %522 = math.exp %521 : vector<1x128xf32>
    %cst_161 = arith.constant 1.000000e+00 : f32
    %523 = vector.broadcast %cst_161 : f32 to vector<1x128xf32>
    %524 = arith.addf %523, %522 : vector<1x128xf32>
    %525 = arith.divf %523, %524 : vector<1x128xf32>
    %526 = vector.extract_strided_slice %513 {offsets = [0, 256], sizes = [1, 128], strides = [1, 1]} : vector<1x512xf32> to vector<1x128xf32>
    %527 = math.tanh %526 : vector<1x128xf32>
    %528 = vector.extract_strided_slice %513 {offsets = [0, 384], sizes = [1, 128], strides = [1, 1]} : vector<1x512xf32> to vector<1x128xf32>
    %529 = arith.negf %528 : vector<1x128xf32>
    %530 = math.exp %529 : vector<1x128xf32>
    %cst_162 = arith.constant 1.000000e+00 : f32
    %531 = vector.broadcast %cst_162 : f32 to vector<1x128xf32>
    %532 = arith.addf %531, %530 : vector<1x128xf32>
    %533 = arith.divf %531, %532 : vector<1x128xf32>
    %534 = arith.mulf %525, %490 : vector<1x128xf32>
    %535 = arith.mulf %519, %527 : vector<1x128xf32>
    %536 = arith.addf %534, %535 : vector<1x128xf32>
    %537 = math.tanh %536 : vector<1x128xf32>
    %538 = arith.mulf %533, %537 : vector<1x128xf32>
    %c0_163 = arith.constant 0 : index
    %c0_164 = arith.constant 0 : index
    %539 = vector.load %arg19[%c0_163, %c0_164] : memref<128x32xf32, #tpu.memory_space<vmem>>, vector<128x32xf32>
    %cst_165 = arith.constant dense<0.000000e+00> : vector<1x32xf32>
    %540 = tpu.matmul %538, %539, %cst_165 {dimension_numbers = #tpu.dot_dimension_numbers<[1], [0], [0], [1], [0, 0, 1, 1], [], []>} : vector<1x128xf32>, vector<128x32xf32>, vector<1x32xf32> -> vector<1x32xf32>
    %c0_166 = arith.constant 0 : index
    %c0_167 = arith.constant 0 : index
    %541 = vector.load %arg14[%c0_166, %c0_167] : memref<1x32xf32, #tpu.memory_space<vmem>>, vector<1x32xf32>
    %542 = arith.addf %540, %541 : vector<1x32xf32>
    %cst_168 = arith.constant dense<0xFF800000> : vector<1xf32>
    %543 = vector.multi_reduction <maximumf>, %542, %cst_168 [1] : vector<1x32xf32> to vector<1xf32>
    %544 = vector.shape_cast %543 : vector<1xf32> to vector<1x1xf32>
    %545 = vector.broadcast %544 : vector<1x1xf32> to vector<1x32xf32>
    %546 = arith.cmpf oeq, %542, %545 : vector<1x32xf32>
    %c32_i32_169 = arith.constant 32 : i32
    %547 = vector.broadcast %c32_i32_169 : i32 to vector<1x32xi32>
    %548 = arith.select %546, %272, %547 : vector<1x32xi1>, vector<1x32xi32>
    %cst_170 = arith.constant dense<2147483647> : vector<1xi32>
    %549 = vector.multi_reduction <minsi>, %548, %cst_170 [1] : vector<1x32xi32> to vector<1xi32>
    %550 = vector.shape_cast %549 : vector<1xi32> to vector<1x1xi32>
    %c32_i32_171 = arith.constant 32 : i32
    %551 = vector.broadcast %c32_i32_171 : i32 to vector<1x1xi32>
    %552 = arith.addi %550, %551 : vector<1x1xi32>
    %553 = vector.broadcast %552 : vector<1x1xi32> to vector<1x128xi32>
    %554 = arith.cmpi eq, %271, %553 : vector<1x128xi32>
    %555 = arith.extui %554 : vector<1x128xi1> to vector<1x128xi32>
    %556 = arith.sitofp %555 : vector<1x128xi32> to vector<1x128xf32>
    %557 = arith.addf %538, %556 : vector<1x128xf32>
    %c0_172 = arith.constant 0 : index
    %c0_173 = arith.constant 0 : index
    %558 = vector.load %arg18[%c0_172, %c0_173] : memref<128x512xf32, #tpu.memory_space<vmem>>, vector<128x512xf32>
    %cst_174 = arith.constant dense<0.000000e+00> : vector<1x512xf32>
    %559 = tpu.matmul %557, %558, %cst_174 {dimension_numbers = #tpu.dot_dimension_numbers<[1], [0], [0], [1], [0, 0, 1, 1], [], []>} : vector<1x128xf32>, vector<128x512xf32>, vector<1x512xf32> -> vector<1x512xf32>
    %560 = vector.extract_strided_slice %559 {offsets = [0, 0], sizes = [1, 128], strides = [1, 1]} : vector<1x512xf32> to vector<1x128xf32>
    %561 = arith.negf %560 : vector<1x128xf32>
    %562 = math.exp %561 : vector<1x128xf32>
    %cst_175 = arith.constant 1.000000e+00 : f32
    %563 = vector.broadcast %cst_175 : f32 to vector<1x128xf32>
    %564 = arith.addf %563, %562 : vector<1x128xf32>
    %565 = arith.divf %563, %564 : vector<1x128xf32>
    %566 = vector.extract_strided_slice %559 {offsets = [0, 128], sizes = [1, 128], strides = [1, 1]} : vector<1x512xf32> to vector<1x128xf32>
    %567 = arith.negf %566 : vector<1x128xf32>
    %568 = math.exp %567 : vector<1x128xf32>
    %cst_176 = arith.constant 1.000000e+00 : f32
    %569 = vector.broadcast %cst_176 : f32 to vector<1x128xf32>
    %570 = arith.addf %569, %568 : vector<1x128xf32>
    %571 = arith.divf %569, %570 : vector<1x128xf32>
    %572 = vector.extract_strided_slice %559 {offsets = [0, 256], sizes = [1, 128], strides = [1, 1]} : vector<1x512xf32> to vector<1x128xf32>
    %573 = math.tanh %572 : vector<1x128xf32>
    %574 = vector.extract_strided_slice %559 {offsets = [0, 384], sizes = [1, 128], strides = [1, 1]} : vector<1x512xf32> to vector<1x128xf32>
    %575 = arith.negf %574 : vector<1x128xf32>
    %576 = math.exp %575 : vector<1x128xf32>
    %cst_177 = arith.constant 1.000000e+00 : f32
    %577 = vector.broadcast %cst_177 : f32 to vector<1x128xf32>
    %578 = arith.addf %577, %576 : vector<1x128xf32>
    %579 = arith.divf %577, %578 : vector<1x128xf32>
    %580 = arith.mulf %571, %536 : vector<1x128xf32>
    %581 = arith.mulf %565, %573 : vector<1x128xf32>
    %582 = arith.addf %580, %581 : vector<1x128xf32>
    %583 = math.tanh %582 : vector<1x128xf32>
    %584 = arith.mulf %579, %583 : vector<1x128xf32>
    %c0_178 = arith.constant 0 : index
    %c0_179 = arith.constant 0 : index
    %585 = vector.load %arg19[%c0_178, %c0_179] : memref<128x32xf32, #tpu.memory_space<vmem>>, vector<128x32xf32>
    %cst_180 = arith.constant dense<0.000000e+00> : vector<1x32xf32>
    %586 = tpu.matmul %584, %585, %cst_180 {dimension_numbers = #tpu.dot_dimension_numbers<[1], [0], [0], [1], [0, 0, 1, 1], [], []>} : vector<1x128xf32>, vector<128x32xf32>, vector<1x32xf32> -> vector<1x32xf32>
    %c0_181 = arith.constant 0 : index
    %c0_182 = arith.constant 0 : index
    %587 = vector.load %arg14[%c0_181, %c0_182] : memref<1x32xf32, #tpu.memory_space<vmem>>, vector<1x32xf32>
    %588 = arith.addf %586, %587 : vector<1x32xf32>
    %cst_183 = arith.constant dense<0xFF800000> : vector<1xf32>
    %589 = vector.multi_reduction <maximumf>, %588, %cst_183 [1] : vector<1x32xf32> to vector<1xf32>
    %590 = vector.shape_cast %589 : vector<1xf32> to vector<1x1xf32>
    %591 = vector.broadcast %590 : vector<1x1xf32> to vector<1x32xf32>
    %592 = arith.cmpf oeq, %588, %591 : vector<1x32xf32>
    %c32_i32_184 = arith.constant 32 : i32
    %593 = vector.broadcast %c32_i32_184 : i32 to vector<1x32xi32>
    %594 = arith.select %592, %272, %593 : vector<1x32xi1>, vector<1x32xi32>
    %cst_185 = arith.constant dense<2147483647> : vector<1xi32>
    %595 = vector.multi_reduction <minsi>, %594, %cst_185 [1] : vector<1x32xi32> to vector<1xi32>
    %596 = vector.shape_cast %595 : vector<1xi32> to vector<1x1xi32>
    %c32_i32_186 = arith.constant 32 : i32
    %597 = vector.broadcast %c32_i32_186 : i32 to vector<1x1xi32>
    %598 = arith.addi %596, %597 : vector<1x1xi32>
    %599 = vector.broadcast %598 : vector<1x1xi32> to vector<1x128xi32>
    %600 = arith.cmpi eq, %271, %599 : vector<1x128xi32>
    %601 = arith.extui %600 : vector<1x128xi1> to vector<1x128xi32>
    %602 = arith.sitofp %601 : vector<1x128xi32> to vector<1x128xf32>
    %603 = arith.addf %584, %602 : vector<1x128xf32>
    %c0_187 = arith.constant 0 : index
    %c0_188 = arith.constant 0 : index
    %604 = vector.load %arg18[%c0_187, %c0_188] : memref<128x512xf32, #tpu.memory_space<vmem>>, vector<128x512xf32>
    %cst_189 = arith.constant dense<0.000000e+00> : vector<1x512xf32>
    %605 = tpu.matmul %603, %604, %cst_189 {dimension_numbers = #tpu.dot_dimension_numbers<[1], [0], [0], [1], [0, 0, 1, 1], [], []>} : vector<1x128xf32>, vector<128x512xf32>, vector<1x512xf32> -> vector<1x512xf32>
    %606 = vector.extract_strided_slice %605 {offsets = [0, 0], sizes = [1, 128], strides = [1, 1]} : vector<1x512xf32> to vector<1x128xf32>
    %607 = arith.negf %606 : vector<1x128xf32>
    %608 = math.exp %607 : vector<1x128xf32>
    %cst_190 = arith.constant 1.000000e+00 : f32
    %609 = vector.broadcast %cst_190 : f32 to vector<1x128xf32>
    %610 = arith.addf %609, %608 : vector<1x128xf32>
    %611 = arith.divf %609, %610 : vector<1x128xf32>
    %612 = vector.extract_strided_slice %605 {offsets = [0, 128], sizes = [1, 128], strides = [1, 1]} : vector<1x512xf32> to vector<1x128xf32>
    %613 = arith.negf %612 : vector<1x128xf32>
    %614 = math.exp %613 : vector<1x128xf32>
    %cst_191 = arith.constant 1.000000e+00 : f32
    %615 = vector.broadcast %cst_191 : f32 to vector<1x128xf32>
    %616 = arith.addf %615, %614 : vector<1x128xf32>
    %617 = arith.divf %615, %616 : vector<1x128xf32>
    %618 = vector.extract_strided_slice %605 {offsets = [0, 256], sizes = [1, 128], strides = [1, 1]} : vector<1x512xf32> to vector<1x128xf32>
    %619 = math.tanh %618 : vector<1x128xf32>
    %620 = vector.extract_strided_slice %605 {offsets = [0, 384], sizes = [1, 128], strides = [1, 1]} : vector<1x512xf32> to vector<1x128xf32>
    %621 = arith.negf %620 : vector<1x128xf32>
    %622 = math.exp %621 : vector<1x128xf32>
    %cst_192 = arith.constant 1.000000e+00 : f32
    %623 = vector.broadcast %cst_192 : f32 to vector<1x128xf32>
    %624 = arith.addf %623, %622 : vector<1x128xf32>
    %625 = arith.divf %623, %624 : vector<1x128xf32>
    %626 = arith.mulf %617, %582 : vector<1x128xf32>
    %627 = arith.mulf %611, %619 : vector<1x128xf32>
    %628 = arith.addf %626, %627 : vector<1x128xf32>
    %629 = math.tanh %628 : vector<1x128xf32>
    %630 = arith.mulf %625, %629 : vector<1x128xf32>
    %c0_193 = arith.constant 0 : index
    %c0_194 = arith.constant 0 : index
    %631 = vector.load %arg19[%c0_193, %c0_194] : memref<128x32xf32, #tpu.memory_space<vmem>>, vector<128x32xf32>
    %cst_195 = arith.constant dense<0.000000e+00> : vector<1x32xf32>
    %632 = tpu.matmul %630, %631, %cst_195 {dimension_numbers = #tpu.dot_dimension_numbers<[1], [0], [0], [1], [0, 0, 1, 1], [], []>} : vector<1x128xf32>, vector<128x32xf32>, vector<1x32xf32> -> vector<1x32xf32>
    %c0_196 = arith.constant 0 : index
    %c0_197 = arith.constant 0 : index
    %633 = vector.load %arg14[%c0_196, %c0_197] : memref<1x32xf32, #tpu.memory_space<vmem>>, vector<1x32xf32>
    %634 = arith.addf %632, %633 : vector<1x32xf32>
    %635 = tpu.concatenate %312, %358, %404, %450, %496, %542, %588, %634 in 0 : vector<1x32xf32>, vector<1x32xf32>, vector<1x32xf32>, vector<1x32xf32>, vector<1x32xf32>, vector<1x32xf32>, vector<1x32xf32>, vector<1x32xf32> -> vector<8x32xf32>
    %c0_198 = arith.constant 0 : index
    %c0_199 = arith.constant 0 : index
    %636 = vector.load %arg15[%c0_198, %c0_199] : memref<8x32xf32, #tpu.memory_space<vmem>>, vector<8x32xf32>
    tpu.vector_store %arg15[%c0_198, %c0_199], %635 {strides = array<i32>} : memref<8x32xf32, #tpu.memory_space<vmem>>, vector<8x32xf32>,
    return
  }
}

</mosaic_0001>

<bundles_post_ra>
// kernel: cvae_forward.1
= control target key start
LH: loop header
LB: loop body
LE: loop exit
PB: predicated region body
PF: predicated region fallthrough
CT: control target
= control target key end

     0   :  { %s8267_s0 = inlined_call_operand.vmem [shape: s32[8,1], index: 0, kind: input, shape index: {}]   ;;  %s8268_s1 = inlined_call_operand.vmem [shape: f32[1,128], index: 1, kind: input, shape index: {}]   ;;  %s8269_s2 = inlined_call_operand.vmem [shape: f32[1,32], index: 2, kind: input, shape index: {}]   ;;  %s8270_s3 = inlined_call_operand.hbm [shape: f32[1,8], index: 3, kind: input, shape index: {}]   ;;  %s8271_s4 = inlined_call_operand.vmem [shape: f32[128,512], index: 4, kind: input, shape index: {}]   ;;  %s8272_s5 = inlined_call_operand.vmem [shape: f32[128,32], index: 5, kind: input, shape index: {}]   ;;  %s8273_s6 = inlined_call_operand.hbm [shape: f32[1,32], index: 6, kind: input, shape index: {}]   ;;  %s8274_s7 = inlined_call_operand.vmem [shape: f32[128,32], index: 7, kind: input, shape index: {}]   ;;  %s8275_s8 = inlined_call_operand.hbm [shape: f32[1,32], index: 8, kind: input, shape index: {}]   ;;  %s8276_s9 = inlined_call_operand.hbm [shape: f32[32,128], index: 9, kind: input, shape index: {}]   ;;  %s8277_s10 = inlined_call_operand.hbm [shape: f32[8,128], index: 10, kind: input, shape index: {}]   ;;  %s8278_s11 = inlined_call_operand.vmem [shape: f32[1,128], index: 11, kind: input, shape index: {}]   ;;  %s8279_s12 = inlined_call_operand.hbm [shape: f32[128,512], index: 12, kind: input, shape index: {}]   ;;  %s8280_s13 = inlined_call_operand.vmem [shape: f32[128,32], index: 13, kind: input, shape index: {}]   ;;  %s8281_s14 = inlined_call_operand.hbm [shape: f32[1,32], index: 14, kind: input, shape index: {}]   ;;  %s8282_s15 = inlined_call_operand.hbm [shape: f32[8,32], index: 15, kind: output, shape index: {0}]   ;;  %s8283_s16 = inlined_call_operand.hbm [shape: f32[1,32], index: 16, kind: output, shape index: {1}]   ;;  %s8284_s17 = inlined_call_operand.hbm [shape: f32[1,32], index: 17, kind: output, shape index: {2}]  }
   0x1   :  { %8293 = sst [smem:[#allocation39_spill]] %s8267_s0 }
   0x2   :  { %8294 = sst [smem:[#allocation40_spill]] %s8268_s1 }
   0x3   :  { %23 = vsyncpa [#allocation6], 0 }
   0x4   :  { %24 = vsyncpa [#allocation9], 0 }
   0x5   :  { %25 = vsyncpa [#allocation12], 0 }
   0x6   :  { %26 = vsyncpa [#allocation15], 0 }
   0x7   :  { %27 = vsyncpa [#allocation7], 0 }
   0x8   :  { %28 = vsyncpa [#allocation18], 0  ;;  %s6615_s24 = smov [#allocation8]   ;;  %s6616_s26 = smov [#allocation11]  }
   0x9   :  { %s55_s25 = sshll.u32 %s6615_s24, 4  ;;  %s76_s27 = sshll.u32 %s6616_s26, 4  ;;  %s56_s25 = int_to_ptr.vmem [resolvable:$true] %s55_s25  ;;  %s6721_s27 = int_to_ptr.vmem [resolvable:$true] %s76_s27 }
   0xa   :  { %s6379_s0 = scalar_lea.hbm %s8273_s6, 16 }
   0xb   :  { %p6380_p0 = scmp.ne.s32.totalorder %s8273_s6, %s6379_s0  ;;  %p6383_p1 = scmp.lt.u32.totalorder %s6379_s0, %s8273_s6 }
   0xd   :  { %p6385_p2 = pnand %p6383_p1, %p6380_p0 }
   0xf   :  { %6388 = shalt.err (!%p6385_p2)
}
  0x10   :  { %s6389_s20 = scalar_lea.vmem %s56_s25, 16  ;;  %s6393_s21 = scalar_lea.vmem %s56_s25, 32 }
  0x11   :  { %p6390_p3 = scmp.ne.s32.totalorder %s56_s25, %s6389_s20  ;;  %p6394_p4 = scmp.lt.s32.totalorder %s56_s25, %s56_s25 }
  0x12   :  { %p6395_p5 = scmp.lt.s32.totalorder %s6393_s21, %s6389_s20 }
  0x14   :  { %p6396_p6 = por %p6395_p5, %p6394_p4 }
  0x16   :  { %p6397_p7 = pnand %p6396_p6, %p6390_p3 }
  0x18   :  { %6400 = shalt.err (!%p6397_p7)
}
  0x19   :  { %58 = dma.hbm_to_vmem [thread:$0]  %s8273_s6, 16, %s56_s25, [#allocation9]  }
  0x1a   :  { %s6401_s28 = scalar_lea.hbm %s8276_s9, 512 }
  0x1b   :  { %p6402_p8 = scmp.ne.s32.totalorder %s8276_s9, %s6401_s28  ;;  %p6405_p9 = scmp.lt.u32.totalorder %s6401_s28, %s8276_s9 }
  0x1d   :  { %p6407_p10 = pnand %p6405_p9, %p6402_p8 }
  0x1f   :  { %6410 = shalt.err (!%p6407_p10)
}
  0x20   :  { %s6411_s19 = scalar_lea.vmem %s6721_s27, 512  ;;  %p6416_p12 = scmp.lt.s32.totalorder %s6721_s27, %s6721_s27 }
  0x21   :  { %p6412_p11 = scmp.ne.s32.totalorder %s6721_s27, %s6411_s19  ;;  %p6417_p13 = scmp.lt.s32.totalorder %s6411_s19, %s6411_s19 }
  0x23   :  { %p6418_p0 = por %p6417_p13, %p6416_p12 }
  0x25   :  { %p6419_p1 = pnand %p6418_p0, %p6412_p11 }
  0x27   :  { %6422 = shalt.err (!%p6419_p1)
}
  0x28   :  { %s6617_s6 = smov 128   ;;  %s6618_s25 = smov 8  }
  0x29   :  { %82 = dma.hbm_to_vmem [thread:$0]  %s8276_s9, 512, %s6721_s27, [#allocation12], %s6617_s6, %s6617_s6, %s6618_s25  }
  0x2a   :  { %s6619_s21 = smov [#allocation5]   ;;  %s6620_s23 = smov [#allocation10]  }
  0x2b   :  { %s41_s22 = sshll.u32 %s6619_s21, 4  ;;  %s67_s24 = sshll.u32 %s6620_s23, 4  ;;  %s42_s22 = int_to_ptr.vmem [resolvable:$true] %s41_s22  ;;  %s68_s24 = int_to_ptr.vmem [resolvable:$true] %s67_s24 }
  0x2c   :  { %s6423_s29 = scalar_lea.hbm %s8270_s3, 16 }
  0x2d   :  { %p6424_p2 = scmp.ne.s32.totalorder %s8270_s3, %s6423_s29  ;;  %p6427_p3 = scmp.lt.u32.totalorder %s6423_s29, %s8270_s3 }
  0x2f   :  { %p6429_p4 = pnand %p6427_p3, %p6424_p2 }
  0x31   :  { %6432 = shalt.err (!%p6429_p4)
}
  0x32   :  { %s6433_s9 = scalar_lea.vmem %s42_s22, 16  ;;  %s6437_s27 = scalar_lea.vmem %s42_s22, 32 }
  0x33   :  { %p6434_p5 = scmp.ne.s32.totalorder %s42_s22, %s6433_s9  ;;  %p6438_p6 = scmp.lt.s32.totalorder %s42_s22, %s42_s22 }
  0x34   :  { %p6439_p7 = scmp.lt.s32.totalorder %s6437_s27, %s6433_s9 }
  0x36   :  { %p6440_p8 = por %p6439_p7, %p6438_p6 }
  0x38   :  { %p6441_p9 = pnand %p6440_p8, %p6434_p5 }
  0x3a   :  { %6444 = shalt.err (!%p6441_p9)
}
  0x3b   :  { %44 = dma.hbm_to_vmem [thread:$0]  %s8270_s3, 16, %s42_s22, [#allocation6]  }
  0x3c   :  { %s6445_s21 = scalar_lea.hbm %s8275_s8, 16 }
  0x3d   :  { %p6446_p10 = scmp.ne.s32.totalorder %s8275_s8, %s6445_s21  ;;  %p6449_p11 = scmp.lt.u32.totalorder %s6445_s21, %s8275_s8 }
  0x3f   :  { %p6451_p12 = pnand %p6449_p11, %p6446_p10 }
  0x41   :  { %6454 = shalt.err (!%p6451_p12)
}
  0x42   :  { %s6455_s0 = scalar_lea.vmem %s68_s24, 16  ;;  %s6459_s30 = scalar_lea.vmem %s68_s24, 32 }
  0x43   :  { %p6456_p13 = scmp.ne.s32.totalorder %s68_s24, %s6455_s0  ;;  %p6460_p0 = scmp.lt.s32.totalorder %s68_s24, %s68_s24 }
  0x44   :  { %p6461_p1 = scmp.lt.s32.totalorder %s6459_s30, %s6455_s0 }
  0x46   :  { %p6462_p2 = por %p6461_p1, %p6460_p0 }
  0x48   :  { %p6463_p3 = pnand %p6462_p2, %p6456_p13 }
  0x4a   :  { %6466 = shalt.err (!%p6463_p3)
}
  0x4b   :  { %70 = dma.hbm_to_vmem [thread:$0]  %s8275_s8, 16, %s68_s24, [#allocation9]  }
  0x4c   :  { %s6621_s18 = smov [#allocation13]   ;;  %s6622_s9 = smov [#allocation14]  }
  0x4d   :  { %s89_s19 = sshll.u32 %s6621_s18, 4  ;;  %s101_s27 = sshll.u32 %s6622_s9, 4  ;;  %s90_s19 = int_to_ptr.vmem [resolvable:$true] %s89_s19  ;;  %s102_s27 = int_to_ptr.vmem [resolvable:$true] %s101_s27 }
  0x4e   :  { %s6467_s1 = scalar_lea.hbm %s8277_s10, 128 }
  0x4f   :  { %p6468_p4 = scmp.ne.s32.totalorder %s8277_s10, %s6467_s1  ;;  %p6471_p5 = scmp.lt.u32.totalorder %s6467_s1, %s8277_s10 }
  0x51   :  { %p6473_p6 = pnand %p6471_p5, %p6468_p4 }
  0x53   :  { %6476 = shalt.err (!%p6473_p6)
}
  0x54   :  { %s6477_s8 = scalar_lea.vmem %s90_s19, 128  ;;  %p6482_p8 = scmp.lt.s32.totalorder %s90_s19, %s90_s19 }
  0x55   :  { %p6478_p7 = scmp.ne.s32.totalorder %s90_s19, %s6477_s8  ;;  %p6483_p9 = scmp.lt.s32.totalorder %s6477_s8, %s6477_s8 }
  0x57   :  { %p6484_p10 = por %p6483_p9, %p6482_p8 }
  0x59   :  { %p6485_p11 = pnand %p6484_p10, %p6478_p7 }
  0x5b   :  { %6488 = shalt.err (!%p6485_p11)
}
  0x5c   :  { %92 = dma.hbm_to_vmem [thread:$0]  %s8277_s10, 128, %s90_s19, [#allocation12]  }
  0x5d   :  { %s6489_s30 = scalar_lea.hbm %s8281_s14, 16 }
  0x5e   :  { %p6490_p12 = scmp.ne.s32.totalorder %s8281_s14, %s6489_s30  ;;  %p6493_p13 = scmp.lt.u32.totalorder %s6489_s30, %s8281_s14 }
  0x60   :  { %p6495_p0 = pnand %p6493_p13, %p6490_p12 }
  0x62   :  { %6498 = shalt.err (!%p6495_p0)
}
  0x63   :  { %s6499_s6 = scalar_lea.vmem %s102_s27, 16  ;;  %s6503_s25 = scalar_lea.vmem %s102_s27, 32 }
  0x64   :  { %p6500_p1 = scmp.ne.s32.totalorder %s102_s27, %s6499_s6  ;;  %p6504_p2 = scmp.lt.s32.totalorder %s102_s27, %s102_s27 }
  0x65   :  { %p6505_p3 = scmp.lt.s32.totalorder %s6503_s25, %s6499_s6 }
  0x67   :  { %p6506_p4 = por %p6505_p3, %p6504_p2 }
  0x69   :  { %p6507_p5 = pnand %p6506_p4, %p6500_p1 }
  0x6b   :  { %6510 = shalt.err (!%p6507_p5)
}
  0x6c   :  { %104 = dma.hbm_to_vmem [thread:$0]  %s8281_s14, 16, %s102_s27, [#allocation15]  }
  0x6d   :  { %6599 = dma.done.wait [#allocation6], 16  }
  0x6e   :  { %6600 = vsyncadd [#allocation6], 4294967280 }
  0x6f   :  { %6601 = dma.done.wait [#allocation9], 32  }
  0x70   :  { %6602 = vsyncadd [#allocation9], 4294967264 }
  0x71   :  { %6603 = dma.done.wait [#allocation12], 640  }
  0x72   :  { %6604 = vsyncadd [#allocation12], 4294966656 }
  0x73   :  { %6605 = dma.done.wait [#allocation15], 16  }
  0x74   :  { %6606 = vsyncadd [#allocation15], 4294967280  ;;  %s6623_s1 = smov [#allocation2]   ;;  %s6511_s26 = scalar_lea.hbm %s8279_s12, 8192 }
  0x75   :  { %s130_s20 = sshll.u32 %s6623_s1, 4  ;;  %p6512_p6 = scmp.ne.s32.totalorder %s8279_s12, %s6511_s26  ;;  %s131_s20 = int_to_ptr.vmem [resolvable:$true] %s130_s20 }
  0x76   :  { %p6515_p7 = scmp.lt.u32.totalorder %s6511_s26, %s8279_s12 }
  0x78   :  { %p6517_p8 = pnand %p6515_p7, %p6512_p6 }
  0x7a   :  { %6520 = shalt.err (!%p6517_p8)  }
  0x7b   :  { %s6521_s28 = scalar_lea.vmem %s131_s20, 8192  ;;  %p6526_p10 = scmp.lt.s32.totalorder %s131_s20, %s131_s20 }
  0x7c   :  { %p6522_p9 = scmp.ne.s32.totalorder %s131_s20, %s6521_s28  ;;  %p6527_p11 = scmp.lt.s32.totalorder %s6521_s28, %s6521_s28 }
  0x7e   :  { %p6528_p12 = por %p6527_p11, %p6526_p10 }
  0x80   :  { %p6529_p13 = pnand %p6528_p12, %p6522_p9 }
  0x82   :  { %6532 = shalt.err (!%p6529_p13)  }
  0x83   :  { %133 = dma.hbm_to_vmem [thread:$0]  %s8279_s12, 8192, %s131_s20, [#allocation4]  ;;  %v6815_v0 = vld [vmem:[%s8280_s13] sm:$0xff]  ;;  %v6820_v1 = vld [vmem:[%s8280_s13 + $0x8] sm:$0xff]  ;;  %v6825_v2 = vld [vmem:[%s8280_s13 + $0x10] sm:$0xff] }
  0x84   :  { %v6830_v3 = vld [vmem:[%s8280_s13 + $0x18] sm:$0xff]  ;;  %v6835_v4 = vld [vmem:[%s8280_s13 + $0x20] sm:$0xff]  ;;  %v6840_v5 = vld [vmem:[%s8280_s13 + $0x28] sm:$0xff]  ;;  %s8300_s21 = sld [smem:[#allocation39_spill]] }
  0x85   :  { %v6845_v6 = vld [vmem:[%s8280_s13 + $0x30] sm:$0xff]  ;;  %v6850_v7 = vld [vmem:[%s8280_s13 + $0x38] sm:$0xff]  ;;  %v6855_v8 = vld [vmem:[%s8280_s13 + $0x40] sm:$0xff] }
  0x86   :  { %v6860_v9 = vld [vmem:[%s8280_s13 + $0x48] sm:$0xff]  ;;  %v6865_v10 = vld [vmem:[%s8280_s13 + $0x50] sm:$0xff]  ;;  %v6870_v11 = vld [vmem:[%s8280_s13 + $0x58] sm:$0xff] }
  0x87   :  { %8295 = vst [vmem:[#allocation33_spill] sm:$0xff] %v6870_v11  ;;  %v6875_v12 = vld [vmem:[%s8280_s13 + $0x60] sm:$0xff]  ;;  %v6880_v13 = vld [vmem:[%s8280_s13 + $0x68] sm:$0xff]  ;;  %v6885_v14 = vld [vmem:[%s8280_s13 + $0x70] sm:$0xff] }
  0x88   :  { %8296 = vst [vmem:[#allocation34_spill] sm:$0xff] %v6875_v12  ;;  %8297 = vst [vmem:[#allocation35_spill] sm:$0xff] %v6880_v13  ;;  %v6890_v15 = vld [vmem:[%s8280_s13 + $0x78] sm:$0xff] }
  0x89   :  { %8298 = vst [vmem:[#allocation36_spill] sm:$0xff] %v6885_v14  ;;  %8299 = vst [vmem:[#allocation37_spill] sm:$0xff] %v6890_v15 }
  0x8a   :  { %v209_v16 = vld [vmem:[%s8300_s21] sm:$0xff] }
  0x8b   :  { %206 = vsyncadd [#allocation4 + $0x1], 2048  ;;  %v220_v17 = vld [vmem:[%s8271_s4 + $0x8] sm:$0xff]  ;;  %v207_v18 = vlaneseq  ;;  %v6624_v19 = vmov 0   ;;  %v210_v20 = vadd.s32 32, %v209_v16  ;;  %v222_v22 = vld [vmem:[%s8271_s4 + $0x18] sm:$0xff] }
  0x8c   :  { %6119 = vset.pattern.permute.xlu0 %v6624_v19  ;;  %v224_v21 = vld [vmem:[%s8271_s4 + $0x28] sm:$0xff]  ;;  %v226_v23 = vld [vmem:[%s8271_s4 + $0x38] sm:$0xff]  ;;  %v8285_v24 = vmov 0.0   ;;  %v219_v27 = vld [vmem:[%s8271_s4] sm:$0xff]  ;;  %s8302_s9 = sld [smem:[#allocation40_spill]]  ;;  %vm6627_vm2 = vmmov 0  }
  0x8d   :  { %347 = vmatprep.mubr.f32.mxu0 %v8285_v24  ;;  %v6908_v25 = vpack.c.bf16 %v224_v21, %v220_v17  ;;  %v6910_v26 = vpack.c.bf16 %v226_v23, %v222_v22  ;;  %v223_v28 = vld [vmem:[%s8271_s4 + $0x20] sm:$0xff]  ;;  %v221_v29 = vld [vmem:[%s8271_s4 + $0x10] sm:$0xff]  ;;  %v6921_v30 = vand.u32 127, %v207_v18  ;;  %418 = vmatprep.mubr.f32.mxu1 %v8285_v24  ;;  %v228_v33 = vld [vmem:[%s8271_s4 + $0x48] sm:$0xff]  ;;  %vm1822_vm3 = vcmask 64512  }
  0x8e   :  { %212 = vperm.xlu0 %6119, %v210_v20   ;;  %v6924_v31 = vpack.c.bf16 %v223_v28, %v219_v27  ;;  %v225_v32 = vld [vmem:[%s8271_s4 + $0x30] sm:$0xff]  ;;  %v232_v34 = vld [vmem:[%s8271_s4 + $0x68] sm:$0xff]  ;;  %v230_v37 = vld [vmem:[%s8271_s4 + $0x58] sm:$0xff]  ;;  %vm1807_vm4 = vcmask 253952   ;;  %vm1896_vm5 = vcmask 261120  }
  0x8f   :  { %8301 = vst [vmem:[#allocation38_spill] sm:$0xff] %v6921_v30  ;;  %4834 = vmatprep.subr.bf16.mxu0 %v6908_v25  ;;  %4866 = vmatprep.subr.bf16.mxu1 %v6910_v26  ;;  %v6937_v35 = vpack.c.bf16 %v225_v32, %v221_v29  ;;  %v6939_v36 = vpack.c.bf16 %v232_v34, %v228_v33  ;;  %v234_v38 = vld [vmem:[%s8271_s4 + $0x78] sm:$0xff]  ;;  %v227_v39 = vld [vmem:[%s8271_s4 + $0x40] sm:$0xff]  ;;  %vm1972_vm0 = vcmp.eq.s32.totalorder %v6921_v30, 32  ;;  %v229_v42 = vld [vmem:[%s8271_s4 + $0x50] sm:$0xff] }
  0x90   :  { %4836 = vmatpush1.bf16.msra.mxu0 %v6924_v31  ;;  %v6952_v40 = vpack.c.bf16 %v234_v38, %v230_v37  ;;  %v231_v41 = vld [vmem:[%s8271_s4 + $0x60] sm:$0xff]  ;;  %v233_v43 = vld [vmem:[%s8271_s4 + $0x70] sm:$0xff]  ;;  %v6964_v44 = vsel %vm1972_vm0, 1.0, %v8285_v24  ;;  %v236_v47 = vld [vmem:[%s8271_s4 + $0x88] sm:$0xff] }
  0x91   :  { %4868 = vmatpush1.bf16.msra.mxu1 %v6937_v35  ;;  %4838 = vmatprep.subr.bf16.mxu0 %v6939_v36  ;;  %v6968_v45 = vpack.c.bf16 %v231_v41, %v227_v39  ;;  %v6970_v46 = vpack.c.bf16 %v233_v43, %v229_v42  ;;  %v240_v48 = vld [vmem:[%s8271_s4 + $0xa8] sm:$0xff]  ;;  %v238_v49 = vld [vmem:[%s8271_s4 + $0x98] sm:$0xff]  ;;  %v235_v52 = vld [vmem:[%s8271_s4 + $0x80] sm:$0xff] }
  0x92   :  { %4870 = vmatprep.subr.bf16.mxu1 %v6952_v40  ;;  %v6982_v50 = vpack.c.bf16 %v240_v48, %v236_v47  ;;  %v242_v51 = vld [vmem:[%s8271_s4 + $0xb8] sm:$0xff]  ;;  %v239_v53 = vld [vmem:[%s8271_s4 + $0xa0] sm:$0xff]  ;;  %v237_v55 = vld [vmem:[%s8271_s4 + $0x90] sm:$0xff] }
  0x93   :  { %v6993_v54 = vpack.c.bf16 %v242_v51, %v238_v49  ;;  %v241_v56 = vld [vmem:[%s8271_s4 + $0xb0] sm:$0xff]  ;;  %v244_v57 = vld [vmem:[%s8271_s4 + $0xc8] sm:$0xff]  ;;  %v7005_v58 = vpack.c.bf16 %v239_v53, %v235_v52  ;;  %v246_v60 = vld [vmem:[%s8271_s4 + $0xd8] sm:$0xff] }
  0x94   :  { %4840 = vmatpush1.bf16.msra.mxu0 %v6968_v45  ;;  %v248_v59 = vld [vmem:[%s8271_s4 + $0xe8] sm:$0xff]  ;;  %v250_v61 = vld [vmem:[%s8271_s4 + $0xf8] sm:$0xff]  ;;  %v7018_v62 = vpack.c.bf16 %v241_v56, %v237_v55  ;;  %v243_v16 = vld [vmem:[%s8271_s4 + $0xc0] sm:$0xff] }
  0x95   :  { %4872 = vmatpush1.bf16.msra.mxu1 %v6970_v46  ;;  %4842 = vmatprep.subr.bf16.mxu0 %v6982_v50  ;;  %v7020_v63 = vpack.c.bf16 %v248_v59, %v244_v57  ;;  %v247_v17 = vld [vmem:[%s8271_s4 + $0xe0] sm:$0xff]  ;;  %v245_v18 = vld [vmem:[%s8271_s4 + $0xd0] sm:$0xff]  ;;  %v7032_v19 = vpack.c.bf16 %v250_v61, %v246_v60  ;;  %v252_v21 = vld [vmem:[%s8271_s4 + $0x108] sm:$0xff] }
  0x96   :  { %4874 = vmatprep.subr.bf16.mxu1 %v6993_v54  ;;  %v249_v20 = vld [vmem:[%s8271_s4 + $0xf0] sm:$0xff]  ;;  %v256_v22 = vld [vmem:[%s8271_s4 + $0x128] sm:$0xff]  ;;  %v254_v23 = vld [vmem:[%s8271_s4 + $0x118] sm:$0xff]  ;;  %v7050_v28 = vpack.c.bf16 %v247_v17, %v243_v16 }
  0x97   :  { %v258_v27 = vld [vmem:[%s8271_s4 + $0x138] sm:$0xff]  ;;  %v7054_v29 = vpack.c.bf16 %v249_v20, %v245_v18  ;;  %v7056_v32 = vpack.c.bf16 %v256_v22, %v252_v21  ;;  %v251_v33 = vld [vmem:[%s8271_s4 + $0x100] sm:$0xff]  ;;  %v253_v37 = vld [vmem:[%s8271_s4 + $0x110] sm:$0xff] }
  0x98   :  { %4844 = vmatpush1.bf16.msra.mxu0 %v7005_v58  ;;  %v255_v34 = vld [vmem:[%s8271_s4 + $0x120] sm:$0xff]  ;;  %v7068_v38 = vpack.c.bf16 %v258_v27, %v254_v23  ;;  %v257_v39 = vld [vmem:[%s8271_s4 + $0x130] sm:$0xff]  ;;  %v260_v41 = vld [vmem:[%s8271_s4 + $0x148] sm:$0xff] }
  0x99   :  { %4876 = vmatpush1.bf16.msra.mxu1 %v7018_v62  ;;  %4846 = vmatprep.subr.bf16.mxu0 %v7020_v63  ;;  %v264_v42 = vld [vmem:[%s8271_s4 + $0x168] sm:$0xff]  ;;  %v262_v43 = vld [vmem:[%s8271_s4 + $0x158] sm:$0xff]  ;;  %v7086_v48 = vpack.c.bf16 %v255_v34, %v251_v33  ;;  %v7090_v49 = vpack.c.bf16 %v257_v39, %v253_v37  ;;  %v259_v52 = vld [vmem:[%s8271_s4 + $0x140] sm:$0xff] }
  0x9a   :  { %4878 = vmatprep.subr.bf16.mxu1 %v7032_v19  ;;  %v266_v47 = vld [vmem:[%s8271_s4 + $0x178] sm:$0xff]  ;;  %v7092_v51 = vpack.c.bf16 %v264_v42, %v260_v41  ;;  %v263_v53 = vld [vmem:[%s8271_s4 + $0x160] sm:$0xff]  ;;  %v261_v55 = vld [vmem:[%s8271_s4 + $0x150] sm:$0xff] }
  0x9b   :  { %v7104_v56 = vpack.c.bf16 %v266_v47, %v262_v43  ;;  %v265_v57 = vld [vmem:[%s8271_s4 + $0x170] sm:$0xff]  ;;  %v268_v59 = vld [vmem:[%s8271_s4 + $0x188] sm:$0xff]  ;;  %v270_v61 = vld [vmem:[%s8271_s4 + $0x198] sm:$0xff]  ;;  %v7122_v17 = vpack.c.bf16 %v263_v53, %v259_v52 }
  0x9c   :  { %4848 = vmatpush1.bf16.msra.mxu0 %v7050_v28  ;;  %v272_v60 = vld [vmem:[%s8271_s4 + $0x1a8] sm:$0xff]  ;;  %v274_v16 = vld [vmem:[%s8271_s4 + $0x1b8] sm:$0xff]  ;;  %v7126_v18 = vpack.c.bf16 %v265_v57, %v261_v55  ;;  %v267_v21 = vld [vmem:[%s8271_s4 + $0x180] sm:$0xff] }
  0x9d   :  { %4880 = vmatpush1.bf16.msra.mxu1 %v7054_v29  ;;  %4850 = vmatprep.subr.bf16.mxu0 %v7056_v32  ;;  %v7128_v20 = vpack.c.bf16 %v272_v60, %v268_v59  ;;  %v271_v22 = vld [vmem:[%s8271_s4 + $0x1a0] sm:$0xff]  ;;  %v269_v23 = vld [vmem:[%s8271_s4 + $0x190] sm:$0xff]  ;;  %v7140_v27 = vpack.c.bf16 %v274_v16, %v270_v61  ;;  %v276_v34 = vld [vmem:[%s8271_s4 + $0x1c8] sm:$0xff] }
  0x9e   :  { %4882 = vmatprep.subr.bf16.mxu1 %v7068_v38  ;;  %v273_v33 = vld [vmem:[%s8271_s4 + $0x1b0] sm:$0xff]  ;;  %v280_v37 = vld [vmem:[%s8271_s4 + $0x1e8] sm:$0xff]  ;;  %v278_v39 = vld [vmem:[%s8271_s4 + $0x1d8] sm:$0xff]  ;;  %v7158_v42 = vpack.c.bf16 %v271_v22, %v267_v21 }
  0x9f   :  { %v282_v41 = vld [vmem:[%s8271_s4 + $0x1f8] sm:$0xff]  ;;  %v7162_v43 = vpack.c.bf16 %v273_v33, %v269_v23  ;;  %v7164_v47 = vpack.c.bf16 %v280_v37, %v276_v34  ;;  %v275_v52 = vld [vmem:[%s8271_s4 + $0x1c0] sm:$0xff]  ;;  %v277_v57 = vld [vmem:[%s8271_s4 + $0x1d0] sm:$0xff] }
  0xa0   :  { %4852 = vmatpush1.bf16.msra.mxu0 %v7086_v48  ;;  %v279_v53 = vld [vmem:[%s8271_s4 + $0x1e0] sm:$0xff]  ;;  %v7173_v55 = vpack.c.bf16 %v282_v41, %v278_v39  ;;  %v281_v59 = vld [vmem:[%s8271_s4 + $0x1f0] sm:$0xff] }
  0xa1   :  { %4884 = vmatpush1.bf16.msra.mxu1 %v7090_v49  ;;  %4854 = vmatprep.subr.bf16.mxu0 %v7092_v51  ;;  %v7182_v60 = vpack.c.bf16 %v279_v53, %v275_v52  ;;  %v7186_v61 = vpack.c.bf16 %v281_v59, %v277_v57  ;;  %v217_v21 = vld [vmem:[%s8302_s9] sm:$0x1] }
  0xa2   :  { %4886 = vmatprep.subr.bf16.mxu1 %v7104_v56 }
  0xa4   :  { %4856 = vmatpush1.bf16.msra.mxu0 %v7122_v17 }
  0xa5   :  { %4888 = vmatpush1.bf16.msra.mxu1 %v7126_v18  ;;  %4858 = vmatprep.subr.bf16.mxu0 %v7128_v20 }
  0xa6   :  { %4890 = vmatprep.subr.bf16.mxu1 %v7140_v27 }
  0xa8   :  { %4860 = vmatpush1.bf16.msra.mxu0 %v7158_v42 }
  0xa9   :  { %4892 = vmatpush1.bf16.msra.mxu1 %v7162_v43  ;;  %4862 = vmatprep.subr.bf16.mxu0 %v7164_v47 }
  0xaa   :  { %4894 = vmatprep.subr.bf16.mxu1 %v7173_v55 }
  0xac   :  { %4864 = vmatpush1.bf16.msra.mxu0 %v7182_v60 }
  0xad   :  { %4896 = vmatpush1.bf16.msra.mxu1 %v7186_v61  ;;  %4898 = vmatprep.subr.bf16.mxu0 %v6908_v25 }
  0xae   :  { %4930 = vmatprep.subr.bf16.mxu1 %v6910_v26 }
 0x10d   :  { %v213_v16 = vpop.permute.xlu0 %212 }
 0x10e   :  { %vm214_vm1 = vcmp.eq.s32.totalorder %v6921_v30, %v213_v16 }
 0x10f   :  { %v7198_v22 = vsel %vm214_vm1, 1.0, %v8285_v24 }
 0x110   :  { %v218_v23 = vadd.f32 %v7198_v22, %v217_v21 }
 0x112   :  { %348 = vmatmul.mubr.f32.vlgmr.msra.gmra.mrb[0].mxu0 %v218_v23  ;;  %419 = vmatmul.mubr.f32.vlgmr.msra.gmra.mrb[0].mxu1 %v218_v23 }
 0x113   :  { %4900 = vmatpush1.bf16.msra.mxu0 %v6924_v31  ;;  %4932 = vmatpush1.bf16.msra.mxu1 %v6937_v35 }
 0x114   :  { %4902 = vmatprep.subr.bf16.mxu0 %v6939_v36  ;;  %4934 = vmatprep.subr.bf16.mxu1 %v6952_v40 }
 0x115   :  { %517 = vmatprep.mubr.f32.mxu0 %v8285_v24  ;;  %588 = vmatprep.mubr.f32.mxu1 %v8285_v24 }
 0x117   :  { %4904 = vmatpush1.bf16.msra.mxu0 %v6968_v45  ;;  %4936 = vmatpush1.bf16.msra.mxu1 %v6970_v46 }
 0x118   :  { %4906 = vmatprep.subr.bf16.mxu0 %v6982_v50  ;;  %4938 = vmatprep.subr.bf16.mxu1 %v6993_v54 }
 0x11b   :  { %4908 = vmatpush1.bf16.msra.mxu0 %v7005_v58  ;;  %4940 = vmatpush1.bf16.msra.mxu1 %v7018_v62 }
 0x11c   :  { %4910 = vmatprep.subr.bf16.mxu0 %v7020_v63  ;;  %4942 = vmatprep.subr.bf16.mxu1 %v7032_v19 }
 0x11f   :  { %4912 = vmatpush1.bf16.msra.mxu0 %v7050_v28  ;;  %4944 = vmatpush1.bf16.msra.mxu1 %v7054_v29 }
 0x120   :  { %4914 = vmatprep.subr.bf16.mxu0 %v7056_v32  ;;  %4946 = vmatprep.subr.bf16.mxu1 %v7068_v38 }
 0x123   :  { %4916 = vmatpush1.bf16.msra.mxu0 %v7086_v48  ;;  %4948 = vmatpush1.bf16.msra.mxu1 %v7090_v49 }
 0x124   :  { %4918 = vmatprep.subr.bf16.mxu0 %v7092_v51  ;;  %4950 = vmatprep.subr.bf16.mxu1 %v7104_v56 }
 0x127   :  { %4920 = vmatpush1.bf16.msra.mxu0 %v7122_v17  ;;  %4952 = vmatpush1.bf16.msra.mxu1 %v7126_v18 }
 0x128   :  { %4922 = vmatprep.subr.bf16.mxu0 %v7128_v20  ;;  %4954 = vmatprep.subr.bf16.mxu1 %v7140_v27 }
 0x12b   :  { %4924 = vmatpush1.bf16.msra.mxu0 %v7158_v42  ;;  %4956 = vmatpush1.bf16.msra.mxu1 %v7162_v43 }
 0x12c   :  { %4926 = vmatprep.subr.bf16.mxu0 %v7164_v47  ;;  %4958 = vmatprep.subr.bf16.mxu1 %v7173_v55 }
 0x12f   :  { %4928 = vmatpush1.bf16.msra.mxu0 %v7182_v60  ;;  %4960 = vmatpush1.bf16.msra.mxu1 %v7186_v61 }
 0x130   :  { %4962 = vmatprep.subr.bf16.mxu0 %v6908_v25  ;;  %4994 = vmatprep.subr.bf16.mxu1 %v6910_v26 }
 0x1e5   :  { %v349_v33 = vpop.f32.mrb[0].mxu0  ;;  %v420_v34 = vpop.f32.mrb[0].mxu1 }
 0x1e6   :  { %v4230_v37 = vmul.f32 -1.442695, %v349_v33  ;;  %v351_v39 = vpop.f32.mrb[1].mxu0  ;;  %v422_v41 = vpop.f32.mrb[1].mxu1 }
 0x1e7   :  { %v4231_v52 = vmul.f32 -1.442695, %v351_v39  ;;  %v4232_v53 = vmul.f32 -1.442695, %v422_v41 }
 0x1e8   :  { %6120 = vpow2.f32 %v4230_v37 }
 0x1e9   :  { %6122 = vpow2.f32 %v4231_v52 }
 0x1ea   :  { %6124 = vpow2.f32 %v4232_v53 }
 0x1eb   :  { %6126 = vtanh.f32 %v420_v34  ;;  %v450_v34 = vrot.slane %v7198_v22, 1 }
 0x1f2   :  { %v6121_v57 = vpop.eup %6120 }
 0x1f3   :  { %v6123_v59 = vpop.eup %6122  ;;  %v428_v16 = vadd.f32 1.0, %v6121_v57 }
 0x1f4   :  { %v434_v21 = vadd.f32 1.0, %v6123_v59  ;;  %v6125_v23 = vpop.eup %6124 }
 0x1f5   :  { %6128 = vrcp.f32 %v428_v16  ;;  %v6127_v24 = vpop.eup %6126  ;;  %v441_v33 = vadd.f32 1.0, %v6125_v23 }
 0x1f6   :  { %6130 = vrcp.f32 %v434_v21 }
 0x1f7   :  { %6132 = vrcp.f32 %v441_v33 }
 0x1ff   :  { %v6129_v30 = vpop.eup %6128 }
 0x200   :  { %v6131_v15 = vpop.eup %6130  ;;  %v445_v14 = vmul.f32 %v6129_v30, %v6127_v24 }
 0x201   :  { %v444_v13 = vmul.f32 0.0, %v6131_v15  ;;  %v6133_v37 = vpop.eup %6132 }
 0x203   :  { %v7235_v12 = vadd.f32 %v445_v14, %v444_v13  ;;  %v8303_v13 = vmov 0.0  }
 0x205   :  { %6134 = vtanh.f32 %v7235_v12 }
 0x20f   :  { %v6135_v39 = vpop.eup %6134 }
 0x210   :  { %v448_v41 = vmul.f32 %v6135_v39, %v6133_v37 }
 0x212   :  { %v452_v52 = vadd.f32 %v450_v34, %v448_v41 }
 0x214   :  { %518 = vmatmul.mubr.f32.vlgmr.msra.gmra.mrb[2].mxu0 %v452_v52  ;;  %589 = vmatmul.mubr.f32.vlgmr.msra.gmra.mrb[2].mxu1 %v452_v52 }
 0x215   :  { %4964 = vmatpush1.bf16.msra.mxu0 %v6924_v31  ;;  %4996 = vmatpush1.bf16.msra.mxu1 %v6937_v35 }
 0x216   :  { %4966 = vmatprep.subr.bf16.mxu0 %v6939_v36  ;;  %4998 = vmatprep.subr.bf16.mxu1 %v6952_v40 }
 0x217   :  { %686 = vmatprep.mubr.f32.mxu0 %v8303_v13  ;;  %757 = vmatprep.mubr.f32.mxu1 %v8303_v13 }
 0x219   :  { %4968 = vmatpush1.bf16.msra.mxu0 %v6968_v45  ;;  %5000 = vmatpush1.bf16.msra.mxu1 %v6970_v46 }
 0x21a   :  { %4970 = vmatprep.subr.bf16.mxu0 %v6982_v50  ;;  %5002 = vmatprep.subr.bf16.mxu1 %v6993_v54 }
 0x21d   :  { %4972 = vmatpush1.bf16.msra.mxu0 %v7005_v58  ;;  %5004 = vmatpush1.bf16.msra.mxu1 %v7018_v62 }
 0x21e   :  { %4974 = vmatprep.subr.bf16.mxu0 %v7020_v63  ;;  %5006 = vmatprep.subr.bf16.mxu1 %v7032_v19 }
 0x221   :  { %4976 = vmatpush1.bf16.msra.mxu0 %v7050_v28  ;;  %5008 = vmatpush1.bf16.msra.mxu1 %v7054_v29 }
 0x222   :  { %4978 = vmatprep.subr.bf16.mxu0 %v7056_v32  ;;  %5010 = vmatprep.subr.bf16.mxu1 %v7068_v38 }
 0x225   :  { %4980 = vmatpush1.bf16.msra.mxu0 %v7086_v48  ;;  %5012 = vmatpush1.bf16.msra.mxu1 %v7090_v49 }
 0x226   :  { %4982 = vmatprep.subr.bf16.mxu0 %v7092_v51  ;;  %5014 = vmatprep.subr.bf16.mxu1 %v7104_v56 }
 0x229   :  { %4984 = vmatpush1.bf16.msra.mxu0 %v7122_v17  ;;  %5016 = vmatpush1.bf16.msra.mxu1 %v7126_v18 }
 0x22a   :  { %4986 = vmatprep.subr.bf16.mxu0 %v7128_v20  ;;  %5018 = vmatprep.subr.bf16.mxu1 %v7140_v27 }
 0x22d   :  { %4988 = vmatpush1.bf16.msra.mxu0 %v7158_v42  ;;  %5020 = vmatpush1.bf16.msra.mxu1 %v7162_v43 }
 0x22e   :  { %4990 = vmatprep.subr.bf16.mxu0 %v7164_v47  ;;  %5022 = vmatprep.subr.bf16.mxu1 %v7173_v55 }
 0x231   :  { %4992 = vmatpush1.bf16.msra.mxu0 %v7182_v60  ;;  %5024 = vmatpush1.bf16.msra.mxu1 %v7186_v61 }
 0x232   :  { %5026 = vmatprep.subr.bf16.mxu0 %v6908_v25  ;;  %5058 = vmatprep.subr.bf16.mxu1 %v6910_v26 }
 0x2e7   :  { %v519_v14 = vpop.f32.mrb[2].mxu0  ;;  %v590_v15 = vpop.f32.mrb[2].mxu1 }
 0x2e8   :  { %v4233_v24 = vmul.f32 -1.442695, %v519_v14  ;;  %v521_v30 = vpop.f32.mrb[3].mxu0  ;;  %v592_v53 = vpop.f32.mrb[3].mxu1 }
 0x2e9   :  { %v4234_v57 = vmul.f32 -1.442695, %v521_v30  ;;  %v4235_v59 = vmul.f32 -1.442695, %v592_v53 }
 0x2ea   :  { %6136 = vpow2.f32 %v4233_v24 }
 0x2eb   :  { %6138 = vpow2.f32 %v4234_v57 }
 0x2ec   :  { %6140 = vpow2.f32 %v4235_v59 }
 0x2ed   :  { %6142 = vtanh.f32 %v590_v15  ;;  %v619_v15 = vrot.slane %v7198_v22, 2 }
 0x2f4   :  { %v6137_v16 = vpop.eup %6136 }
 0x2f5   :  { %v6139_v21 = vpop.eup %6138  ;;  %v598_v23 = vadd.f32 1.0, %v6137_v16 }
 0x2f6   :  { %v604_v33 = vadd.f32 1.0, %v6139_v21  ;;  %v6141_v37 = vpop.eup %6140 }
 0x2f7   :  { %6144 = vrcp.f32 %v598_v23  ;;  %v6143_v39 = vpop.eup %6142  ;;  %v611_v14 = vadd.f32 1.0, %v6141_v37 }
 0x2f8   :  { %6146 = vrcp.f32 %v604_v33 }
 0x2f9   :  { %6148 = vrcp.f32 %v611_v14 }
 0x301   :  { %v6145_v41 = vpop.eup %6144 }
 0x302   :  { %v6147_v34 = vpop.eup %6146  ;;  %v615_v52 = vmul.f32 %v6145_v41, %v6143_v39 }
 0x303   :  { %v614_v11 = vmul.f32 %v6147_v34, %v7235_v12  ;;  %v6149_v24 = vpop.eup %6148 }
 0x305   :  { %v7274_v30 = vadd.f32 %v615_v52, %v614_v11 }
 0x307   :  { %6150 = vtanh.f32 %v7274_v30 }
 0x311   :  { %v6151_v53 = vpop.eup %6150 }
 0x312   :  { %v618_v57 = vmul.f32 %v6151_v53, %v6149_v24 }
 0x314   :  { %v621_v59 = vadd.f32 %v619_v15, %v618_v57 }
 0x316   :  { %687 = vmatmul.mubr.f32.vlgmr.msra.gmra.mrb[4].mxu0 %v621_v59  ;;  %758 = vmatmul.mubr.f32.vlgmr.msra.gmra.mrb[4].mxu1 %v621_v59 }
 0x317   :  { %5028 = vmatpush1.bf16.msra.mxu0 %v6924_v31  ;;  %5060 = vmatpush1.bf16.msra.mxu1 %v6937_v35 }
 0x318   :  { %5030 = vmatprep.subr.bf16.mxu0 %v6939_v36  ;;  %5062 = vmatprep.subr.bf16.mxu1 %v6952_v40 }
 0x319   :  { %855 = vmatprep.mubr.f32.mxu0 %v8303_v13  ;;  %926 = vmatprep.mubr.f32.mxu1 %v8303_v13 }
 0x31b   :  { %5032 = vmatpush1.bf16.msra.mxu0 %v6968_v45  ;;  %5064 = vmatpush1.bf16.msra.mxu1 %v6970_v46 }
 0x31c   :  { %5034 = vmatprep.subr.bf16.mxu0 %v6982_v50  ;;  %5066 = vmatprep.subr.bf16.mxu1 %v6993_v54 }
 0x31f   :  { %5036 = vmatpush1.bf16.msra.mxu0 %v7005_v58  ;;  %5068 = vmatpush1.bf16.msra.mxu1 %v7018_v62 }
 0x320   :  { %5038 = vmatprep.subr.bf16.mxu0 %v7020_v63  ;;  %5070 = vmatprep.subr.bf16.mxu1 %v7032_v19 }
 0x323   :  { %5040 = vmatpush1.bf16.msra.mxu0 %v7050_v28  ;;  %5072 = vmatpush1.bf16.msra.mxu1 %v7054_v29 }
 0x324   :  { %5042 = vmatprep.subr.bf16.mxu0 %v7056_v32  ;;  %5074 = vmatprep.subr.bf16.mxu1 %v7068_v38 }
 0x327   :  { %5044 = vmatpush1.bf16.msra.mxu0 %v7086_v48  ;;  %5076 = vmatpush1.bf16.msra.mxu1 %v7090_v49 }
 0x328   :  { %5046 = vmatprep.subr.bf16.mxu0 %v7092_v51  ;;  %5078 = vmatprep.subr.bf16.mxu1 %v7104_v56 }
 0x32b   :  { %5048 = vmatpush1.bf16.msra.mxu0 %v7122_v17  ;;  %5080 = vmatpush1.bf16.msra.mxu1 %v7126_v18 }
 0x32c   :  { %5050 = vmatprep.subr.bf16.mxu0 %v7128_v20  ;;  %5082 = vmatprep.subr.bf16.mxu1 %v7140_v27 }
 0x32f   :  { %5052 = vmatpush1.bf16.msra.mxu0 %v7158_v42  ;;  %5084 = vmatpush1.bf16.msra.mxu1 %v7162_v43 }
 0x330   :  { %5054 = vmatprep.subr.bf16.mxu0 %v7164_v47  ;;  %5086 = vmatprep.subr.bf16.mxu1 %v7173_v55 }
 0x333   :  { %5056 = vmatpush1.bf16.msra.mxu0 %v7182_v60  ;;  %5088 = vmatpush1.bf16.msra.mxu1 %v7186_v61 }
 0x334   :  { %5090 = vmatprep.subr.bf16.mxu0 %v6908_v25  ;;  %5122 = vmatprep.subr.bf16.mxu1 %v6910_v26 }
 0x3e9   :  { %v688_v11 = vpop.f32.mrb[4].mxu0  ;;  %v759_v12 = vpop.f32.mrb[4].mxu1 }
 0x3ea   :  { %v4236_v16 = vmul.f32 -1.442695, %v688_v11  ;;  %v690_v21 = vpop.f32.mrb[5].mxu0  ;;  %v761_v23 = vpop.f32.mrb[5].mxu1 }
 0x3eb   :  { %v4237_v33 = vmul.f32 -1.442695, %v690_v21  ;;  %v4238_v37 = vmul.f32 -1.442695, %v761_v23 }
 0x3ec   :  { %6152 = vpow2.f32 %v4236_v16 }
 0x3ed   :  { %6154 = vpow2.f32 %v4237_v33 }
 0x3ee   :  { %6156 = vpow2.f32 %v4238_v37 }
 0x3ef   :  { %6158 = vtanh.f32 %v759_v12  ;;  %v788_v12 = vrot.slane %v7198_v22, 3 }
 0x3f6   :  { %v6153_v39 = vpop.eup %6152 }
 0x3f7   :  { %v6155_v41 = vpop.eup %6154  ;;  %v767_v34 = vadd.f32 1.0, %v6153_v39 }
 0x3f8   :  { %v773_v52 = vadd.f32 1.0, %v6155_v41  ;;  %v6157_v14 = vpop.eup %6156 }
 0x3f9   :  { %6160 = vrcp.f32 %v767_v34  ;;  %v6159_v24 = vpop.eup %6158  ;;  %v780_v59 = vadd.f32 1.0, %v6157_v14 }
 0x3fa   :  { %6162 = vrcp.f32 %v773_v52 }
 0x3fb   :  { %6164 = vrcp.f32 %v780_v59 }
 0x403   :  { %v6161_v53 = vpop.eup %6160 }
 0x404   :  { %v6163_v57 = vpop.eup %6162  ;;  %v784_v15 = vmul.f32 %v6161_v53, %v6159_v24 }
 0x405   :  { %v783_v11 = vmul.f32 %v6163_v57, %v7274_v30  ;;  %v6165_v16 = vpop.eup %6164 }
 0x407   :  { %v7313_v21 = vadd.f32 %v784_v15, %v783_v11 }
 0x409   :  { %6166 = vtanh.f32 %v7313_v21 }
 0x413   :  { %v6167_v23 = vpop.eup %6166 }
 0x414   :  { %v787_v33 = vmul.f32 %v6167_v23, %v6165_v16 }
 0x416   :  { %v790_v37 = vadd.f32 %v788_v12, %v787_v33 }
 0x418   :  { %856 = vmatmul.mubr.f32.vlgmr.msra.gmra.mrb[6].mxu0 %v790_v37  ;;  %927 = vmatmul.mubr.f32.vlgmr.msra.gmra.mrb[6].mxu1 %v790_v37 }
 0x419   :  { %5092 = vmatpush1.bf16.msra.mxu0 %v6924_v31  ;;  %5124 = vmatpush1.bf16.msra.mxu1 %v6937_v35 }
 0x41a   :  { %5094 = vmatprep.subr.bf16.mxu0 %v6939_v36  ;;  %5126 = vmatprep.subr.bf16.mxu1 %v6952_v40 }
 0x41b   :  { %1024 = vmatprep.mubr.f32.mxu0 %v8303_v13  ;;  %1095 = vmatprep.mubr.f32.mxu1 %v8303_v13 }
 0x41d   :  { %5096 = vmatpush1.bf16.msra.mxu0 %v6968_v45  ;;  %5128 = vmatpush1.bf16.msra.mxu1 %v6970_v46 }
 0x41e   :  { %5098 = vmatprep.subr.bf16.mxu0 %v6982_v50  ;;  %5130 = vmatprep.subr.bf16.mxu1 %v6993_v54 }
 0x421   :  { %5100 = vmatpush1.bf16.msra.mxu0 %v7005_v58  ;;  %5132 = vmatpush1.bf16.msra.mxu1 %v7018_v62 }
 0x422   :  { %5102 = vmatprep.subr.bf16.mxu0 %v7020_v63  ;;  %5134 = vmatprep.subr.bf16.mxu1 %v7032_v19 }
 0x425   :  { %5104 = vmatpush1.bf16.msra.mxu0 %v7050_v28  ;;  %5136 = vmatpush1.bf16.msra.mxu1 %v7054_v29 }
 0x426   :  { %5106 = vmatprep.subr.bf16.mxu0 %v7056_v32  ;;  %5138 = vmatprep.subr.bf16.mxu1 %v7068_v38 }
 0x429   :  { %5108 = vmatpush1.bf16.msra.mxu0 %v7086_v48  ;;  %5140 = vmatpush1.bf16.msra.mxu1 %v7090_v49 }
 0x42a   :  { %5110 = vmatprep.subr.bf16.mxu0 %v7092_v51  ;;  %5142 = vmatprep.subr.bf16.mxu1 %v7104_v56 }
 0x42d   :  { %5112 = vmatpush1.bf16.msra.mxu0 %v7122_v17  ;;  %5144 = vmatpush1.bf16.msra.mxu1 %v7126_v18 }
 0x42e   :  { %5114 = vmatprep.subr.bf16.mxu0 %v7128_v20  ;;  %5146 = vmatprep.subr.bf16.mxu1 %v7140_v27 }
 0x431   :  { %5116 = vmatpush1.bf16.msra.mxu0 %v7158_v42  ;;  %5148 = vmatpush1.bf16.msra.mxu1 %v7162_v43 }
 0x432   :  { %5118 = vmatprep.subr.bf16.mxu0 %v7164_v47  ;;  %5150 = vmatprep.subr.bf16.mxu1 %v7173_v55 }
 0x435   :  { %5120 = vmatpush1.bf16.msra.mxu0 %v7182_v60  ;;  %5152 = vmatpush1.bf16.msra.mxu1 %v7186_v61 }
 0x436   :  { %5154 = vmatprep.subr.bf16.mxu0 %v6908_v25  ;;  %5186 = vmatprep.subr.bf16.mxu1 %v6910_v26 }
 0x4eb   :  { %v857_v30 = vpop.f32.mrb[6].mxu0  ;;  %v928_v39 = vpop.f32.mrb[6].mxu1 }
 0x4ec   :  { %v4239_v41 = vmul.f32 -1.442695, %v857_v30  ;;  %v859_v34 = vpop.f32.mrb[7].mxu0  ;;  %v930_v52 = vpop.f32.mrb[7].mxu1 }
 0x4ed   :  { %v4240_v14 = vmul.f32 -1.442695, %v859_v34  ;;  %v4241_v24 = vmul.f32 -1.442695, %v930_v52 }
 0x4ee   :  { %6168 = vpow2.f32 %v4239_v41 }
 0x4ef   :  { %6170 = vpow2.f32 %v4240_v14 }
 0x4f0   :  { %6172 = vpow2.f32 %v4241_v24 }
 0x4f1   :  { %6174 = vtanh.f32 %v928_v39  ;;  %v957_v39 = vrot.slane %v7198_v22, 4 }
 0x4f8   :  { %v6169_v53 = vpop.eup %6168 }
 0x4f9   :  { %v6171_v57 = vpop.eup %6170  ;;  %v936_v15 = vadd.f32 1.0, %v6169_v53 }
 0x4fa   :  { %v942_v59 = vadd.f32 1.0, %v6171_v57  ;;  %v6173_v11 = vpop.eup %6172 }
 0x4fb   :  { %6176 = vrcp.f32 %v936_v15  ;;  %v6175_v16 = vpop.eup %6174  ;;  %v949_v37 = vadd.f32 1.0, %v6173_v11 }
 0x4fc   :  { %6178 = vrcp.f32 %v942_v59 }
 0x4fd   :  { %6180 = vrcp.f32 %v949_v37 }
 0x505   :  { %v6177_v23 = vpop.eup %6176 }
 0x506   :  { %v6179_v33 = vpop.eup %6178  ;;  %v953_v12 = vmul.f32 %v6177_v23, %v6175_v16 }
 0x507   :  { %v952_v30 = vmul.f32 %v6179_v33, %v7313_v21  ;;  %v6181_v41 = vpop.eup %6180 }
 0x509   :  { %v7352_v34 = vadd.f32 %v953_v12, %v952_v30 }
 0x50b   :  { %6182 = vtanh.f32 %v7352_v34 }
 0x515   :  { %v6183_v52 = vpop.eup %6182 }
 0x516   :  { %v956_v14 = vmul.f32 %v6183_v52, %v6181_v41 }
 0x518   :  { %v959_v24 = vadd.f32 %v957_v39, %v956_v14 }
 0x51a   :  { %1025 = vmatmul.mubr.f32.vlgmr.msra.gmra.mrb[8].mxu0 %v959_v24  ;;  %1096 = vmatmul.mubr.f32.vlgmr.msra.gmra.mrb[8].mxu1 %v959_v24 }
 0x51b   :  { %5156 = vmatpush1.bf16.msra.mxu0 %v6924_v31  ;;  %5188 = vmatpush1.bf16.msra.mxu1 %v6937_v35 }
 0x51c   :  { %5158 = vmatprep.subr.bf16.mxu0 %v6939_v36  ;;  %5190 = vmatprep.subr.bf16.mxu1 %v6952_v40 }
 0x51d   :  { %1193 = vmatprep.mubr.f32.mxu0 %v8303_v13  ;;  %1264 = vmatprep.mubr.f32.mxu1 %v8303_v13 }
 0x51f   :  { %5160 = vmatpush1.bf16.msra.mxu0 %v6968_v45  ;;  %5192 = vmatpush1.bf16.msra.mxu1 %v6970_v46 }
 0x520   :  { %5162 = vmatprep.subr.bf16.mxu0 %v6982_v50  ;;  %5194 = vmatprep.subr.bf16.mxu1 %v6993_v54 }
 0x523   :  { %5164 = vmatpush1.bf16.msra.mxu0 %v7005_v58  ;;  %5196 = vmatpush1.bf16.msra.mxu1 %v7018_v62 }
 0x524   :  { %5166 = vmatprep.subr.bf16.mxu0 %v7020_v63  ;;  %5198 = vmatprep.subr.bf16.mxu1 %v7032_v19 }
 0x527   :  { %5168 = vmatpush1.bf16.msra.mxu0 %v7050_v28  ;;  %5200 = vmatpush1.bf16.msra.mxu1 %v7054_v29 }
 0x528   :  { %5170 = vmatprep.subr.bf16.mxu0 %v7056_v32  ;;  %5202 = vmatprep.subr.bf16.mxu1 %v7068_v38 }
 0x52b   :  { %5172 = vmatpush1.bf16.msra.mxu0 %v7086_v48  ;;  %5204 = vmatpush1.bf16.msra.mxu1 %v7090_v49 }
 0x52c   :  { %5174 = vmatprep.subr.bf16.mxu0 %v7092_v51  ;;  %5206 = vmatprep.subr.bf16.mxu1 %v7104_v56 }
 0x52f   :  { %5176 = vmatpush1.bf16.msra.mxu0 %v7122_v17  ;;  %5208 = vmatpush1.bf16.msra.mxu1 %v7126_v18 }
 0x530   :  { %5178 = vmatprep.subr.bf16.mxu0 %v7128_v20  ;;  %5210 = vmatprep.subr.bf16.mxu1 %v7140_v27 }
 0x533   :  { %5180 = vmatpush1.bf16.msra.mxu0 %v7158_v42  ;;  %5212 = vmatpush1.bf16.msra.mxu1 %v7162_v43 }
 0x534   :  { %5182 = vmatprep.subr.bf16.mxu0 %v7164_v47  ;;  %5214 = vmatprep.subr.bf16.mxu1 %v7173_v55 }
 0x537   :  { %5184 = vmatpush1.bf16.msra.mxu0 %v7182_v60  ;;  %5216 = vmatpush1.bf16.msra.mxu1 %v7186_v61 }
 0x538   :  { %5218 = vmatprep.subr.bf16.mxu0 %v6908_v25  ;;  %5250 = vmatprep.subr.bf16.mxu1 %v6910_v26 }
 0x5ed   :  { %v1026_v21 = vpop.f32.mrb[8].mxu0  ;;  %v1097_v53 = vpop.f32.mrb[8].mxu1 }
 0x5ee   :  { %v4242_v57 = vmul.f32 -1.442695, %v1026_v21  ;;  %v1028_v15 = vpop.f32.mrb[9].mxu0  ;;  %v1099_v59 = vpop.f32.mrb[9].mxu1 }
 0x5ef   :  { %v4243_v11 = vmul.f32 -1.442695, %v1028_v15  ;;  %v4244_v16 = vmul.f32 -1.442695, %v1099_v59 }
 0x5f0   :  { %6184 = vpow2.f32 %v4242_v57 }
 0x5f1   :  { %6186 = vpow2.f32 %v4243_v11 }
 0x5f2   :  { %6188 = vpow2.f32 %v4244_v16 }
 0x5f3   :  { %6190 = vtanh.f32 %v1097_v53  ;;  %v1126_v53 = vrot.slane %v7198_v22, 5 }
 0x5fa   :  { %v6185_v23 = vpop.eup %6184 }
 0x5fb   :  { %v6187_v33 = vpop.eup %6186  ;;  %v1105_v12 = vadd.f32 1.0, %v6185_v23 }
 0x5fc   :  { %v1111_v37 = vadd.f32 1.0, %v6187_v33  ;;  %v6189_v30 = vpop.eup %6188 }
 0x5fd   :  { %6192 = vrcp.f32 %v1105_v12  ;;  %v6191_v41 = vpop.eup %6190  ;;  %v1118_v24 = vadd.f32 1.0, %v6189_v30 }
 0x5fe   :  { %6194 = vrcp.f32 %v1111_v37 }
 0x5ff   :  { %6196 = vrcp.f32 %v1118_v24 }
 0x607   :  { %v6193_v52 = vpop.eup %6192 }
 0x608   :  { %v6195_v14 = vpop.eup %6194  ;;  %v1122_v39 = vmul.f32 %v6193_v52, %v6191_v41 }
 0x609   :  { %v1121_v21 = vmul.f32 %v6195_v14, %v7352_v34  ;;  %v6197_v57 = vpop.eup %6196 }
 0x60b   :  { %v7391_v15 = vadd.f32 %v1122_v39, %v1121_v21 }
 0x60d   :  { %6198 = vtanh.f32 %v7391_v15 }
 0x617   :  { %v6199_v59 = vpop.eup %6198 }
 0x618   :  { %v1125_v11 = vmul.f32 %v6199_v59, %v6197_v57 }
 0x61a   :  { %v1128_v16 = vadd.f32 %v1126_v53, %v1125_v11 }
 0x61c   :  { %1194 = vmatmul.mubr.f32.vlgmr.msra.gmra.mrb[10].mxu0 %v1128_v16  ;;  %1265 = vmatmul.mubr.f32.vlgmr.msra.gmra.mrb[10].mxu1 %v1128_v16 }
 0x61d   :  { %5220 = vmatpush1.bf16.msra.mxu0 %v6924_v31  ;;  %5252 = vmatpush1.bf16.msra.mxu1 %v6937_v35 }
 0x61e   :  { %5222 = vmatprep.subr.bf16.mxu0 %v6939_v36  ;;  %5254 = vmatprep.subr.bf16.mxu1 %v6952_v40 }
 0x61f   :  { %1362 = vmatprep.mubr.f32.mxu0 %v8303_v13  ;;  %1433 = vmatprep.mubr.f32.mxu1 %v8303_v13 }
 0x621   :  { %5224 = vmatpush1.bf16.msra.mxu0 %v6968_v45  ;;  %5256 = vmatpush1.bf16.msra.mxu1 %v6970_v46 }
 0x622   :  { %5226 = vmatprep.subr.bf16.mxu0 %v6982_v50  ;;  %5258 = vmatprep.subr.bf16.mxu1 %v6993_v54 }
 0x625   :  { %5228 = vmatpush1.bf16.msra.mxu0 %v7005_v58  ;;  %5260 = vmatpush1.bf16.msra.mxu1 %v7018_v62 }
 0x626   :  { %5230 = vmatprep.subr.bf16.mxu0 %v7020_v63  ;;  %5262 = vmatprep.subr.bf16.mxu1 %v7032_v19 }
 0x629   :  { %5232 = vmatpush1.bf16.msra.mxu0 %v7050_v28  ;;  %5264 = vmatpush1.bf16.msra.mxu1 %v7054_v29 }
 0x62a   :  { %5234 = vmatprep.subr.bf16.mxu0 %v7056_v32  ;;  %5266 = vmatprep.subr.bf16.mxu1 %v7068_v38 }
 0x62d   :  { %5236 = vmatpush1.bf16.msra.mxu0 %v7086_v48  ;;  %5268 = vmatpush1.bf16.msra.mxu1 %v7090_v49 }
 0x62e   :  { %5238 = vmatprep.subr.bf16.mxu0 %v7092_v51  ;;  %5270 = vmatprep.subr.bf16.mxu1 %v7104_v56 }
 0x631   :  { %5240 = vmatpush1.bf16.msra.mxu0 %v7122_v17  ;;  %5272 = vmatpush1.bf16.msra.mxu1 %v7126_v18 }
 0x632   :  { %5242 = vmatprep.subr.bf16.mxu0 %v7128_v20  ;;  %5274 = vmatprep.subr.bf16.mxu1 %v7140_v27 }
 0x635   :  { %5244 = vmatpush1.bf16.msra.mxu0 %v7158_v42  ;;  %5276 = vmatpush1.bf16.msra.mxu1 %v7162_v43 }
 0x636   :  { %5246 = vmatprep.subr.bf16.mxu0 %v7164_v47  ;;  %5278 = vmatprep.subr.bf16.mxu1 %v7173_v55 }
 0x639   :  { %5248 = vmatpush1.bf16.msra.mxu0 %v7182_v60  ;;  %5280 = vmatpush1.bf16.msra.mxu1 %v7186_v61 }
 0x63a   :  { %5282 = vmatprep.subr.bf16.mxu0 %v6908_v25  ;;  %5314 = vmatprep.subr.bf16.mxu1 %v6910_v26 }
 0x6ef   :  { %v1195_v34 = vpop.f32.mrb[10].mxu0  ;;  %v1266_v23 = vpop.f32.mrb[10].mxu1 }
 0x6f0   :  { %v4245_v33 = vmul.f32 -1.442695, %v1195_v34  ;;  %v1197_v12 = vpop.f32.mrb[11].mxu0  ;;  %v1268_v37 = vpop.f32.mrb[11].mxu1 }
 0x6f1   :  { %v4246_v30 = vmul.f32 -1.442695, %v1197_v12  ;;  %v4247_v41 = vmul.f32 -1.442695, %v1268_v37 }
 0x6f2   :  { %6200 = vpow2.f32 %v4245_v33 }
 0x6f3   :  { %6202 = vpow2.f32 %v4246_v30  ;;  %v1636_v30 = vld [vmem:[%s8272_s5 + $0x18] sm:$0xff] }
 0x6f4   :  { %6204 = vpow2.f32 %v4247_v41  ;;  %v1722_v41 = vld [vmem:[%s8274_s7 + $0x10] sm:$0xff] }
 0x6f5   :  { %6206 = vtanh.f32 %v1266_v23  ;;  %v1295_v23 = vrot.slane %v7198_v22, 6 }
 0x6fc   :  { %v6201_v52 = vpop.eup %6200 }
 0x6fd   :  { %v6203_v14 = vpop.eup %6202  ;;  %v1274_v39 = vadd.f32 1.0, %v6201_v52 }
 0x6fe   :  { %v1280_v24 = vadd.f32 1.0, %v6203_v14  ;;  %v6205_v25 = vpop.eup %6204  ;;  %v1723_v14 = vld [vmem:[%s8274_s7 + $0x18] sm:$0xff] }
 0x6ff   :  { %6208 = vrcp.f32 %v1274_v39  ;;  %v6207_v21 = vpop.eup %6206  ;;  %v1287_v11 = vadd.f32 1.0, %v6205_v25  ;;  %v5373_v39 = vpack.c.bf16 %v1723_v14, %v1722_v41  ;;  %v1638_v25 = vld [vmem:[%s8272_s5 + $0x28] sm:$0xff] }
 0x700   :  { %6210 = vrcp.f32 %v1280_v24  ;;  %v1637_v24 = vld [vmem:[%s8272_s5 + $0x20] sm:$0xff] }
 0x701   :  { %6212 = vrcp.f32 %v1287_v11  ;;  %v1639_v11 = vld [vmem:[%s8272_s5 + $0x30] sm:$0xff] }
 0x709   :  { %v6209_v26 = vpop.eup %6208 }
 0x70a   :  { %v6211_v57 = vpop.eup %6210  ;;  %v1291_v59 = vmul.f32 %v6209_v26, %v6207_v21  ;;  %v1724_v21 = vld [vmem:[%s8274_s7 + $0x20] sm:$0xff]  ;;  %v5352_v26 = vpack.c.bf16 %v1638_v25, %v1637_v24 }
 0x70b   :  { %v1290_v53 = vmul.f32 %v6211_v57, %v7391_v15  ;;  %v6213_v34 = vpop.eup %6212  ;;  %v1635_v15 = vld [vmem:[%s8272_s5 + $0x10] sm:$0xff]  ;;  %v1725_v57 = vld [vmem:[%s8274_s7 + $0x28] sm:$0xff] }
 0x70c   :  { %v5349_v52 = vpack.c.bf16 %v1636_v30, %v1635_v15 }
 0x70d   :  { %v7430_v16 = vadd.f32 %v1291_v59, %v1290_v53  ;;  %v5376_v59 = vpack.c.bf16 %v1725_v57, %v1724_v21  ;;  %v1640_v53 = vld [vmem:[%s8272_s5 + $0x38] sm:$0xff] }
 0x70f   :  { %6214 = vtanh.f32 %v7430_v16 }
 0x719   :  { %v6215_v33 = vpop.eup %6214 }
 0x71a   :  { %v1294_v12 = vmul.f32 %v6215_v33, %v6213_v34  ;;  %v5355_v34 = vpack.c.bf16 %v1640_v53, %v1639_v11  ;;  %v1727_v33 = vld [vmem:[%s8274_s7 + $0x38] sm:$0xff] }
 0x71c   :  { %v1297_v37 = vadd.f32 %v1295_v23, %v1294_v12  ;;  %v1641_v23 = vld [vmem:[%s8272_s5 + $0x40] sm:$0xff] }
 0x71e   :  { %1363 = vmatmul.mubr.f32.vlgmr.msra.gmra.mrb[12].mxu0 %v1297_v37  ;;  %1434 = vmatmul.mubr.f32.vlgmr.msra.gmra.mrb[12].mxu1 %v1297_v37  ;;  %v1642_v37 = vld [vmem:[%s8272_s5 + $0x48] sm:$0xff] }
 0x71f   :  { %5284 = vmatpush1.bf16.msra.mxu0 %v6924_v31  ;;  %5316 = vmatpush1.bf16.msra.mxu1 %v6937_v35 }
 0x720   :  { %5286 = vmatprep.subr.bf16.mxu0 %v6939_v36  ;;  %5318 = vmatprep.subr.bf16.mxu1 %v6952_v40 }
 0x721   :  { %1531 = vmatprep.mubr.f32.mxu0 %v8303_v13  ;;  %1602 = vmatprep.mubr.f32.mxu1 %v8303_v13 }
 0x723   :  { %5288 = vmatpush1.bf16.msra.mxu0 %v6968_v45  ;;  %5320 = vmatpush1.bf16.msra.mxu1 %v6970_v46 }
 0x724   :  { %5290 = vmatprep.subr.bf16.mxu0 %v6982_v50  ;;  %5322 = vmatprep.subr.bf16.mxu1 %v6993_v54 }
 0x727   :  { %5292 = vmatpush1.bf16.msra.mxu0 %v7005_v58  ;;  %5324 = vmatpush1.bf16.msra.mxu1 %v7018_v62 }
 0x728   :  { %5294 = vmatprep.subr.bf16.mxu0 %v7020_v63  ;;  %5326 = vmatprep.subr.bf16.mxu1 %v7032_v19 }
 0x72b   :  { %5296 = vmatpush1.bf16.msra.mxu0 %v7050_v28  ;;  %5328 = vmatpush1.bf16.msra.mxu1 %v7054_v29 }
 0x72c   :  { %5298 = vmatprep.subr.bf16.mxu0 %v7056_v32  ;;  %5330 = vmatprep.subr.bf16.mxu1 %v7068_v38 }
 0x72f   :  { %5300 = vmatpush1.bf16.msra.mxu0 %v7086_v48  ;;  %5332 = vmatpush1.bf16.msra.mxu1 %v7090_v49 }
 0x730   :  { %5302 = vmatprep.subr.bf16.mxu0 %v7092_v51  ;;  %5334 = vmatprep.subr.bf16.mxu1 %v7104_v56 }
 0x733   :  { %5304 = vmatpush1.bf16.msra.mxu0 %v7122_v17  ;;  %5336 = vmatpush1.bf16.msra.mxu1 %v7126_v18 }
 0x734   :  { %5306 = vmatprep.subr.bf16.mxu0 %v7128_v20  ;;  %5338 = vmatprep.subr.bf16.mxu1 %v7140_v27  ;;  %v1464_v20 = vrot.slane %v7198_v22, 7 }
 0x737   :  { %5308 = vmatpush1.bf16.msra.mxu0 %v7158_v42  ;;  %5340 = vmatpush1.bf16.msra.mxu1 %v7162_v43  ;;  %v1633_v42 = vld [vmem:[%s8272_s5] sm:$0xff]  ;;  %v1634_v43 = vld [vmem:[%s8272_s5 + $0x8] sm:$0xff] }
 0x738   :  { %5310 = vmatprep.subr.bf16.mxu0 %v7164_v47  ;;  %5342 = vmatprep.subr.bf16.mxu1 %v7173_v55  ;;  %v1720_v47 = vld [vmem:[%s8274_s7] sm:$0xff]  ;;  %v5346_v55 = vpack.c.bf16 %v1634_v43, %v1633_v42 }
 0x73b   :  { %5312 = vmatpush1.bf16.msra.mxu0 %v7182_v60  ;;  %5344 = vmatpush1.bf16.msra.mxu1 %v7186_v61  ;;  %v1721_v60 = vld [vmem:[%s8274_s7 + $0x8] sm:$0xff]  ;;  %v8289_v61 = vmov 0.0|0.0  }
 0x73c   :  { %5345 = vmatprep.subr.bf16.mxu0 %v8289_v61  ;;  %5369 = vmatprep.subr.bf16.mxu1 %v8289_v61  ;;  %v5370_v22 = vpack.c.bf16 %v1721_v60, %v1720_v47 }
 0x7f1   :  { %v1364_v31 = vpop.f32.mrb[12].mxu0  ;;  %v1435_v35 = vpop.f32.mrb[12].mxu1 }
 0x7f2   :  { %v4248_v36 = vmul.f32 -1.442695, %v1364_v31  ;;  %v1366_v40 = vpop.f32.mrb[13].mxu0  ;;  %v1437_v45 = vpop.f32.mrb[13].mxu1  ;;  %v1728_v31 = vld [vmem:[%s8274_s7 + $0x40] sm:$0xff] }
 0x7f3   :  { %v4249_v46 = vmul.f32 -1.442695, %v1366_v40  ;;  %v4250_v50 = vmul.f32 -1.442695, %v1437_v45  ;;  %v1643_v45 = vld [vmem:[%s8272_s5 + $0x50] sm:$0xff] }
 0x7f4   :  { %6216 = vpow2.f32 %v4248_v36  ;;  %v1729_v36 = vld [vmem:[%s8274_s7 + $0x48] sm:$0xff] }
 0x7f5   :  { %6218 = vpow2.f32 %v4249_v46  ;;  %v5382_v40 = vpack.c.bf16 %v1729_v36, %v1728_v31  ;;  %v1644_v46 = vld [vmem:[%s8272_s5 + $0x58] sm:$0xff]  ;;  %v1820_v31 = vld [vmem:[#allocation5] sm:$0x1]  ;;  %v1649_v36 = vld [vmem:[#allocation8] sm:$0x1] }
 0x7f6   :  { %6220 = vpow2.f32 %v4250_v50  ;;  %v1730_v50 = vld [vmem:[%s8274_s7 + $0x50] sm:$0xff] }
 0x7f7   :  { %6222 = vtanh.f32 %v1435_v35  ;;  %v5358_v35 = vpack.c.bf16 %v1642_v37, %v1641_v23  ;;  %v1819_v37 = vld [vmem:[#allocation11 + $0x18] sm:$0xff] }
 0x7fe   :  { %v6217_v54 = vpop.eup %6216 }
 0x7ff   :  { %v6219_v58 = vpop.eup %6218  ;;  %v1443_v62 = vadd.f32 1.0, %v6217_v54  ;;  %v5361_v54 = vpack.c.bf16 %v1644_v46, %v1643_v45 }
 0x800   :  { %v1449_v63 = vadd.f32 1.0, %v6219_v58  ;;  %v6221_v19 = vpop.eup %6220  ;;  %v1731_v58 = vld [vmem:[%s8274_s7 + $0x58] sm:$0xff] }
 0x801   :  { %6224 = vrcp.f32 %v1443_v62  ;;  %v6223_v28 = vpop.eup %6222  ;;  %v1456_v48 = vadd.f32 1.0, %v6221_v19  ;;  %v1645_v62 = vld [vmem:[%s8272_s5 + $0x60] sm:$0xff]  ;;  %v5385_v19 = vpack.c.bf16 %v1731_v58, %v1730_v50 }
 0x802   :  { %6226 = vrcp.f32 %v1449_v63  ;;  %v1646_v63 = vld [vmem:[%s8272_s5 + $0x68] sm:$0xff] }
 0x803   :  { %6228 = vrcp.f32 %v1456_v48  ;;  %v1647_v48 = vld [vmem:[%s8272_s5 + $0x70] sm:$0xff] }
 0x80b   :  { %v6225_v29 = vpop.eup %6224 }
 0x80c   :  { %v6227_v32 = vpop.eup %6226  ;;  %v1460_v38 = vmul.f32 %v6225_v29, %v6223_v28  ;;  %v1732_v28 = vld [vmem:[%s8274_s7 + $0x60] sm:$0xff]  ;;  %v1733_v29 = vld [vmem:[%s8274_s7 + $0x68] sm:$0xff] }
 0x80d   :  { %v1459_v49 = vmul.f32 %v6227_v32, %v7430_v16  ;;  %v6229_v56 = vpop.eup %6228  ;;  %v1726_v16 = vld [vmem:[%s8274_s7 + $0x30] sm:$0xff]  ;;  %v5364_v32 = vpack.c.bf16 %v1646_v63, %v1645_v62 }
 0x80e   :  { %v5379_v12 = vpack.c.bf16 %v1727_v33, %v1726_v16  ;;  %v1817_v33 = vld [vmem:[#allocation11 + $0x8] sm:$0xff] }
 0x80f   :  { %v7467_v51 = vadd.f32 %v1460_v38, %v1459_v49  ;;  %v5388_v38 = vpack.c.bf16 %v1733_v29, %v1732_v28  ;;  %v1648_v49 = vld [vmem:[%s8272_s5 + $0x78] sm:$0xff]  ;;  %v1810_v28 = vld [vmem:[%s8269_s2] sm:$0x1] }
 0x811   :  { %6230 = vtanh.f32 %v7467_v51 }
 0x81b   :  { %v6231_v17 = vpop.eup %6230 }
 0x81c   :  { %v1463_v18 = vmul.f32 %v6231_v17, %v6229_v56  ;;  %v1734_v56 = vld [vmem:[%s8274_s7 + $0x70] sm:$0xff]  ;;  %v1735_v17 = vld [vmem:[%s8274_s7 + $0x78] sm:$0xff] }
 0x81e   :  { %v1466_v27 = vadd.f32 %v1464_v20, %v1463_v18  ;;  %v5367_v18 = vpack.c.bf16 %v1648_v49, %v1647_v48  ;;  %v5391_v20 = vpack.c.bf16 %v1735_v17, %v1734_v56  ;;  %v1970_v17 = vld [vmem:[%s8278_s11] sm:$0x1] }
 0x820   :  { %1532 = vmatmul.mubr.f32.vlgmr.msra.gmra.mrb[14].mxu0 %v1466_v27  ;;  %1603 = vmatmul.mubr.f32.vlgmr.msra.gmra.mrb[14].mxu1 %v1466_v27 }
 0x821   :  { %5347 = vmatpush3.bf16.msra.mxu0 %v5346_v55  ;;  %5371 = vmatpush3.bf16.msra.mxu1 %v5370_v22 }
 0x822   :  { %5348 = vmatprep.subr.bf16.mxu0 %v8289_v61  ;;  %5372 = vmatprep.subr.bf16.mxu1 %v8289_v61 }
 0x823   :  { %4499 = vmatprep.mubr.msk.f32.mxu0 %vm6627_vm2, %v8303_v13  ;;  %4534 = vmatprep.mubr.msk.f32.mxu1 %vm6627_vm2, %v8303_v13 }
 0x825   :  { %5350 = vmatpush3.bf16.msra.mxu0 %v5349_v52  ;;  %5374 = vmatpush3.bf16.msra.mxu1 %v5373_v39 }
 0x826   :  { %5351 = vmatprep.subr.bf16.mxu0 %v8289_v61  ;;  %5375 = vmatprep.subr.bf16.mxu1 %v8289_v61 }
 0x829   :  { %5353 = vmatpush3.bf16.msra.mxu0 %v5352_v26  ;;  %5377 = vmatpush3.bf16.msra.mxu1 %v5376_v59 }
 0x82a   :  { %5354 = vmatprep.subr.bf16.mxu0 %v8289_v61  ;;  %5378 = vmatprep.subr.bf16.mxu1 %v8289_v61 }
 0x82d   :  { %5356 = vmatpush3.bf16.msra.mxu0 %v5355_v34  ;;  %5380 = vmatpush3.bf16.msra.mxu1 %v5379_v12  ;;  %v1816_v34 = vld [vmem:[#allocation11] sm:$0xff] }
 0x82e   :  { %5357 = vmatprep.subr.bf16.mxu0 %v8289_v61  ;;  %5381 = vmatprep.subr.bf16.mxu1 %v8289_v61  ;;  %v1821_v12 = vld [vmem:[#allocation13] sm:$0xff]  ;;  %v5394_v23 = vpack.c.bf16 %v1817_v33, %v1816_v34 }
 0x831   :  { %5359 = vmatpush3.bf16.msra.mxu0 %v5358_v35  ;;  %5383 = vmatpush3.bf16.msra.mxu1 %v5382_v40  ;;  %v1736_v40 = vld [vmem:[#allocation10] sm:$0x1] }
 0x832   :  { %5360 = vmatprep.subr.bf16.mxu0 %v8289_v61  ;;  %5384 = vmatprep.subr.bf16.mxu1 %v8289_v61 }
 0x835   :  { %5362 = vmatpush3.bf16.msra.mxu0 %v5361_v54  ;;  %5386 = vmatpush3.bf16.msra.mxu1 %v5385_v19 }
 0x836   :  { %5363 = vmatprep.subr.bf16.mxu0 %v8289_v61  ;;  %5387 = vmatprep.subr.bf16.mxu1 %v8289_v61 }
 0x839   :  { %5365 = vmatpush3.bf16.msra.mxu0 %v5364_v32  ;;  %5389 = vmatpush3.bf16.msra.mxu1 %v5388_v38 }
 0x83a   :  { %5366 = vmatprep.subr.bf16.mxu0 %v8289_v61  ;;  %5390 = vmatprep.subr.bf16.mxu1 %v8289_v61 }
 0x83d   :  { %5368 = vmatpush3.bf16.msra.mxu0 %v5367_v18  ;;  %5392 = vmatpush3.bf16.msra.mxu1 %v5391_v20 }
 0x83e   :  { %4537 = vmatprep.subr.mxu0 %v8303_v13  ;;  %5393 = vmatprep.subr.bf16.mxu1 %v8289_v61 }
 0x8f3   :  { %v1533_v27 = vpop.f32.mrb[14].mxu0  ;;  %v1604_v42 = vpop.f32.mrb[14].mxu1 }
 0x8f4   :  { %v4251_v43 = vmul.f32 -1.442695, %v1533_v27  ;;  %v1535_v47 = vpop.f32.mrb[15].mxu0  ;;  %v1606_v55 = vpop.f32.mrb[15].mxu1 }
 0x8f5   :  { %v4252_v60 = vmul.f32 -1.442695, %v1535_v47  ;;  %v4253_v22 = vmul.f32 -1.442695, %v1606_v55 }
 0x8f6   :  { %6232 = vpow2.f32 %v4251_v43 }
 0x8f7   :  { %6234 = vpow2.f32 %v4252_v60 }
 0x8f8   :  { %6236 = vpow2.f32 %v4253_v22 }
 0x8f9   :  { %6238 = vtanh.f32 %v1604_v42 }
 0x900   :  { %v6233_v15 = vpop.eup %6232 }
 0x901   :  { %v6235_v30 = vpop.eup %6234  ;;  %v1612_v41 = vadd.f32 1.0, %v6233_v15 }
 0x902   :  { %v1618_v52 = vadd.f32 1.0, %v6235_v30  ;;  %v6237_v14 = vpop.eup %6236 }
 0x903   :  { %6240 = vrcp.f32 %v1612_v41  ;;  %v6239_v39 = vpop.eup %6238  ;;  %v1625_v26 = vadd.f32 1.0, %v6237_v14 }
 0x904   :  { %6242 = vrcp.f32 %v1618_v52 }
 0x905   :  { %6244 = vrcp.f32 %v1625_v26 }
 0x90d   :  { %v6241_v24 = vpop.eup %6240 }
 0x90e   :  { %v6243_v25 = vpop.eup %6242  ;;  %v1629_v21 = vmul.f32 %v6241_v24, %v6239_v39 }
 0x90f   :  { %v1628_v57 = vmul.f32 %v6243_v25, %v7467_v51  ;;  %v6245_v11 = vpop.eup %6244  ;;  %v1818_v51 = vld [vmem:[#allocation11 + $0x10] sm:$0xff] }
 0x910   :  { %v5397_v35 = vpack.c.bf16 %v1819_v37, %v1818_v51 }
 0x911   :  { %v1630_v59 = vadd.f32 %v1629_v21, %v1628_v57 }
 0x913   :  { %6246 = vtanh.f32 %v1630_v59 }
 0x91d   :  { %v6247_v53 = vpop.eup %6246 }
 0x91e   :  { %v1632_v16 = vmul.f32 %v6247_v53, %v6245_v11 }
 0x920   :  { %4500 = vmatmul.mubr.f32.vlgmr.msra.gmra.mrb[16].mxu0 %v1632_v16  ;;  %4535 = vmatmul.mubr.f32.vlgmr.msra.gmra.mrb[16].mxu1 %v1632_v16 }
 0x921   :  { %4539 = vmatprep.mubr.msk.f32.mxu0 %vm6627_vm2, %v8303_v13  ;;  %4550 = vmatprep.mubr.msk.f32.mxu1 %vm6627_vm2, %v8303_v13 }
 0x922   :  { %4538 = vmatpush3.msra.mxu0 %v1821_v12  ;;  %5395 = vmatpush3.bf16.msra.mxu1 %v5394_v23 }
 0x923   :  { %5396 = vmatprep.subr.bf16.mxu1 %v8289_v61 }
 0x924   :  { %4540 = vmatmul.mubr.msk.f32.vlgmr.msra.gmra.mrb[18].mxu0 %vm1822_vm3, %v1820_v31 }
 0x926   :  { %5398 = vmatpush3.bf16.msra.mxu1 %v5397_v35 }
 0x9f3   :  { %v1716_v45 = vpop.f32.mrb[16].mxu0  ;;  %v1803_v46 = vpop.f32.mrb[16].mxu1 }
 0x9f4   :  { %v1717_v50 = vadd.f32 %v1716_v45, %v1649_v36  ;;  %v1804_v54 = vadd.f32 %v1803_v46, %v1736_v40  ;;  %v4501_v58 = vpop.f32.mrb[17].mxu0  ;;  %v4536_v62 = vpop.f32.mrb[17].mxu1 }
 0x9f6   :  { %1808 = vst.msk [vmem:[#allocation17] sm:$0x1] %vm1807_vm4, %v1717_v50  ;;  %1809 = vst.msk [vmem:[#allocation19] sm:$0x1] %vm1807_vm4, %v1804_v54  ;;  %v1811_v63 = vmul.f32 0.5, %v1804_v54 }
 0x9f7   :  { %v1892_v48 = vpop.f32.mrb[18].mxu0 }
 0x9f8   :  { %v1812_v19 = vmul.f32 1.442695, %v1811_v63  ;;  %v4541_v49 = vpop.f32.mrb[19].mxu0 }
 0x9fa   :  { %6248 = vpow2.f32 %v1812_v19 }
 0xa04   :  { %v6249_v29 = vpop.eup %6248 }
 0xa05   :  { %v1814_v32 = vmul.f32 %v6249_v29, %v1810_v28 }
 0xa07   :  { %v1815_v38 = vadd.f32 %v1814_v32, %v1717_v50 }
 0xa09   :  { %4551 = vmatmul.mubr.msk.f32.vlgmr.msra.gmra.mrb[18].mxu1 %vm1896_vm5, %v1815_v38 }
 0xadc   :  { %v1966_v56 = vpop.f32.mrb[18].mxu1 }
 0xadd   :  { %v1967_v18 = vadd.f32 %v1966_v56, %v1892_v48  ;;  %v4552_v20 = vpop.f32.mrb[19].mxu1 }
 0xadf   :  { %v7604_v27 = vadd.f32 %v1970_v17, %v1967_v18 }
 0xae0   :  { %6607 = dma.done.wait [#allocation4], 8192 }
 0xae1   :  { %6608 = vsyncadd [#allocation4], 4294959104 }
 0xae2   :  { %6609 = dma.done.wait [#allocation4 + $0x1], 2048 }
 0xae3   :  { %6610 = vsyncadd [#allocation4 + $0x1], 4294965248  ;;  %2111 = vmatprep.mubr.f32.mxu0 %v8303_v13  ;;  %2182 = vmatprep.mubr.f32.mxu1 %v8303_v13  ;;  %v1984_v42 = vld [vmem:[#allocation2 + $0x8] sm:$0xff]  ;;  %v1983_v47 = vld [vmem:[#allocation2] sm:$0xff]  ;;  %s6628_s2 = smov [#allocation17]  }
 0xae4   :  { %v1988_v43 = vld [vmem:[#allocation2 + $0x28] sm:$0xff]  ;;  %v1987_v60 = vld [vmem:[#allocation2 + $0x20] sm:$0xff]  ;;  %v1986_v11 = vld [vmem:[#allocation2 + $0x18] sm:$0xff]  ;;  %s4179_s11 = sshll.u32 %s6628_s2, 4  ;;  %s4180_s11 = int_to_ptr.vmem [resolvable:$true] %s4179_s11 }
 0xae5   :  { %v7608_v55 = vpack.c.bf16 %v1988_v43, %v1984_v42  ;;  %v1992_v22 = vld [vmem:[#allocation2 + $0x48] sm:$0xff]  ;;  %v7610_v30 = vpack.c.bf16 %v1987_v60, %v1983_v47  ;;  %v1991_v52 = vld [vmem:[#allocation2 + $0x40] sm:$0xff]  ;;  %v1990_v53 = vld [vmem:[#allocation2 + $0x38] sm:$0xff]  ;;  %s6533_s30 = scalar_lea.vmem %s4180_s11, 16  ;;  %s6537_s3 = scalar_lea.vmem %s4180_s11, 32 }
 0xae6   :  { %v1996_v15 = vld [vmem:[#allocation2 + $0x68] sm:$0xff]  ;;  %v1995_v14 = vld [vmem:[#allocation2 + $0x60] sm:$0xff]  ;;  %v7621_v34 = vpack.c.bf16 %v1990_v53, %v1986_v11  ;;  %v1985_v33 = vld [vmem:[#allocation2 + $0x10] sm:$0xff]  ;;  %p6534_p0 = scmp.ne.s32.totalorder %s4180_s11, %s6533_s30  ;;  %p6538_p1 = scmp.lt.s32.totalorder %s4180_s11, %s4180_s11 }
 0xae7   :  { %v7612_v41 = vpack.c.bf16 %v1996_v15, %v1992_v22  ;;  %v2000_v39 = vld [vmem:[#allocation2 + $0x88] sm:$0xff]  ;;  %5400 = vmatprep.subr.bf16.mxu0 %v7608_v55  ;;  %v7616_v25 = vpack.c.bf16 %v1995_v14, %v1991_v52  ;;  %v1999_v21 = vld [vmem:[#allocation2 + $0x80] sm:$0xff]  ;;  %v1989_v12 = vld [vmem:[#allocation2 + $0x30] sm:$0xff]  ;;  %p6539_p2 = scmp.lt.s32.totalorder %s6537_s3, %s6533_s30 }
 0xae8   :  { %v2004_v24 = vld [vmem:[#allocation2 + $0xa8] sm:$0xff]  ;;  %5402 = vmatpush1.bf16.msra.mxu0 %v7610_v30  ;;  %v2003_v26 = vld [vmem:[#allocation2 + $0xa0] sm:$0xff]  ;;  %v7623_v23 = vpack.c.bf16 %v1989_v12, %v1985_v33  ;;  %5432 = vmatprep.subr.bf16.mxu1 %v7621_v34  ;;  %v1994_v37 = vld [vmem:[#allocation2 + $0x58] sm:$0xff] }
 0xae9   :  { %5404 = vmatprep.subr.bf16.mxu0 %v7612_v41  ;;  %v7619_v57 = vpack.c.bf16 %v2004_v24, %v2000_v39  ;;  %v2008_v59 = vld [vmem:[#allocation2 + $0xc8] sm:$0xff]  ;;  %v7626_v51 = vpack.c.bf16 %v2003_v26, %v1999_v21  ;;  %v1998_v31 = vld [vmem:[#allocation2 + $0x78] sm:$0xff]  ;;  %v1993_v35 = vld [vmem:[#allocation2 + $0x50] sm:$0xff]  ;;  %p6540_p3 = por %p6539_p2, %p6538_p1 }
 0xaea   :  { %v2012_v16 = vld [vmem:[#allocation2 + $0xe8] sm:$0xff]  ;;  %v2007_v40 = vld [vmem:[#allocation2 + $0xc0] sm:$0xff]  ;;  %5434 = vmatpush1.bf16.msra.mxu1 %v7623_v23  ;;  %v7633_v46 = vpack.c.bf16 %v1998_v31, %v1994_v37  ;;  %v1997_v50 = vld [vmem:[#allocation2 + $0x70] sm:$0xff] }
 0xaeb   :  { %v7630_v36 = vpack.c.bf16 %v2012_v16, %v2008_v59  ;;  %v2011_v45 = vld [vmem:[#allocation2 + $0xe0] sm:$0xff]  ;;  %v2016_v54 = vld [vmem:[#allocation2 + $0x108] sm:$0xff]  ;;  %v7635_v62 = vpack.c.bf16 %v1997_v50, %v1993_v35  ;;  %v2002_v63 = vld [vmem:[#allocation2 + $0x98] sm:$0xff]  ;;  %p6541_p4 = pnand %p6540_p3, %p6534_p0 }
 0xaec   :  { %5406 = vmatpush1.bf16.msra.mxu0 %v7616_v25  ;;  %v2020_v58 = vld [vmem:[#allocation2 + $0x128] sm:$0xff]  ;;  %5436 = vmatprep.subr.bf16.mxu1 %v7633_v46  ;;  %v2006_v19 = vld [vmem:[#allocation2 + $0xb8] sm:$0xff]  ;;  %v2001_v28 = vld [vmem:[#allocation2 + $0x90] sm:$0xff]  ;;  %v7639_v32 = vpack.c.bf16 %v2011_v45, %v2007_v40 }
 0xaed   :  { %5408 = vmatprep.subr.bf16.mxu0 %v7619_v57  ;;  %v2005_v29 = vld [vmem:[#allocation2 + $0xb0] sm:$0xff]  ;;  %v2015_v38 = vld [vmem:[#allocation2 + $0x100] sm:$0xff]  ;;  %v7641_v49 = vpack.c.bf16 %v2006_v19, %v2002_v63  ;;  %v7644_v56 = vpack.c.bf16 %v2020_v58, %v2016_v54  ;;  %v2024_v17 = vld [vmem:[#allocation2 + $0x148] sm:$0xff] }
 0xaee   :  { %v2019_v48 = vld [vmem:[#allocation2 + $0x120] sm:$0xff]  ;;  %5438 = vmatpush1.bf16.msra.mxu1 %v7635_v62  ;;  %v7647_v18 = vpack.c.bf16 %v2005_v29, %v2001_v28  ;;  %v2010_v20 = vld [vmem:[#allocation2 + $0xd8] sm:$0xff]  ;;  %v2028_v43 = vld [vmem:[#allocation2 + $0x168] sm:$0xff] }
 0xaef   :  { %v2014_v42 = vld [vmem:[#allocation2 + $0xf8] sm:$0xff]  ;;  %5440 = vmatprep.subr.bf16.mxu1 %v7641_v49  ;;  %v2009_v60 = vld [vmem:[#allocation2 + $0xd0] sm:$0xff]  ;;  %v7653_v15 = vpack.c.bf16 %v2019_v48, %v2015_v38  ;;  %v7656_v39 = vpack.c.bf16 %v2028_v43, %v2024_v17  ;;  %v2023_v24 = vld [vmem:[#allocation2 + $0x140] sm:$0xff] }
 0xaf0   :  { %5410 = vmatpush1.bf16.msra.mxu0 %v7626_v51  ;;  %v7650_v47 = vpack.c.bf16 %v2014_v42, %v2010_v20  ;;  %v2013_v22 = vld [vmem:[#allocation2 + $0xf0] sm:$0xff]  ;;  %v2018_v52 = vld [vmem:[#allocation2 + $0x118] sm:$0xff]  ;;  %v2027_v21 = vld [vmem:[#allocation2 + $0x160] sm:$0xff] }
 0xaf1   :  { %5412 = vmatprep.subr.bf16.mxu0 %v7630_v36  ;;  %v2022_v14 = vld [vmem:[#allocation2 + $0x138] sm:$0xff]  ;;  %v2032_v26 = vld [vmem:[#allocation2 + $0x188] sm:$0xff]  ;;  %v7659_v59 = vpack.c.bf16 %v2013_v22, %v2009_v60  ;;  %v2017_v16 = vld [vmem:[#allocation2 + $0x110] sm:$0xff]  ;;  %v7665_v31 = vpack.c.bf16 %v2027_v21, %v2023_v24 }
 0xaf2   :  { %5442 = vmatpush1.bf16.msra.mxu1 %v7647_v18  ;;  %v2036_v11 = vld [vmem:[#allocation2 + $0x1a8] sm:$0xff]  ;;  %v7662_v53 = vpack.c.bf16 %v2022_v14, %v2018_v52  ;;  %v2021_v33 = vld [vmem:[#allocation2 + $0x130] sm:$0xff]  ;;  %v2026_v12 = vld [vmem:[#allocation2 + $0x158] sm:$0xff] }
 0xaf3   :  { %5444 = vmatprep.subr.bf16.mxu1 %v7650_v47  ;;  %v2030_v37 = vld [vmem:[#allocation2 + $0x178] sm:$0xff]  ;;  %v7668_v35 = vpack.c.bf16 %v2036_v11, %v2032_v26  ;;  %v2031_v40 = vld [vmem:[#allocation2 + $0x180] sm:$0xff]  ;;  %v2040_v50 = vld [vmem:[#allocation2 + $0x1c8] sm:$0xff]  ;;  %v7671_v54 = vpack.c.bf16 %v2021_v33, %v2017_v16 }
 0xaf4   :  { %5414 = vmatpush1.bf16.msra.mxu0 %v7639_v32  ;;  %v2035_v45 = vld [vmem:[#allocation2 + $0x1a0] sm:$0xff]  ;;  %v2044_v58 = vld [vmem:[#allocation2 + $0x1e8] sm:$0xff]  ;;  %v7674_v63 = vpack.c.bf16 %v2030_v37, %v2026_v12  ;;  %v2025_v19 = vld [vmem:[#allocation2 + $0x150] sm:$0xff]  ;;  %v1982_v12 = vadd.f32 %v6964_v44, %v7604_v27  ;;  %v7729_v44 = vpack.c.bf16 %v6820_v1, %v6815_v0  ;;  %v7735_v27 = vpack.c.bf16 %v6830_v3, %v6825_v2 }
 0xaf5   :  { %5416 = vmatprep.subr.bf16.mxu0 %v7644_v56  ;;  %v2029_v28 = vld [vmem:[#allocation2 + $0x170] sm:$0xff]  ;;  %v2034_v29 = vld [vmem:[#allocation2 + $0x198] sm:$0xff]  ;;  %v7677_v48 = vpack.c.bf16 %v2035_v45, %v2031_v40  ;;  %v7680_v17 = vpack.c.bf16 %v2044_v58, %v2040_v50  ;;  %v2039_v20 = vld [vmem:[#allocation2 + $0x1c0] sm:$0xff]  ;;  %v7741_v40 = vpack.c.bf16 %v6840_v5, %v6835_v4  ;;  %v7747_v0 = vpack.c.bf16 %v6850_v7, %v6845_v6 }
 0xaf6   :  { %5446 = vmatpush1.bf16.msra.mxu1 %v7659_v59  ;;  %v2038_v38 = vld [vmem:[#allocation2 + $0x1b8] sm:$0xff]  ;;  %v2043_v42 = vld [vmem:[#allocation2 + $0x1e0] sm:$0xff]  ;;  %v7683_v43 = vpack.c.bf16 %v2029_v28, %v2025_v19  ;;  %v2033_v22 = vld [vmem:[#allocation2 + $0x190] sm:$0xff]  ;;  %v7753_v1 = vpack.c.bf16 %v6860_v9, %v6855_v8 }
 0xaf7   :  { %5448 = vmatprep.subr.bf16.mxu1 %v7662_v53  ;;  %v7686_v60 = vpack.c.bf16 %v2038_v38, %v2034_v29  ;;  %v2037_v52 = vld [vmem:[#allocation2 + $0x1b0] sm:$0xff]  ;;  %v2042_v14 = vld [vmem:[#allocation2 + $0x1d8] sm:$0xff]  ;;  %v7689_v21 = vpack.c.bf16 %v2043_v42, %v2039_v20  ;;  %v8305_v4 = vld [vmem:[#allocation34_spill] sm:$0xff] }
 0xaf8   :  { %5418 = vmatpush1.bf16.msra.mxu0 %v7653_v15  ;;  %v2046_v24 = vld [vmem:[#allocation2 + $0x1f8] sm:$0xff]  ;;  %v7693_v26 = vpack.c.bf16 %v2037_v52, %v2033_v22  ;;  %v2041_v16 = vld [vmem:[#allocation2 + $0x1d0] sm:$0xff] }
 0xaf9   :  { %5420 = vmatprep.subr.bf16.mxu0 %v7656_v39  ;;  %v7696_v11 = vpack.c.bf16 %v2046_v24, %v2042_v14  ;;  %v2045_v33 = vld [vmem:[#allocation2 + $0x1f0] sm:$0xff]  ;;  %v8304_v2 = vld [vmem:[#allocation33_spill] sm:$0xff] }
 0xafa   :  { %5450 = vmatpush1.bf16.msra.mxu1 %v7671_v54  ;;  %v7702_v37 = vpack.c.bf16 %v2045_v33, %v2041_v16  ;;  %v7759_v3 = vpack.c.bf16 %v8304_v2, %v6865_v10  ;;  %v8306_v5 = vld [vmem:[#allocation35_spill] sm:$0xff]  ;;  %v8307_v7 = vld [vmem:[#allocation36_spill] sm:$0xff]  ;;  %v8308_v8 = vld [vmem:[#allocation37_spill] sm:$0xff] }
 0xafb   :  { %5452 = vmatprep.subr.bf16.mxu1 %v7674_v63  ;;  %v7764_v6 = vpack.c.bf16 %v8306_v5, %v8305_v4  ;;  %v7770_v9 = vpack.c.bf16 %v8308_v8, %v8307_v7 }
 0xafc   :  { %5422 = vmatpush1.bf16.msra.mxu0 %v7665_v31 }
 0xafd   :  { %5424 = vmatprep.subr.bf16.mxu0 %v7668_v35 }
 0xafe   :  { %5454 = vmatpush1.bf16.msra.mxu1 %v7683_v43 }
 0xaff   :  { %5456 = vmatprep.subr.bf16.mxu1 %v7686_v60 }
 0xb00   :  { %5426 = vmatpush1.bf16.msra.mxu0 %v7677_v48 }
 0xb01   :  { %5428 = vmatprep.subr.bf16.mxu0 %v7680_v17 }
 0xb02   :  { %5458 = vmatpush1.bf16.msra.mxu1 %v7693_v26 }
 0xb03   :  { %5460 = vmatprep.subr.bf16.mxu1 %v7696_v11 }
 0xb04   :  { %5430 = vmatpush1.bf16.msra.mxu0 %v7689_v21 }
 0xb05   :  { %5463 = vmatprep.subr.bf16.mxu0 %v8289_v61 }
 0xb06   :  { %5462 = vmatpush1.bf16.msra.mxu1 %v7702_v37 }
 0xb07   :  { %2112 = vmatmul.mubr.f32.vlgmr.msra.gmra.mrb[20].mxu0 %v1982_v12  ;;  %5488 = vmatprep.subr.bf16.mxu1 %v7608_v55 }
 0xb08   :  { %4585 = vmatprep.mubr.msk.f32.mxu0 %vm6627_vm2, %v8303_v13  ;;  %5465 = vmatpush3.bf16.msra.mxu0 %v7729_v44 }
 0xb09   :  { %2183 = vmatmul.mubr.f32.vlgmr.msra.gmra.mrb[20].mxu1 %v1982_v12  ;;  %5466 = vmatprep.subr.bf16.mxu0 %v8289_v61 }
 0xb0a   :  { %5490 = vmatpush1.bf16.msra.mxu1 %v7610_v30  ;;  %2389 = vmatprep.mubr.f32.mxu1 %v8303_v13 }
 0xb0b   :  { %5492 = vmatprep.subr.bf16.mxu1 %v7612_v41 }
 0xb0c   :  { %5468 = vmatpush3.bf16.msra.mxu0 %v7735_v27 }
 0xb0d   :  { %5469 = vmatprep.subr.bf16.mxu0 %v8289_v61 }
 0xb0e   :  { %5494 = vmatpush1.bf16.msra.mxu1 %v7616_v25 }
 0xb0f   :  { %5496 = vmatprep.subr.bf16.mxu1 %v7619_v57 }
 0xb10   :  { %5471 = vmatpush3.bf16.msra.mxu0 %v7741_v40 }
 0xb11   :  { %5472 = vmatprep.subr.bf16.mxu0 %v8289_v61 }
 0xb12   :  { %5498 = vmatpush1.bf16.msra.mxu1 %v7626_v51 }
 0xb13   :  { %5500 = vmatprep.subr.bf16.mxu1 %v7630_v36 }
 0xb14   :  { %5474 = vmatpush3.bf16.msra.mxu0 %v7747_v0 }
 0xb15   :  { %5475 = vmatprep.subr.bf16.mxu0 %v8289_v61 }
 0xb16   :  { %5502 = vmatpush1.bf16.msra.mxu1 %v7639_v32 }
 0xb17   :  { %5504 = vmatprep.subr.bf16.mxu1 %v7644_v56 }
 0xb18   :  { %5477 = vmatpush3.bf16.msra.mxu0 %v7753_v1 }
 0xb19   :  { %5478 = vmatprep.subr.bf16.mxu0 %v8289_v61 }
 0xb1a   :  { %5506 = vmatpush1.bf16.msra.mxu1 %v7653_v15 }
 0xb1b   :  { %5508 = vmatprep.subr.bf16.mxu1 %v7656_v39 }
 0xb1c   :  { %5480 = vmatpush3.bf16.msra.mxu0 %v7759_v3 }
 0xb1d   :  { %5481 = vmatprep.subr.bf16.mxu0 %v8289_v61 }
 0xb1e   :  { %5510 = vmatpush1.bf16.msra.mxu1 %v7665_v31 }
 0xb1f   :  { %5512 = vmatprep.subr.bf16.mxu1 %v7668_v35 }
 0xb20   :  { %5483 = vmatpush3.bf16.msra.mxu0 %v7764_v6 }
 0xb21   :  { %5484 = vmatprep.subr.bf16.mxu0 %v8289_v61 }
 0xb22   :  { %5514 = vmatpush1.bf16.msra.mxu1 %v7677_v48 }
 0xb23   :  { %5516 = vmatprep.subr.bf16.mxu1 %v7680_v17 }
 0xb24   :  { %5486 = vmatpush3.bf16.msra.mxu0 %v7770_v9 }
 0xb25   :  { %5520 = vmatprep.subr.bf16.mxu0 %v7621_v34 }
 0xb26   :  { %5518 = vmatpush1.bf16.msra.mxu1 %v7689_v21 }
 0xb27   :  { %5551 = vmatprep.subr.bf16.mxu1 %v8289_v61 }
 0xbda   :  { %v2113_v10 = vpop.f32.mrb[20].mxu0 }
 0xbdb   :  { %v4257_v45 = vmul.f32 -1.442695, %v2113_v10  ;;  %v2115_v50 = vpop.f32.mrb[21].mxu0  ;;  %v7795_v10 = vld [vmem:[#allocation14] sm:$0x1] }
 0xbdc   :  { %v4258_v58 = vmul.f32 -1.442695, %v2115_v50  ;;  %v2184_v19 = vpop.f32.mrb[20].mxu1 }
 0xbdd   :  { %6250 = vpow2.f32 %v4257_v45  ;;  %v2186_v28 = vpop.f32.mrb[21].mxu1 }
 0xbde   :  { %6252 = vpow2.f32 %v4258_v58  ;;  %v4259_v29 = vmul.f32 -1.442695, %v2186_v28 }
 0xbe0   :  { %6254 = vpow2.f32 %v4259_v29  ;;  %v8310_v29 = vld [vmem:[#allocation38_spill] sm:$0xff] }
 0xbe1   :  { %6256 = vtanh.f32 %v2184_v19 }
 0xbe7   :  { %v6251_v38 = vpop.eup %6250 }
 0xbe8   :  { %v6253_v20 = vpop.eup %6252  ;;  %v2192_v42 = vadd.f32 1.0, %v6251_v38 }
 0xbe9   :  { %v2198_v22 = vadd.f32 1.0, %v6253_v20 }
 0xbea   :  { %6258 = vrcp.f32 %v2192_v42  ;;  %v6255_v52 = vpop.eup %6254 }
 0xbeb   :  { %6260 = vrcp.f32 %v2198_v22  ;;  %v6257_v14 = vpop.eup %6256  ;;  %v2205_v16 = vadd.f32 1.0, %v6255_v52 }
 0xbed   :  { %6262 = vrcp.f32 %v2205_v16 }
 0xbf4   :  { %v6259_v24 = vpop.eup %6258 }
 0xbf5   :  { %v6261_v33 = vpop.eup %6260  ;;  %v2209_v12 = vmul.f32 %v6259_v24, %v6257_v14 }
 0xbf6   :  { %v2208_v2 = vmul.f32 0.0, %v6261_v33 }
 0xbf7   :  { %v6263_v5 = vpop.eup %6262 }
 0xbf8   :  { %v7775_v4 = vadd.f32 %v2209_v12, %v2208_v2 }
 0xbfa   :  { %6264 = vtanh.f32 %v7775_v4 }
 0xc04   :  { %v6265_v7 = vpop.eup %6264 }
 0xc05   :  { %v2212_v8 = vmul.f32 %v6265_v7, %v6263_v5 }
 0xc07   :  { %4586 = vmatmul.mubr.f32.vlgmr.msra.gmra.mrb[22].mxu0 %v2212_v8 }
 0xc08   :  { %5522 = vmatpush1.bf16.msra.mxu0 %v7623_v23  ;;  %2460 = vmatprep.mubr.f32.mxu0 %v8303_v13 }
 0xc09   :  { %5524 = vmatprep.subr.bf16.mxu0 %v7633_v46 }
 0xc0c   :  { %5526 = vmatpush1.bf16.msra.mxu0 %v7635_v62 }
 0xc0d   :  { %5528 = vmatprep.subr.bf16.mxu0 %v7641_v49 }
 0xc10   :  { %5530 = vmatpush1.bf16.msra.mxu0 %v7647_v18 }
 0xc11   :  { %5532 = vmatprep.subr.bf16.mxu0 %v7650_v47 }
 0xc14   :  { %5534 = vmatpush1.bf16.msra.mxu0 %v7659_v59 }
 0xc15   :  { %5536 = vmatprep.subr.bf16.mxu0 %v7662_v53 }
 0xc18   :  { %5538 = vmatpush1.bf16.msra.mxu0 %v7671_v54 }
 0xc19   :  { %5540 = vmatprep.subr.bf16.mxu0 %v7674_v63 }
 0xc1c   :  { %5542 = vmatpush1.bf16.msra.mxu0 %v7683_v43 }
 0xc1d   :  { %5544 = vmatprep.subr.bf16.mxu0 %v7686_v60 }
 0xc20   :  { %5546 = vmatpush1.bf16.msra.mxu0 %v7693_v26 }
 0xc21   :  { %5548 = vmatprep.subr.bf16.mxu0 %v7696_v11 }
 0xc24   :  { %5550 = vmatpush1.bf16.msra.mxu0 %v7702_v37 }
 0xc25   :  { %5576 = vmatprep.subr.bf16.mxu0 %v7608_v55 }
 0xcda   :  { %v2296_v45 = vpop.f32.mrb[22].mxu0 }
 0xcdb   :  { %v7798_v50 = vadd.f32 %v2296_v45, %v7795_v10  ;;  %v4587_v58 = vpop.f32.mrb[23].mxu0 }
 0xcdd   :  { %8309 = vst [vmem:[#allocation33_spill] sm:$0xff] %v7798_v50  ;;  %v2300_v19 = vsel %vm1807_vm4, %v7798_v50, -inf }
 0xcde   :  { %2301 = vmax.xlane.f32.xlu0 %v2300_v19 }
 0xd6b   :  { %v2302_v28 = vpop.xlane.xlu0 %2301 }
 0xd6c   :  { %vm2303_vm6 = vcmp.eq.f32.partialorder %v7798_v50, %v2302_v28 }
 0xd6d   :  { %v2304_v38 = vsel %vm2303_vm6, %v8310_v29, 32 }
 0xd6e   :  { %v2305_v20 = vsel %vm1807_vm4, %v2304_v38, 2147483647 }
 0xd6f   :  { %v2307_v42 = vshra.s32 %v2305_v20, 16  ;;  %v2306_v52 = vand.u32 65535, %v2305_v20 }
 0xd71   :  { %v2309_v22 = vcvt.s32.f32 %v2307_v42  ;;  %v2308_v24 = vcvt.s32.f32 %v2306_v52 }
 0xd73   :  { %2310 = vmin.xlane.f32.xlu0 %v2309_v22 }
 0xe00   :  { %v2311_v14 = vpop.xlane.xlu0 %2310 }
 0xe01   :  { %vm2312_vm7 = vcmp.eq.f32.partialorder %v2309_v22, %v2311_v14  ;;  %v2317_v33 = vcvt.f32.s32 %v2311_v14 }
 0xe02   :  { %v2313_v16 = vsel %vm2312_vm7, %v2308_v24, inf }
 0xe03   :  { %2314 = vmin.xlane.f32.xlu1 %v2313_v16  ;;  %v2318_v2 = vshll.u32 %v2317_v33, 16 }
 0xe90   :  { %v2315_v12 = vpop.xlane.xlu1 %2314 }
 0xe91   :  { %v2316_v5 = vcvt.f32.s32 %v2315_v12 }
 0xe93   :  { %v2319_v7 = vadd.s32 %v2318_v2, %v2316_v5 }
 0xe95   :  { %v2320_v45 = vadd.s32 32, %v2319_v7 }
 0xe97   :  { %vm2321_vm8 = vcmp.eq.s32.totalorder %v8310_v29, %v2320_v45 }
 0xe98   :  { %v4260_v58 = vsel %vm2321_vm8, 1.0, %v8303_v13 }
 0xe99   :  { %v2324_v19 = vadd.f32 %v4260_v58, %v2212_v8 }
 0xe9b   :  { %2390 = vmatmul.mubr.f32.vlgmr.msra.gmra.mrb[22].mxu1 %v2324_v19  ;;  %2461 = vmatmul.mubr.f32.vlgmr.msra.gmra.mrb[24].mxu0 %v2324_v19 }
 0xe9c   :  { %5553 = vmatpush3.bf16.msra.mxu1 %v7729_v44  ;;  %4620 = vmatprep.mubr.msk.f32.mxu1 %vm6627_vm2, %v8303_v13 }
 0xe9d   :  { %5554 = vmatprep.subr.bf16.mxu1 %v8289_v61  ;;  %5578 = vmatpush1.bf16.msra.mxu0 %v7610_v30 }
 0xe9e   :  { %5580 = vmatprep.subr.bf16.mxu0 %v7612_v41  ;;  %2650 = vmatprep.mubr.f32.mxu0 %v8303_v13 }
 0xea0   :  { %5556 = vmatpush3.bf16.msra.mxu1 %v7735_v27 }
 0xea1   :  { %5557 = vmatprep.subr.bf16.mxu1 %v8289_v61  ;;  %5582 = vmatpush1.bf16.msra.mxu0 %v7616_v25 }
 0xea2   :  { %5584 = vmatprep.subr.bf16.mxu0 %v7619_v57 }
 0xea4   :  { %5559 = vmatpush3.bf16.msra.mxu1 %v7741_v40 }
 0xea5   :  { %5560 = vmatprep.subr.bf16.mxu1 %v8289_v61  ;;  %5586 = vmatpush1.bf16.msra.mxu0 %v7626_v51 }
 0xea6   :  { %5588 = vmatprep.subr.bf16.mxu0 %v7630_v36 }
 0xea8   :  { %5562 = vmatpush3.bf16.msra.mxu1 %v7747_v0 }
 0xea9   :  { %5563 = vmatprep.subr.bf16.mxu1 %v8289_v61  ;;  %5590 = vmatpush1.bf16.msra.mxu0 %v7639_v32 }
 0xeaa   :  { %5592 = vmatprep.subr.bf16.mxu0 %v7644_v56 }
 0xeac   :  { %5565 = vmatpush3.bf16.msra.mxu1 %v7753_v1 }
 0xead   :  { %5566 = vmatprep.subr.bf16.mxu1 %v8289_v61  ;;  %5594 = vmatpush1.bf16.msra.mxu0 %v7653_v15 }
 0xeae   :  { %5596 = vmatprep.subr.bf16.mxu0 %v7656_v39 }
 0xeb0   :  { %5568 = vmatpush3.bf16.msra.mxu1 %v7759_v3 }
 0xeb1   :  { %5569 = vmatprep.subr.bf16.mxu1 %v8289_v61  ;;  %5598 = vmatpush1.bf16.msra.mxu0 %v7665_v31 }
 0xeb2   :  { %5600 = vmatprep.subr.bf16.mxu0 %v7668_v35 }
 0xeb4   :  { %5571 = vmatpush3.bf16.msra.mxu1 %v7764_v6 }
 0xeb5   :  { %5572 = vmatprep.subr.bf16.mxu1 %v8289_v61  ;;  %5602 = vmatpush1.bf16.msra.mxu0 %v7677_v48 }
 0xeb6   :  { %5604 = vmatprep.subr.bf16.mxu0 %v7680_v17 }
 0xeb8   :  { %5574 = vmatpush3.bf16.msra.mxu1 %v7770_v9 }
 0xeb9   :  { %5608 = vmatprep.subr.bf16.mxu1 %v7621_v34  ;;  %5606 = vmatpush1.bf16.msra.mxu0 %v7689_v21 }
 0xeba   :  { %5639 = vmatprep.subr.bf16.mxu0 %v8289_v61 }
 0xf6e   :  { %v2391_v8 = vpop.f32.mrb[22].mxu1  ;;  %v2462_v28 = vpop.f32.mrb[24].mxu0 }
 0xf6f   :  { %v4261_v38 = vmul.f32 -1.442695, %v2391_v8  ;;  %v2393_v20 = vpop.f32.mrb[23].mxu1  ;;  %v2464_v42 = vpop.f32.mrb[25].mxu0 }
 0xf70   :  { %v4262_v22 = vmul.f32 -1.442695, %v2393_v20  ;;  %v4263_v52 = vmul.f32 -1.442695, %v2464_v42 }
 0xf71   :  { %6266 = vpow2.f32 %v4261_v38 }
 0xf72   :  { %6268 = vpow2.f32 %v4262_v22 }
 0xf73   :  { %6270 = vpow2.f32 %v4263_v52 }
 0xf74   :  { %6272 = vtanh.f32 %v2462_v28 }
 0xf7b   :  { %v6267_v14 = vpop.eup %6266 }
 0xf7c   :  { %v6269_v24 = vpop.eup %6268  ;;  %v2470_v16 = vadd.f32 1.0, %v6267_v14 }
 0xf7d   :  { %v2476_v33 = vadd.f32 1.0, %v6269_v24  ;;  %v6271_v12 = vpop.eup %6270 }
 0xf7e   :  { %6274 = vrcp.f32 %v2470_v16  ;;  %v6273_v2 = vpop.eup %6272  ;;  %v2483_v58 = vadd.f32 1.0, %v6271_v12 }
 0xf7f   :  { %6276 = vrcp.f32 %v2476_v33 }
 0xf80   :  { %6278 = vrcp.f32 %v2483_v58 }
 0xf88   :  { %v6275_v5 = vpop.eup %6274 }
 0xf89   :  { %v6277_v7 = vpop.eup %6276  ;;  %v2487_v45 = vmul.f32 %v6275_v5, %v6273_v2 }
 0xf8a   :  { %v2486_v19 = vmul.f32 %v6277_v7, %v7775_v4  ;;  %v6279_v38 = vpop.eup %6278 }
 0xf8c   :  { %v7843_v8 = vadd.f32 %v2487_v45, %v2486_v19 }
 0xf8e   :  { %6280 = vtanh.f32 %v7843_v8 }
 0xf98   :  { %v6281_v20 = vpop.eup %6280 }
 0xf99   :  { %v2490_v42 = vmul.f32 %v6281_v20, %v6279_v38 }
 0xf9b   :  { %4621 = vmatmul.mubr.f32.vlgmr.msra.gmra.mrb[24].mxu1 %v2490_v42 }
 0xf9c   :  { %5610 = vmatpush1.bf16.msra.mxu1 %v7623_v23  ;;  %2721 = vmatprep.mubr.f32.mxu1 %v8303_v13 }
 0xf9d   :  { %5612 = vmatprep.subr.bf16.mxu1 %v7633_v46 }
 0xfa0   :  { %5614 = vmatpush1.bf16.msra.mxu1 %v7635_v62 }
 0xfa1   :  { %5616 = vmatprep.subr.bf16.mxu1 %v7641_v49 }
 0xfa4   :  { %5618 = vmatpush1.bf16.msra.mxu1 %v7647_v18 }
 0xfa5   :  { %5620 = vmatprep.subr.bf16.mxu1 %v7650_v47 }
 0xfa8   :  { %5622 = vmatpush1.bf16.msra.mxu1 %v7659_v59 }
 0xfa9   :  { %5624 = vmatprep.subr.bf16.mxu1 %v7662_v53 }
 0xfac   :  { %5626 = vmatpush1.bf16.msra.mxu1 %v7671_v54 }
 0xfad   :  { %5628 = vmatprep.subr.bf16.mxu1 %v7674_v63 }
 0xfb0   :  { %5630 = vmatpush1.bf16.msra.mxu1 %v7683_v43 }
 0xfb1   :  { %5632 = vmatprep.subr.bf16.mxu1 %v7686_v60 }
 0xfb4   :  { %5634 = vmatpush1.bf16.msra.mxu1 %v7693_v26 }
 0xfb5   :  { %5636 = vmatprep.subr.bf16.mxu1 %v7696_v11 }
 0xfb8   :  { %5638 = vmatpush1.bf16.msra.mxu1 %v7702_v37 }
 0xfb9   :  { %5664 = vmatprep.subr.bf16.mxu1 %v7608_v55 }
0x106e   :  { %v2557_v4 = vpop.f32.mrb[24].mxu1 }
0x106f   :  { %v7864_v28 = vadd.f32 %v2557_v4, %v7795_v10  ;;  %v4622_v22 = vpop.f32.mrb[25].mxu1 }
0x1071   :  { %v2561_v52 = vsel %vm1807_vm4, %v7864_v28, -inf }
0x1072   :  { %2562 = vmax.xlane.f32.xlu1 %v2561_v52 }
0x10ff   :  { %v2563_v14 = vpop.xlane.xlu1 %2562 }
0x1100   :  { %vm2564_vm9 = vcmp.eq.f32.partialorder %v7864_v28, %v2563_v14 }
0x1101   :  { %v2565_v24 = vsel %vm2564_vm9, %v8310_v29, 32 }
0x1102   :  { %v2566_v16 = vsel %vm1807_vm4, %v2565_v24, 2147483647 }
0x1103   :  { %v2568_v33 = vshra.s32 %v2566_v16, 16  ;;  %v2567_v2 = vand.u32 65535, %v2566_v16 }
0x1105   :  { %v2570_v12 = vcvt.s32.f32 %v2568_v33  ;;  %v2569_v7 = vcvt.s32.f32 %v2567_v2 }
0x1107   :  { %2571 = vmin.xlane.f32.xlu0 %v2570_v12 }
0x1194   :  { %v2572_v5 = vpop.xlane.xlu0 %2571 }
0x1195   :  { %vm2573_vm10 = vcmp.eq.f32.partialorder %v2570_v12, %v2572_v5  ;;  %v2578_v58 = vcvt.f32.s32 %v2572_v5 }
0x1196   :  { %v2574_v45 = vsel %vm2573_vm10, %v2569_v7, inf }
0x1197   :  { %2575 = vmin.xlane.f32.xlu1 %v2574_v45  ;;  %v2579_v38 = vshll.u32 %v2578_v58, 16 }
0x1224   :  { %v2576_v19 = vpop.xlane.xlu1 %2575 }
0x1225   :  { %v2577_v20 = vcvt.f32.s32 %v2576_v19 }
0x1227   :  { %v2580_v4 = vadd.s32 %v2579_v38, %v2577_v20 }
0x1229   :  { %v2581_v22 = vadd.s32 32, %v2580_v4 }
0x122b   :  { %vm2582_vm11 = vcmp.eq.s32.totalorder %v8310_v29, %v2581_v22 }
0x122c   :  { %v4264_v52 = vsel %vm2582_vm11, 1.0, %v8303_v13 }
0x122d   :  { %v2585_v14 = vadd.f32 %v4264_v52, %v2490_v42 }
0x122f   :  { %2651 = vmatmul.mubr.f32.vlgmr.msra.gmra.mrb[26].mxu0 %v2585_v14  ;;  %2722 = vmatmul.mubr.f32.vlgmr.msra.gmra.mrb[26].mxu1 %v2585_v14 }
0x1230   :  { %5641 = vmatpush3.bf16.msra.mxu0 %v7729_v44  ;;  %4655 = vmatprep.mubr.msk.f32.mxu0 %vm6627_vm2, %v8303_v13 }
0x1231   :  { %5642 = vmatprep.subr.bf16.mxu0 %v8289_v61  ;;  %5666 = vmatpush1.bf16.msra.mxu1 %v7610_v30 }
0x1232   :  { %5668 = vmatprep.subr.bf16.mxu1 %v7612_v41  ;;  %2911 = vmatprep.mubr.f32.mxu1 %v8303_v13 }
0x1234   :  { %5644 = vmatpush3.bf16.msra.mxu0 %v7735_v27 }
0x1235   :  { %5645 = vmatprep.subr.bf16.mxu0 %v8289_v61  ;;  %5670 = vmatpush1.bf16.msra.mxu1 %v7616_v25 }
0x1236   :  { %5672 = vmatprep.subr.bf16.mxu1 %v7619_v57 }
0x1238   :  { %5647 = vmatpush3.bf16.msra.mxu0 %v7741_v40 }
0x1239   :  { %5648 = vmatprep.subr.bf16.mxu0 %v8289_v61  ;;  %5674 = vmatpush1.bf16.msra.mxu1 %v7626_v51 }
0x123a   :  { %5676 = vmatprep.subr.bf16.mxu1 %v7630_v36 }
0x123c   :  { %5650 = vmatpush3.bf16.msra.mxu0 %v7747_v0 }
0x123d   :  { %5651 = vmatprep.subr.bf16.mxu0 %v8289_v61  ;;  %5678 = vmatpush1.bf16.msra.mxu1 %v7639_v32 }
0x123e   :  { %5680 = vmatprep.subr.bf16.mxu1 %v7644_v56 }
0x1240   :  { %5653 = vmatpush3.bf16.msra.mxu0 %v7753_v1 }
0x1241   :  { %5654 = vmatprep.subr.bf16.mxu0 %v8289_v61  ;;  %5682 = vmatpush1.bf16.msra.mxu1 %v7653_v15 }
0x1242   :  { %5684 = vmatprep.subr.bf16.mxu1 %v7656_v39 }
0x1244   :  { %5656 = vmatpush3.bf16.msra.mxu0 %v7759_v3 }
0x1245   :  { %5657 = vmatprep.subr.bf16.mxu0 %v8289_v61  ;;  %5686 = vmatpush1.bf16.msra.mxu1 %v7665_v31 }
0x1246   :  { %5688 = vmatprep.subr.bf16.mxu1 %v7668_v35 }
0x1248   :  { %5659 = vmatpush3.bf16.msra.mxu0 %v7764_v6 }
0x1249   :  { %5660 = vmatprep.subr.bf16.mxu0 %v8289_v61  ;;  %5690 = vmatpush1.bf16.msra.mxu1 %v7677_v48 }
0x124a   :  { %5692 = vmatprep.subr.bf16.mxu1 %v7680_v17 }
0x124c   :  { %5662 = vmatpush3.bf16.msra.mxu0 %v7770_v9 }
0x124d   :  { %5696 = vmatprep.subr.bf16.mxu0 %v7621_v34  ;;  %5694 = vmatpush1.bf16.msra.mxu1 %v7689_v21 }
0x124e   :  { %5727 = vmatprep.subr.bf16.mxu1 %v8289_v61 }
0x1302   :  { %v2652_v42 = vpop.f32.mrb[26].mxu0  ;;  %v2723_v24 = vpop.f32.mrb[26].mxu1 }
0x1303   :  { %v4265_v16 = vmul.f32 -1.442695, %v2652_v42  ;;  %v2654_v33 = vpop.f32.mrb[27].mxu0  ;;  %v2725_v12 = vpop.f32.mrb[27].mxu1 }
0x1304   :  { %v4266_v2 = vmul.f32 -1.442695, %v2654_v33  ;;  %v4267_v5 = vmul.f32 -1.442695, %v2725_v12 }
0x1305   :  { %6282 = vpow2.f32 %v4265_v16 }
0x1306   :  { %6284 = vpow2.f32 %v4266_v2 }
0x1307   :  { %6286 = vpow2.f32 %v4267_v5 }
0x1308   :  { %6288 = vtanh.f32 %v2723_v24 }
0x130f   :  { %v6283_v7 = vpop.eup %6282 }
0x1310   :  { %v6285_v45 = vpop.eup %6284  ;;  %v2731_v58 = vadd.f32 1.0, %v6283_v7 }
0x1311   :  { %v2737_v19 = vadd.f32 1.0, %v6285_v45  ;;  %v6287_v38 = vpop.eup %6286 }
0x1312   :  { %6290 = vrcp.f32 %v2731_v58  ;;  %v6289_v20 = vpop.eup %6288  ;;  %v2744_v14 = vadd.f32 1.0, %v6287_v38 }
0x1313   :  { %6292 = vrcp.f32 %v2737_v19 }
0x1314   :  { %6294 = vrcp.f32 %v2744_v14 }
0x131c   :  { %v6291_v4 = vpop.eup %6290 }
0x131d   :  { %v6293_v22 = vpop.eup %6292  ;;  %v2748_v52 = vmul.f32 %v6291_v4, %v6289_v20 }
0x131e   :  { %v2747_v42 = vmul.f32 %v6293_v22, %v7843_v8  ;;  %v6295_v16 = vpop.eup %6294 }
0x1320   :  { %v7909_v33 = vadd.f32 %v2748_v52, %v2747_v42 }
0x1322   :  { %6296 = vtanh.f32 %v7909_v33 }
0x132c   :  { %v6297_v12 = vpop.eup %6296 }
0x132d   :  { %v2751_v2 = vmul.f32 %v6297_v12, %v6295_v16 }
0x132f   :  { %4656 = vmatmul.mubr.f32.vlgmr.msra.gmra.mrb[28].mxu0 %v2751_v2 }
0x1330   :  { %5698 = vmatpush1.bf16.msra.mxu0 %v7623_v23  ;;  %2982 = vmatprep.mubr.f32.mxu0 %v8303_v13 }
0x1331   :  { %5700 = vmatprep.subr.bf16.mxu0 %v7633_v46 }
0x1334   :  { %5702 = vmatpush1.bf16.msra.mxu0 %v7635_v62 }
0x1335   :  { %5704 = vmatprep.subr.bf16.mxu0 %v7641_v49 }
0x1338   :  { %5706 = vmatpush1.bf16.msra.mxu0 %v7647_v18 }
0x1339   :  { %5708 = vmatprep.subr.bf16.mxu0 %v7650_v47 }
0x133c   :  { %5710 = vmatpush1.bf16.msra.mxu0 %v7659_v59 }
0x133d   :  { %5712 = vmatprep.subr.bf16.mxu0 %v7662_v53 }
0x1340   :  { %5714 = vmatpush1.bf16.msra.mxu0 %v7671_v54 }
0x1341   :  { %5716 = vmatprep.subr.bf16.mxu0 %v7674_v63 }
0x1344   :  { %5718 = vmatpush1.bf16.msra.mxu0 %v7683_v43 }
0x1345   :  { %5720 = vmatprep.subr.bf16.mxu0 %v7686_v60 }
0x1348   :  { %5722 = vmatpush1.bf16.msra.mxu0 %v7693_v26 }
0x1349   :  { %5724 = vmatprep.subr.bf16.mxu0 %v7696_v11 }
0x134c   :  { %5726 = vmatpush1.bf16.msra.mxu0 %v7702_v37 }
0x134d   :  { %5752 = vmatprep.subr.bf16.mxu0 %v7608_v55 }
0x1402   :  { %v2818_v8 = vpop.f32.mrb[28].mxu0 }
0x1403   :  { %v7930_v24 = vadd.f32 %v2818_v8, %v7795_v10  ;;  %v4657_v5 = vpop.f32.mrb[29].mxu0 }
0x1405   :  { %v2822_v7 = vsel %vm1807_vm4, %v7930_v24, -inf }
0x1406   :  { %2823 = vmax.xlane.f32.xlu0 %v2822_v7 }
0x1493   :  { %v2824_v45 = vpop.xlane.xlu0 %2823 }
0x1494   :  { %vm2825_vm12 = vcmp.eq.f32.partialorder %v7930_v24, %v2824_v45 }
0x1495   :  { %v2826_v58 = vsel %vm2825_vm12, %v8310_v29, 32 }
0x1496   :  { %v2827_v19 = vsel %vm1807_vm4, %v2826_v58, 2147483647 }
0x1497   :  { %v2829_v38 = vshra.s32 %v2827_v19, 16  ;;  %v2828_v4 = vand.u32 65535, %v2827_v19 }
0x1499   :  { %v2831_v20 = vcvt.s32.f32 %v2829_v38  ;;  %v2830_v52 = vcvt.s32.f32 %v2828_v4 }
0x149b   :  { %2832 = vmin.xlane.f32.xlu1 %v2831_v20 }
0x1528   :  { %v2833_v22 = vpop.xlane.xlu1 %2832 }
0x1529   :  { %vm2834_vm13 = vcmp.eq.f32.partialorder %v2831_v20, %v2833_v22  ;;  %v2839_v42 = vcvt.f32.s32 %v2833_v22 }
0x152a   :  { %v2835_v14 = vsel %vm2834_vm13, %v2830_v52, inf }
0x152b   :  { %2836 = vmin.xlane.f32.xlu0 %v2835_v14  ;;  %v2840_v12 = vshll.u32 %v2839_v42, 16 }
0x15b8   :  { %v2837_v16 = vpop.xlane.xlu0 %2836 }
0x15b9   :  { %v2838_v8 = vcvt.f32.s32 %v2837_v16 }
0x15bb   :  { %v2841_v5 = vadd.s32 %v2840_v12, %v2838_v8 }
0x15bd   :  { %v2842_v7 = vadd.s32 32, %v2841_v5 }
0x15bf   :  { %vm2843_vm14 = vcmp.eq.s32.totalorder %v8310_v29, %v2842_v7 }
0x15c0   :  { %v4268_v45 = vsel %vm2843_vm14, 1.0, %v8303_v13 }
0x15c1   :  { %v2846_v58 = vadd.f32 %v4268_v45, %v2751_v2 }
0x15c3   :  { %2912 = vmatmul.mubr.f32.vlgmr.msra.gmra.mrb[28].mxu1 %v2846_v58  ;;  %2983 = vmatmul.mubr.f32.vlgmr.msra.gmra.mrb[30].mxu0 %v2846_v58 }
0x15c4   :  { %5729 = vmatpush3.bf16.msra.mxu1 %v7729_v44  ;;  %4690 = vmatprep.mubr.msk.f32.mxu1 %vm6627_vm2, %v8303_v13 }
0x15c5   :  { %5730 = vmatprep.subr.bf16.mxu1 %v8289_v61  ;;  %5754 = vmatpush1.bf16.msra.mxu0 %v7610_v30 }
0x15c6   :  { %5756 = vmatprep.subr.bf16.mxu0 %v7612_v41  ;;  %3172 = vmatprep.mubr.f32.mxu0 %v8303_v13 }
0x15c8   :  { %5732 = vmatpush3.bf16.msra.mxu1 %v7735_v27 }
0x15c9   :  { %5733 = vmatprep.subr.bf16.mxu1 %v8289_v61  ;;  %5758 = vmatpush1.bf16.msra.mxu0 %v7616_v25 }
0x15ca   :  { %5760 = vmatprep.subr.bf16.mxu0 %v7619_v57 }
0x15cc   :  { %5735 = vmatpush3.bf16.msra.mxu1 %v7741_v40 }
0x15cd   :  { %5736 = vmatprep.subr.bf16.mxu1 %v8289_v61  ;;  %5762 = vmatpush1.bf16.msra.mxu0 %v7626_v51 }
0x15ce   :  { %5764 = vmatprep.subr.bf16.mxu0 %v7630_v36 }
0x15d0   :  { %5738 = vmatpush3.bf16.msra.mxu1 %v7747_v0 }
0x15d1   :  { %5739 = vmatprep.subr.bf16.mxu1 %v8289_v61  ;;  %5766 = vmatpush1.bf16.msra.mxu0 %v7639_v32 }
0x15d2   :  { %5768 = vmatprep.subr.bf16.mxu0 %v7644_v56 }
0x15d4   :  { %5741 = vmatpush3.bf16.msra.mxu1 %v7753_v1 }
0x15d5   :  { %5742 = vmatprep.subr.bf16.mxu1 %v8289_v61  ;;  %5770 = vmatpush1.bf16.msra.mxu0 %v7653_v15 }
0x15d6   :  { %5772 = vmatprep.subr.bf16.mxu0 %v7656_v39 }
0x15d8   :  { %5744 = vmatpush3.bf16.msra.mxu1 %v7759_v3 }
0x15d9   :  { %5745 = vmatprep.subr.bf16.mxu1 %v8289_v61  ;;  %5774 = vmatpush1.bf16.msra.mxu0 %v7665_v31 }
0x15da   :  { %5776 = vmatprep.subr.bf16.mxu0 %v7668_v35 }
0x15dc   :  { %5747 = vmatpush3.bf16.msra.mxu1 %v7764_v6 }
0x15dd   :  { %5748 = vmatprep.subr.bf16.mxu1 %v8289_v61  ;;  %5778 = vmatpush1.bf16.msra.mxu0 %v7677_v48 }
0x15de   :  { %5780 = vmatprep.subr.bf16.mxu0 %v7680_v17 }
0x15e0   :  { %5750 = vmatpush3.bf16.msra.mxu1 %v7770_v9 }
0x15e1   :  { %5784 = vmatprep.subr.bf16.mxu1 %v7621_v34  ;;  %5782 = vmatpush1.bf16.msra.mxu0 %v7689_v21 }
0x15e2   :  { %5815 = vmatprep.subr.bf16.mxu0 %v8289_v61 }
0x1696   :  { %v2913_v2 = vpop.f32.mrb[28].mxu1  ;;  %v2984_v19 = vpop.f32.mrb[30].mxu0 }
0x1697   :  { %v4269_v38 = vmul.f32 -1.442695, %v2913_v2  ;;  %v2915_v20 = vpop.f32.mrb[29].mxu1  ;;  %v2986_v4 = vpop.f32.mrb[31].mxu0 }
0x1698   :  { %v4270_v22 = vmul.f32 -1.442695, %v2915_v20  ;;  %v4271_v52 = vmul.f32 -1.442695, %v2986_v4 }
0x1699   :  { %6298 = vpow2.f32 %v4269_v38 }
0x169a   :  { %6300 = vpow2.f32 %v4270_v22 }
0x169b   :  { %6302 = vpow2.f32 %v4271_v52 }
0x169c   :  { %6304 = vtanh.f32 %v2984_v19 }
0x16a3   :  { %v6299_v14 = vpop.eup %6298 }
0x16a4   :  { %v6301_v42 = vpop.eup %6300  ;;  %v2992_v16 = vadd.f32 1.0, %v6299_v14 }
0x16a5   :  { %v2998_v12 = vadd.f32 1.0, %v6301_v42  ;;  %v6303_v8 = vpop.eup %6302 }
0x16a6   :  { %6306 = vrcp.f32 %v2992_v16  ;;  %v6305_v5 = vpop.eup %6304  ;;  %v3005_v2 = vadd.f32 1.0, %v6303_v8 }
0x16a7   :  { %6308 = vrcp.f32 %v2998_v12 }
0x16a8   :  { %6310 = vrcp.f32 %v3005_v2 }
0x16b0   :  { %v6307_v7 = vpop.eup %6306 }
0x16b1   :  { %v6309_v45 = vpop.eup %6308  ;;  %v3009_v58 = vmul.f32 %v6307_v7, %v6305_v5 }
0x16b2   :  { %v3008_v61 = vmul.f32 %v6309_v45, %v7909_v33  ;;  %v6311_v38 = vpop.eup %6310 }
0x16b4   :  { %v7975_v20 = vadd.f32 %v3009_v58, %v3008_v61 }
0x16b6   :  { %6312 = vtanh.f32 %v7975_v20 }
0x16c0   :  { %v6313_v4 = vpop.eup %6312 }
0x16c1   :  { %v3012_v22 = vmul.f32 %v6313_v4, %v6311_v38 }
0x16c3   :  { %4691 = vmatmul.mubr.f32.vlgmr.msra.gmra.mrb[30].mxu1 %v3012_v22 }
0x16c4   :  { %5786 = vmatpush1.bf16.msra.mxu1 %v7623_v23  ;;  %3243 = vmatprep.mubr.f32.mxu1 %v8303_v13 }
0x16c5   :  { %5788 = vmatprep.subr.bf16.mxu1 %v7633_v46 }
0x16c8   :  { %5790 = vmatpush1.bf16.msra.mxu1 %v7635_v62 }
0x16c9   :  { %5792 = vmatprep.subr.bf16.mxu1 %v7641_v49 }
0x16cc   :  { %5794 = vmatpush1.bf16.msra.mxu1 %v7647_v18 }
0x16cd   :  { %5796 = vmatprep.subr.bf16.mxu1 %v7650_v47 }
0x16d0   :  { %5798 = vmatpush1.bf16.msra.mxu1 %v7659_v59 }
0x16d1   :  { %5800 = vmatprep.subr.bf16.mxu1 %v7662_v53 }
0x16d4   :  { %5802 = vmatpush1.bf16.msra.mxu1 %v7671_v54 }
0x16d5   :  { %5804 = vmatprep.subr.bf16.mxu1 %v7674_v63 }
0x16d8   :  { %5806 = vmatpush1.bf16.msra.mxu1 %v7683_v43 }
0x16d9   :  { %5808 = vmatprep.subr.bf16.mxu1 %v7686_v60 }
0x16dc   :  { %5810 = vmatpush1.bf16.msra.mxu1 %v7693_v26 }
0x16dd   :  { %5812 = vmatprep.subr.bf16.mxu1 %v7696_v11 }
0x16e0   :  { %5814 = vmatpush1.bf16.msra.mxu1 %v7702_v37 }
0x16e1   :  { %5840 = vmatprep.subr.bf16.mxu1 %v7608_v55 }
0x1796   :  { %v3079_v61 = vpop.f32.mrb[30].mxu1 }
0x1797   :  { %v7996_v33 = vadd.f32 %v3079_v61, %v7795_v10  ;;  %v4692_v19 = vpop.f32.mrb[31].mxu1 }
0x1799   :  { %8311 = vst [vmem:[#allocation34_spill] sm:$0xff] %v7996_v33  ;;  %v3083_v52 = vsel %vm1807_vm4, %v7996_v33, -inf }
0x179a   :  { %3084 = vmax.xlane.f32.xlu1 %v3083_v52 }
0x1827   :  { %v3085_v14 = vpop.xlane.xlu1 %3084 }
0x1828   :  { %vm3086_vm15 = vcmp.eq.f32.partialorder %v7996_v33, %v3085_v14 }
0x1829   :  { %v3087_v42 = vsel %vm3086_vm15, %v8310_v29, 32 }
0x182a   :  { %v3088_v16 = vsel %vm1807_vm4, %v3087_v42, 2147483647 }
0x182b   :  { %v3090_v12 = vshra.s32 %v3088_v16, 16  ;;  %v3089_v5 = vand.u32 65535, %v3088_v16  ;;  %v8312_v16 = vmov 0.0|0.0  }
0x182d   :  { %v3092_v8 = vcvt.s32.f32 %v3090_v12  ;;  %v3091_v45 = vcvt.s32.f32 %v3089_v5 }
0x182f   :  { %3093 = vmin.xlane.f32.xlu0 %v3092_v8 }
0x18bc   :  { %v3094_v7 = vpop.xlane.xlu0 %3093 }
0x18bd   :  { %vm3095_vm0 = vcmp.eq.f32.partialorder %v3092_v8, %v3094_v7  ;;  %v3100_v2 = vcvt.f32.s32 %v3094_v7 }
0x18be   :  { %v3096_v58 = vsel %vm3095_vm0, %v3091_v45, inf }
0x18bf   :  { %3097 = vmin.xlane.f32.xlu1 %v3096_v58  ;;  %v3101_v4 = vshll.u32 %v3100_v2, 16 }
0x194c   :  { %v3098_v38 = vpop.xlane.xlu1 %3097 }
0x194d   :  { %v3099_v61 = vcvt.f32.s32 %v3098_v38 }
0x194f   :  { %v3102_v19 = vadd.s32 %v3101_v4, %v3099_v61 }
0x1951   :  { %v3103_v52 = vadd.s32 32, %v3102_v19 }
0x1953   :  { %vm3104_vm1 = vcmp.eq.s32.totalorder %v8310_v29, %v3103_v52 }
0x1954   :  { %v4272_v14 = vsel %vm3104_vm1, 1.0, %v8303_v13 }
0x1955   :  { %v3107_v42 = vadd.f32 %v4272_v14, %v3012_v22 }
0x1957   :  { %3173 = vmatmul.mubr.f32.vlgmr.msra.gmra.mrb[32].mxu0 %v3107_v42  ;;  %3244 = vmatmul.mubr.f32.vlgmr.msra.gmra.mrb[32].mxu1 %v3107_v42 }
0x1958   :  { %5817 = vmatpush3.bf16.msra.mxu0 %v7729_v44  ;;  %4725 = vmatprep.mubr.msk.f32.mxu0 %vm6627_vm2, %v8303_v13 }
0x1959   :  { %5818 = vmatprep.subr.bf16.mxu0 %v8312_v16  ;;  %5842 = vmatpush1.bf16.msra.mxu1 %v7610_v30 }
0x195a   :  { %5844 = vmatprep.subr.bf16.mxu1 %v7612_v41  ;;  %3433 = vmatprep.mubr.f32.mxu1 %v8303_v13 }
0x195c   :  { %5820 = vmatpush3.bf16.msra.mxu0 %v7735_v27 }
0x195d   :  { %5821 = vmatprep.subr.bf16.mxu0 %v8312_v16  ;;  %5846 = vmatpush1.bf16.msra.mxu1 %v7616_v25 }
0x195e   :  { %5848 = vmatprep.subr.bf16.mxu1 %v7619_v57 }
0x1960   :  { %5823 = vmatpush3.bf16.msra.mxu0 %v7741_v40 }
0x1961   :  { %5824 = vmatprep.subr.bf16.mxu0 %v8312_v16  ;;  %5850 = vmatpush1.bf16.msra.mxu1 %v7626_v51 }
0x1962   :  { %5852 = vmatprep.subr.bf16.mxu1 %v7630_v36 }
0x1964   :  { %5826 = vmatpush3.bf16.msra.mxu0 %v7747_v0 }
0x1965   :  { %5827 = vmatprep.subr.bf16.mxu0 %v8312_v16  ;;  %5854 = vmatpush1.bf16.msra.mxu1 %v7639_v32 }
0x1966   :  { %5856 = vmatprep.subr.bf16.mxu1 %v7644_v56 }
0x1968   :  { %5829 = vmatpush3.bf16.msra.mxu0 %v7753_v1 }
0x1969   :  { %5830 = vmatprep.subr.bf16.mxu0 %v8312_v16  ;;  %5858 = vmatpush1.bf16.msra.mxu1 %v7653_v15 }
0x196a   :  { %5860 = vmatprep.subr.bf16.mxu1 %v7656_v39 }
0x196c   :  { %5832 = vmatpush3.bf16.msra.mxu0 %v7759_v3 }
0x196d   :  { %5833 = vmatprep.subr.bf16.mxu0 %v8312_v16  ;;  %5862 = vmatpush1.bf16.msra.mxu1 %v7665_v31 }
0x196e   :  { %5864 = vmatprep.subr.bf16.mxu1 %v7668_v35 }
0x1970   :  { %5835 = vmatpush3.bf16.msra.mxu0 %v7764_v6 }
0x1971   :  { %5836 = vmatprep.subr.bf16.mxu0 %v8312_v16  ;;  %5866 = vmatpush1.bf16.msra.mxu1 %v7677_v48 }
0x1972   :  { %5868 = vmatprep.subr.bf16.mxu1 %v7680_v17 }
0x1974   :  { %5838 = vmatpush3.bf16.msra.mxu0 %v7770_v9 }
0x1975   :  { %5872 = vmatprep.subr.bf16.mxu0 %v7621_v34  ;;  %5870 = vmatpush1.bf16.msra.mxu1 %v7689_v21 }
0x1976   :  { %5903 = vmatprep.subr.bf16.mxu1 %v8312_v16 }
0x1a2a   :  { %v3174_v22 = vpop.f32.mrb[32].mxu0  ;;  %v3245_v12 = vpop.f32.mrb[32].mxu1 }
0x1a2b   :  { %v4273_v8 = vmul.f32 -1.442695, %v3174_v22  ;;  %v3176_v5 = vpop.f32.mrb[33].mxu0  ;;  %v3247_v7 = vpop.f32.mrb[33].mxu1 }
0x1a2c   :  { %v4274_v45 = vmul.f32 -1.442695, %v3176_v5  ;;  %v4275_v58 = vmul.f32 -1.442695, %v3247_v7 }
0x1a2d   :  { %6314 = vpow2.f32 %v4273_v8 }
0x1a2e   :  { %6316 = vpow2.f32 %v4274_v45 }
0x1a2f   :  { %6318 = vpow2.f32 %v4275_v58 }
0x1a30   :  { %6320 = vtanh.f32 %v3245_v12 }
0x1a37   :  { %v6315_v2 = vpop.eup %6314 }
0x1a38   :  { %v6317_v38 = vpop.eup %6316  ;;  %v3253_v4 = vadd.f32 1.0, %v6315_v2 }
0x1a39   :  { %v3259_v61 = vadd.f32 1.0, %v6317_v38  ;;  %v6319_v19 = vpop.eup %6318 }
0x1a3a   :  { %6322 = vrcp.f32 %v3253_v4  ;;  %v6321_v52 = vpop.eup %6320  ;;  %v3266_v22 = vadd.f32 1.0, %v6319_v19 }
0x1a3b   :  { %6324 = vrcp.f32 %v3259_v61 }
0x1a3c   :  { %6326 = vrcp.f32 %v3266_v22 }
0x1a44   :  { %v6323_v14 = vpop.eup %6322 }
0x1a45   :  { %v6325_v42 = vpop.eup %6324  ;;  %v3270_v50 = vmul.f32 %v6323_v14, %v6321_v52 }
0x1a46   :  { %v3269_v33 = vmul.f32 %v6325_v42, %v7975_v20  ;;  %v6327_v8 = vpop.eup %6326 }
0x1a48   :  { %v8041_v5 = vadd.f32 %v3270_v50, %v3269_v33 }
0x1a4a   :  { %6328 = vtanh.f32 %v8041_v5 }
0x1a54   :  { %v6329_v7 = vpop.eup %6328 }
0x1a55   :  { %v3273_v45 = vmul.f32 %v6329_v7, %v6327_v8 }
0x1a57   :  { %4726 = vmatmul.mubr.f32.vlgmr.msra.gmra.mrb[34].mxu0 %v3273_v45 }
0x1a58   :  { %5874 = vmatpush1.bf16.msra.mxu0 %v7623_v23  ;;  %3504 = vmatprep.mubr.f32.mxu0 %v8303_v13 }
0x1a59   :  { %5876 = vmatprep.subr.bf16.mxu0 %v7633_v46 }
0x1a5c   :  { %5878 = vmatpush1.bf16.msra.mxu0 %v7635_v62 }
0x1a5d   :  { %5880 = vmatprep.subr.bf16.mxu0 %v7641_v49 }
0x1a60   :  { %5882 = vmatpush1.bf16.msra.mxu0 %v7647_v18 }
0x1a61   :  { %5884 = vmatprep.subr.bf16.mxu0 %v7650_v47 }
0x1a64   :  { %5886 = vmatpush1.bf16.msra.mxu0 %v7659_v59 }
0x1a65   :  { %5888 = vmatprep.subr.bf16.mxu0 %v7662_v53 }
0x1a68   :  { %5890 = vmatpush1.bf16.msra.mxu0 %v7671_v54 }
0x1a69   :  { %5892 = vmatprep.subr.bf16.mxu0 %v7674_v63 }
0x1a6c   :  { %5894 = vmatpush1.bf16.msra.mxu0 %v7683_v43 }
0x1a6d   :  { %5896 = vmatprep.subr.bf16.mxu0 %v7686_v60 }
0x1a70   :  { %5898 = vmatpush1.bf16.msra.mxu0 %v7693_v26 }
0x1a71   :  { %5900 = vmatprep.subr.bf16.mxu0 %v7696_v11 }
0x1a74   :  { %5902 = vmatpush1.bf16.msra.mxu0 %v7702_v37 }
0x1a75   :  { %5928 = vmatprep.subr.bf16.mxu0 %v7608_v55 }
0x1b2a   :  { %v3340_v50 = vpop.f32.mrb[34].mxu0 }
0x1b2b   :  { %v8062_v20 = vadd.f32 %v3340_v50, %v7795_v10  ;;  %v4727_v33 = vpop.f32.mrb[35].mxu0 }
0x1b2d   :  { %v3344_v12 = vsel %vm1807_vm4, %v8062_v20, -inf }
0x1b2e   :  { %3345 = vmax.xlane.f32.xlu0 %v3344_v12 }
0x1bbb   :  { %v3346_v58 = vpop.xlane.xlu0 %3345 }
0x1bbc   :  { %vm3347_vm3 = vcmp.eq.f32.partialorder %v8062_v20, %v3346_v58 }
0x1bbd   :  { %v3348_v2 = vsel %vm3347_vm3, %v8310_v29, 32 }
0x1bbe   :  { %v3349_v38 = vsel %vm1807_vm4, %v3348_v2, 2147483647 }
0x1bbf   :  { %v3351_v4 = vshra.s32 %v3349_v38, 16  ;;  %v3350_v19 = vand.u32 65535, %v3349_v38 }
0x1bc1   :  { %v3353_v61 = vcvt.s32.f32 %v3351_v4  ;;  %v3352_v14 = vcvt.s32.f32 %v3350_v19 }
0x1bc3   :  { %3354 = vmin.xlane.f32.xlu1 %v3353_v61 }
0x1c50   :  { %v3355_v52 = vpop.xlane.xlu1 %3354 }
0x1c51   :  { %vm3356_vm6 = vcmp.eq.f32.partialorder %v3353_v61, %v3355_v52  ;;  %v3361_v42 = vcvt.f32.s32 %v3355_v52 }
0x1c52   :  { %v3357_v10 = vsel %vm3356_vm6, %v3352_v14, inf }
0x1c53   :  { %3358 = vmin.xlane.f32.xlu0 %v3357_v10  ;;  %v3362_v8 = vshll.u32 %v3361_v42, 16 }
0x1ce0   :  { %v3359_v22 = vpop.xlane.xlu0 %3358 }
0x1ce1   :  { %v3360_v7 = vcvt.f32.s32 %v3359_v22 }
0x1ce3   :  { %v3363_v50 = vadd.s32 %v3362_v8, %v3360_v7 }
0x1ce5   :  { %v3364_v33 = vadd.s32 32, %v3363_v50 }
0x1ce7   :  { %vm3365_vm7 = vcmp.eq.s32.totalorder %v8310_v29, %v3364_v33 }
0x1ce8   :  { %v4276_v12 = vsel %vm3365_vm7, 1.0, %v8303_v13 }
0x1ce9   :  { %v3368_v58 = vadd.f32 %v4276_v12, %v3273_v45 }
0x1ceb   :  { %3434 = vmatmul.mubr.f32.vlgmr.msra.gmra.mrb[34].mxu1 %v3368_v58  ;;  %3505 = vmatmul.mubr.f32.vlgmr.msra.gmra.mrb[36].mxu0 %v3368_v58 }
0x1cec   :  { %5905 = vmatpush3.bf16.msra.mxu1 %v7729_v44  ;;  %4760 = vmatprep.mubr.msk.f32.mxu1 %vm6627_vm2, %v8303_v13 }
0x1ced   :  { %5906 = vmatprep.subr.bf16.mxu1 %v8312_v16  ;;  %5930 = vmatpush1.bf16.msra.mxu0 %v7610_v30 }
0x1cee   :  { %5932 = vmatprep.subr.bf16.mxu0 %v7612_v41  ;;  %3694 = vmatprep.mubr.f32.mxu0 %v8303_v13 }
0x1cf0   :  { %5908 = vmatpush3.bf16.msra.mxu1 %v7735_v27 }
0x1cf1   :  { %5909 = vmatprep.subr.bf16.mxu1 %v8312_v16  ;;  %5934 = vmatpush1.bf16.msra.mxu0 %v7616_v25 }
0x1cf2   :  { %5936 = vmatprep.subr.bf16.mxu0 %v7619_v57 }
0x1cf4   :  { %5911 = vmatpush3.bf16.msra.mxu1 %v7741_v40 }
0x1cf5   :  { %5912 = vmatprep.subr.bf16.mxu1 %v8312_v16  ;;  %5938 = vmatpush1.bf16.msra.mxu0 %v7626_v51 }
0x1cf6   :  { %5940 = vmatprep.subr.bf16.mxu0 %v7630_v36 }
0x1cf8   :  { %5914 = vmatpush3.bf16.msra.mxu1 %v7747_v0 }
0x1cf9   :  { %5915 = vmatprep.subr.bf16.mxu1 %v8312_v16  ;;  %5942 = vmatpush1.bf16.msra.mxu0 %v7639_v32 }
0x1cfa   :  { %5944 = vmatprep.subr.bf16.mxu0 %v7644_v56 }
0x1cfc   :  { %5917 = vmatpush3.bf16.msra.mxu1 %v7753_v1 }
0x1cfd   :  { %5918 = vmatprep.subr.bf16.mxu1 %v8312_v16  ;;  %5946 = vmatpush1.bf16.msra.mxu0 %v7653_v15 }
0x1cfe   :  { %5948 = vmatprep.subr.bf16.mxu0 %v7656_v39 }
0x1d00   :  { %5920 = vmatpush3.bf16.msra.mxu1 %v7759_v3 }
0x1d01   :  { %5921 = vmatprep.subr.bf16.mxu1 %v8312_v16  ;;  %5950 = vmatpush1.bf16.msra.mxu0 %v7665_v31 }
0x1d02   :  { %5952 = vmatprep.subr.bf16.mxu0 %v7668_v35 }
0x1d04   :  { %5923 = vmatpush3.bf16.msra.mxu1 %v7764_v6 }
0x1d05   :  { %5924 = vmatprep.subr.bf16.mxu1 %v8312_v16  ;;  %5954 = vmatpush1.bf16.msra.mxu0 %v7677_v48 }
0x1d06   :  { %5956 = vmatprep.subr.bf16.mxu0 %v7680_v17 }
0x1d08   :  { %5926 = vmatpush3.bf16.msra.mxu1 %v7770_v9 }
0x1d09   :  { %5960 = vmatprep.subr.bf16.mxu1 %v7621_v34  ;;  %5958 = vmatpush1.bf16.msra.mxu0 %v7689_v21 }
0x1d0a   :  { %5991 = vmatprep.subr.bf16.mxu0 %v8312_v16 }
0x1dbe   :  { %v3435_v45 = vpop.f32.mrb[34].mxu1  ;;  %v3506_v2 = vpop.f32.mrb[36].mxu0 }
0x1dbf   :  { %v4277_v38 = vmul.f32 -1.442695, %v3435_v45  ;;  %v3437_v4 = vpop.f32.mrb[35].mxu1  ;;  %v3508_v61 = vpop.f32.mrb[37].mxu0 }
0x1dc0   :  { %v4278_v19 = vmul.f32 -1.442695, %v3437_v4  ;;  %v4279_v52 = vmul.f32 -1.442695, %v3508_v61 }
0x1dc1   :  { %6330 = vpow2.f32 %v4277_v38 }
0x1dc2   :  { %6332 = vpow2.f32 %v4278_v19 }
0x1dc3   :  { %6334 = vpow2.f32 %v4279_v52 }
0x1dc4   :  { %6336 = vtanh.f32 %v3506_v2  ;;  %v8127_v2 = vld [vmem:[#allocation14] sm:$0x1] }
0x1dcb   :  { %v6331_v14 = vpop.eup %6330 }
0x1dcc   :  { %v6333_v10 = vpop.eup %6332  ;;  %v3514_v42 = vadd.f32 1.0, %v6331_v14 }
0x1dcd   :  { %v3520_v22 = vadd.f32 1.0, %v6333_v10  ;;  %v6335_v8 = vpop.eup %6334 }
0x1dce   :  { %6338 = vrcp.f32 %v3514_v42  ;;  %v6337_v7 = vpop.eup %6336  ;;  %v3527_v58 = vadd.f32 1.0, %v6335_v8 }
0x1dcf   :  { %6340 = vrcp.f32 %v3520_v22 }
0x1dd0   :  { %6342 = vrcp.f32 %v3527_v58 }
0x1dd8   :  { %v6339_v50 = vpop.eup %6338 }
0x1dd9   :  { %v6341_v33 = vpop.eup %6340  ;;  %v3531_v12 = vmul.f32 %v6339_v50, %v6337_v7 }
0x1dda   :  { %v3530_v45 = vmul.f32 %v6341_v33, %v8041_v5  ;;  %v6343_v38 = vpop.eup %6342 }
0x1ddc   :  { %v8107_v4 = vadd.f32 %v3531_v12, %v3530_v45 }
0x1dde   :  { %6344 = vtanh.f32 %v8107_v4 }
0x1de8   :  { %v6345_v61 = vpop.eup %6344 }
0x1de9   :  { %v3534_v19 = vmul.f32 %v6345_v61, %v6343_v38 }
0x1deb   :  { %4761 = vmatmul.mubr.f32.vlgmr.msra.gmra.mrb[36].mxu1 %v3534_v19 }
0x1dec   :  { %5962 = vmatpush1.bf16.msra.mxu1 %v7623_v23  ;;  %3765 = vmatprep.mubr.f32.mxu1 %v8303_v13 }
0x1ded   :  { %5964 = vmatprep.subr.bf16.mxu1 %v7633_v46 }
0x1df0   :  { %5966 = vmatpush1.bf16.msra.mxu1 %v7635_v62 }
0x1df1   :  { %5968 = vmatprep.subr.bf16.mxu1 %v7641_v49 }
0x1df4   :  { %5970 = vmatpush1.bf16.msra.mxu1 %v7647_v18 }
0x1df5   :  { %5972 = vmatprep.subr.bf16.mxu1 %v7650_v47 }
0x1df8   :  { %5974 = vmatpush1.bf16.msra.mxu1 %v7659_v59 }
0x1df9   :  { %5976 = vmatprep.subr.bf16.mxu1 %v7662_v53 }
0x1dfc   :  { %5978 = vmatpush1.bf16.msra.mxu1 %v7671_v54 }
0x1dfd   :  { %5980 = vmatprep.subr.bf16.mxu1 %v7674_v63 }
0x1e00   :  { %5982 = vmatpush1.bf16.msra.mxu1 %v7683_v43 }
0x1e01   :  { %5984 = vmatprep.subr.bf16.mxu1 %v7686_v60 }
0x1e04   :  { %5986 = vmatpush1.bf16.msra.mxu1 %v7693_v26 }
0x1e05   :  { %5988 = vmatprep.subr.bf16.mxu1 %v7696_v11 }
0x1e08   :  { %5990 = vmatpush1.bf16.msra.mxu1 %v7702_v37 }
0x1e09   :  { %6016 = vmatprep.subr.bf16.mxu1 %v7608_v55 }
0x1ebe   :  { %v3601_v5 = vpop.f32.mrb[36].mxu1 }
0x1ebf   :  { %v8130_v52 = vadd.f32 %v8127_v2, %v3601_v5  ;;  %v4762_v14 = vpop.f32.mrb[37].mxu1 }
0x1ec1   :  { %v3605_v10 = vsel %vm1807_vm4, %v8130_v52, -inf }
0x1ec2   :  { %3606 = vmax.xlane.f32.xlu1 %v3605_v10 }
0x1f4f   :  { %v3607_v42 = vpop.xlane.xlu1 %3606 }
0x1f50   :  { %vm3608_vm8 = vcmp.eq.f32.partialorder %v8130_v52, %v3607_v42 }
0x1f51   :  { %v3609_v22 = vsel %vm3608_vm8, %v8310_v29, 32 }
0x1f52   :  { %v3610_v8 = vsel %vm1807_vm4, %v3609_v22, 2147483647 }
0x1f53   :  { %v3612_v7 = vshra.s32 %v3610_v8, 16  ;;  %v3611_v50 = vand.u32 65535, %v3610_v8 }
0x1f55   :  { %v3614_v55 = vcvt.s32.f32 %v3612_v7  ;;  %v3613_v12 = vcvt.s32.f32 %v3611_v50 }
0x1f57   :  { %3615 = vmin.xlane.f32.xlu0 %v3614_v55 }
0x1fe4   :  { %v3616_v33 = vpop.xlane.xlu0 %3615 }
0x1fe5   :  { %vm3617_vm9 = vcmp.eq.f32.partialorder %v3614_v55, %v3616_v33  ;;  %v3622_v45 = vcvt.f32.s32 %v3616_v33 }
0x1fe6   :  { %v3618_v58 = vsel %vm3617_vm9, %v3613_v12, inf }
0x1fe7   :  { %3619 = vmin.xlane.f32.xlu1 %v3618_v58  ;;  %v3623_v61 = vshll.u32 %v3622_v45, 16 }
0x2074   :  { %v3620_v38 = vpop.xlane.xlu1 %3619 }
0x2075   :  { %v3621_v5 = vcvt.f32.s32 %v3620_v38 }
0x2077   :  { %v3624_v14 = vadd.s32 %v3623_v61, %v3621_v5 }
0x2079   :  { %v3625_v10 = vadd.s32 32, %v3624_v14 }
0x207b   :  { %vm3626_vm10 = vcmp.eq.s32.totalorder %v8310_v29, %v3625_v10 }
0x207c   :  { %v4280_v42 = vsel %vm3626_vm10, 1.0, %v8303_v13 }
0x207d   :  { %v3629_v22 = vadd.f32 %v4280_v42, %v3534_v19 }
0x207f   :  { %3695 = vmatmul.mubr.f32.vlgmr.msra.gmra.mrb[38].mxu0 %v3629_v22  ;;  %3766 = vmatmul.mubr.f32.vlgmr.msra.gmra.mrb[38].mxu1 %v3629_v22 }
0x2080   :  { %5993 = vmatpush3.bf16.msra.mxu0 %v7729_v44  ;;  %4795 = vmatprep.mubr.msk.f32.mxu0 %vm6627_vm2, %v8303_v13 }
0x2081   :  { %5994 = vmatprep.subr.bf16.mxu0 %v8312_v16  ;;  %6018 = vmatpush1.bf16.msra.mxu1 %v7610_v30 }
0x2082   :  { %6020 = vmatprep.subr.bf16.mxu1 %v7612_v41  ;;  %3955 = vmatprep.mubr.f32.mxu1 %v8303_v13 }
0x2084   :  { %5996 = vmatpush3.bf16.msra.mxu0 %v7735_v27 }
0x2085   :  { %5997 = vmatprep.subr.bf16.mxu0 %v8312_v16  ;;  %6022 = vmatpush1.bf16.msra.mxu1 %v7616_v25 }
0x2086   :  { %6024 = vmatprep.subr.bf16.mxu1 %v7619_v57 }
0x2088   :  { %5999 = vmatpush3.bf16.msra.mxu0 %v7741_v40 }
0x2089   :  { %6000 = vmatprep.subr.bf16.mxu0 %v8312_v16  ;;  %6026 = vmatpush1.bf16.msra.mxu1 %v7626_v51 }
0x208a   :  { %6028 = vmatprep.subr.bf16.mxu1 %v7630_v36 }
0x208c   :  { %6002 = vmatpush3.bf16.msra.mxu0 %v7747_v0 }
0x208d   :  { %6003 = vmatprep.subr.bf16.mxu0 %v8312_v16  ;;  %6030 = vmatpush1.bf16.msra.mxu1 %v7639_v32 }
0x208e   :  { %6032 = vmatprep.subr.bf16.mxu1 %v7644_v56 }
0x2090   :  { %6005 = vmatpush3.bf16.msra.mxu0 %v7753_v1 }
0x2091   :  { %6006 = vmatprep.subr.bf16.mxu0 %v8312_v16  ;;  %6034 = vmatpush1.bf16.msra.mxu1 %v7653_v15 }
0x2092   :  { %6036 = vmatprep.subr.bf16.mxu1 %v7656_v39 }
0x2094   :  { %6008 = vmatpush3.bf16.msra.mxu0 %v7759_v3 }
0x2095   :  { %6009 = vmatprep.subr.bf16.mxu0 %v8312_v16  ;;  %6038 = vmatpush1.bf16.msra.mxu1 %v7665_v31 }
0x2096   :  { %6040 = vmatprep.subr.bf16.mxu1 %v7668_v35 }
0x2098   :  { %6011 = vmatpush3.bf16.msra.mxu0 %v7764_v6 }
0x2099   :  { %6012 = vmatprep.subr.bf16.mxu0 %v8312_v16  ;;  %6042 = vmatpush1.bf16.msra.mxu1 %v7677_v48 }
0x209a   :  { %6044 = vmatprep.subr.bf16.mxu1 %v7680_v17 }
0x209c   :  { %6014 = vmatpush3.bf16.msra.mxu0 %v7770_v9 }
0x209d   :  { %6048 = vmatprep.subr.bf16.mxu0 %v7621_v34  ;;  %6046 = vmatpush1.bf16.msra.mxu1 %v7689_v21 }
0x209e   :  { %6079 = vmatprep.subr.bf16.mxu1 %v8312_v16 }
0x2152   :  { %v3696_v30 = vpop.f32.mrb[38].mxu0  ;;  %v3767_v41 = vpop.f32.mrb[38].mxu1 }
0x2153   :  { %v4281_v25 = vmul.f32 -1.442695, %v3696_v30  ;;  %v3698_v57 = vpop.f32.mrb[39].mxu0  ;;  %v3769_v51 = vpop.f32.mrb[39].mxu1 }
0x2154   :  { %v4282_v36 = vmul.f32 -1.442695, %v3698_v57  ;;  %v4283_v32 = vmul.f32 -1.442695, %v3769_v51 }
0x2155   :  { %6346 = vpow2.f32 %v4281_v25 }
0x2156   :  { %6348 = vpow2.f32 %v4282_v36 }
0x2157   :  { %6350 = vpow2.f32 %v4283_v32 }
0x2158   :  { %6352 = vtanh.f32 %v3767_v41 }
0x215f   :  { %v6347_v56 = vpop.eup %6346 }
0x2160   :  { %v6349_v15 = vpop.eup %6348  ;;  %v3775_v39 = vadd.f32 1.0, %v6347_v56 }
0x2161   :  { %v3781_v31 = vadd.f32 1.0, %v6349_v15  ;;  %v6351_v34 = vpop.eup %6350 }
0x2162   :  { %6354 = vrcp.f32 %v3775_v39  ;;  %v6353_v35 = vpop.eup %6352  ;;  %v3788_v19 = vadd.f32 1.0, %v6351_v34 }
0x2163   :  { %6356 = vrcp.f32 %v3781_v31 }
0x2164   :  { %6358 = vrcp.f32 %v3788_v19 }
0x216c   :  { %v6355_v48 = vpop.eup %6354 }
0x216d   :  { %v6357_v17 = vpop.eup %6356  ;;  %v3792_v21 = vmul.f32 %v6355_v48, %v6353_v35 }
0x216e   :  { %v3791_v8 = vmul.f32 %v6357_v17, %v8107_v4  ;;  %v6359_v55 = vpop.eup %6358 }
0x2170   :  { %v8175_v7 = vadd.f32 %v3792_v21, %v3791_v8 }
0x2172   :  { %6360 = vtanh.f32 %v8175_v7 }
0x217c   :  { %v6361_v50 = vpop.eup %6360 }
0x217d   :  { %v3795_v33 = vmul.f32 %v6361_v50, %v6359_v55 }
0x217f   :  { %4796 = vmatmul.mubr.f32.vlgmr.msra.gmra.mrb[40].mxu0 %v3795_v33 }
0x2180   :  { %6050 = vmatpush1.bf16.msra.mxu0 %v7623_v23  ;;  %4026 = vmatprep.mubr.f32.mxu0 %v8303_v13 }
0x2181   :  { %6052 = vmatprep.subr.bf16.mxu0 %v7633_v46 }
0x2184   :  { %6054 = vmatpush1.bf16.msra.mxu0 %v7635_v62 }
0x2185   :  { %6056 = vmatprep.subr.bf16.mxu0 %v7641_v49 }
0x2188   :  { %6058 = vmatpush1.bf16.msra.mxu0 %v7647_v18 }
0x2189   :  { %6060 = vmatprep.subr.bf16.mxu0 %v7650_v47 }
0x218c   :  { %6062 = vmatpush1.bf16.msra.mxu0 %v7659_v59 }
0x218d   :  { %6064 = vmatprep.subr.bf16.mxu0 %v7662_v53 }
0x2190   :  { %6066 = vmatpush1.bf16.msra.mxu0 %v7671_v54 }
0x2191   :  { %6068 = vmatprep.subr.bf16.mxu0 %v7674_v63 }
0x2194   :  { %6070 = vmatpush1.bf16.msra.mxu0 %v7683_v43 }
0x2195   :  { %6072 = vmatprep.subr.bf16.mxu0 %v7686_v60 }
0x2198   :  { %6074 = vmatpush1.bf16.msra.mxu0 %v7693_v26 }
0x2199   :  { %6076 = vmatprep.subr.bf16.mxu0 %v7696_v11 }
0x219c   :  { %6078 = vmatpush1.bf16.msra.mxu0 %v7702_v37 }
0x2252   :  { %v3862_v23 = vpop.f32.mrb[40].mxu0 }
0x2253   :  { %v8195_v46 = vadd.f32 %v8127_v2, %v3862_v23  ;;  %v4797_v62 = vpop.f32.mrb[41].mxu0 }
0x2255   :  { %v3866_v49 = vsel %vm1807_vm4, %v8195_v46, -inf }
0x2256   :  { %3867 = vmax.xlane.f32.xlu0 %v3866_v49 }
0x22e3   :  { %v3868_v18 = vpop.xlane.xlu0 %3867 }
0x22e4   :  { %vm3869_vm11 = vcmp.eq.f32.partialorder %v8195_v46, %v3868_v18 }
0x22e5   :  { %v3870_v47 = vsel %vm3869_vm11, %v8310_v29, 32 }
0x22e6   :  { %v3871_v59 = vsel %vm1807_vm4, %v3870_v47, 2147483647 }
0x22e7   :  { %v3873_v53 = vshra.s32 %v3871_v59, 16  ;;  %v3872_v63 = vand.u32 65535, %v3871_v59 }
0x22e9   :  { %v3875_v54 = vcvt.s32.f32 %v3873_v53  ;;  %v3874_v60 = vcvt.s32.f32 %v3872_v63 }
0x22eb   :  { %3876 = vmin.xlane.f32.xlu1 %v3875_v54 }
0x2378   :  { %v3877_v43 = vpop.xlane.xlu1 %3876 }
0x2379   :  { %vm3878_vm12 = vcmp.eq.f32.partialorder %v3875_v54, %v3877_v43  ;;  %v3883_v11 = vcvt.f32.s32 %v3877_v43 }
0x237a   :  { %v3879_v26 = vsel %vm3878_vm12, %v3874_v60, inf }
0x237b   :  { %3880 = vmin.xlane.f32.xlu0 %v3879_v26  ;;  %v3884_v4 = vshll.u32 %v3883_v11, 16 }
0x2408   :  { %v3881_v37 = vpop.xlane.xlu0 %3880 }
0x2409   :  { %v3882_v12 = vcvt.f32.s32 %v3881_v37 }
0x240b   :  { %v3885_v58 = vadd.s32 %v3884_v4, %v3882_v12 }
0x240d   :  { %v3886_v45 = vadd.s32 32, %v3885_v58 }
0x240f   :  { %vm3887_vm13 = vcmp.eq.s32.totalorder %v8310_v29, %v3886_v45 }
0x2410   :  { %v4284_v38 = vsel %vm3887_vm13, 1.0, %v8303_v13 }
0x2411   :  { %v3890_v61 = vadd.f32 %v4284_v38, %v3795_v33 }
0x2413   :  { %3956 = vmatmul.mubr.f32.vlgmr.msra.gmra.mrb[40].mxu1 %v3890_v61  ;;  %4027 = vmatmul.mubr.f32.vlgmr.msra.gmra.mrb[42].mxu0 %v3890_v61 }
0x2414   :  { %6081 = vmatpush3.bf16.msra.mxu1 %v7729_v44  ;;  %4830 = vmatprep.mubr.msk.f32.mxu1 %vm6627_vm2, %v8303_v13 }
0x2415   :  { %6082 = vmatprep.subr.bf16.mxu1 %v8312_v16 }
0x2418   :  { %6084 = vmatpush3.bf16.msra.mxu1 %v7735_v27 }
0x2419   :  { %6085 = vmatprep.subr.bf16.mxu1 %v8312_v16 }
0x241c   :  { %6087 = vmatpush3.bf16.msra.mxu1 %v7741_v40 }
0x241d   :  { %6088 = vmatprep.subr.bf16.mxu1 %v8312_v16 }
0x2420   :  { %6090 = vmatpush3.bf16.msra.mxu1 %v7747_v0 }
0x2421   :  { %6091 = vmatprep.subr.bf16.mxu1 %v8312_v16 }
0x2424   :  { %6093 = vmatpush3.bf16.msra.mxu1 %v7753_v1 }
0x2425   :  { %6094 = vmatprep.subr.bf16.mxu1 %v8312_v16 }
0x2428   :  { %6096 = vmatpush3.bf16.msra.mxu1 %v7759_v3 }
0x2429   :  { %6097 = vmatprep.subr.bf16.mxu1 %v8312_v16 }
0x242c   :  { %6099 = vmatpush3.bf16.msra.mxu1 %v7764_v6 }
0x242d   :  { %6100 = vmatprep.subr.bf16.mxu1 %v8312_v16 }
0x2430   :  { %6102 = vmatpush3.bf16.msra.mxu1 %v7770_v9 }
0x24e6   :  { %v3957_v13 = vpop.f32.mrb[40].mxu1  ;;  %v4028_v44 = vpop.f32.mrb[42].mxu0 }
0x24e7   :  { %v4285_v27 = vmul.f32 -1.442695, %v3957_v13  ;;  %v3959_v40 = vpop.f32.mrb[41].mxu1  ;;  %v4030_v0 = vpop.f32.mrb[43].mxu0 }
0x24e8   :  { %v4286_v29 = vmul.f32 -1.442695, %v3959_v40  ;;  %v4287_v1 = vmul.f32 -1.442695, %v4030_v0 }
0x24e9   :  { %6362 = vpow2.f32 %v4285_v27 }
0x24ea   :  { %6364 = vpow2.f32 %v4286_v29 }
0x24eb   :  { %6366 = vpow2.f32 %v4287_v1 }
0x24ec   :  { %6368 = vtanh.f32 %v4028_v44 }
0x24f3   :  { %v6363_v5 = vpop.eup %6362 }
0x24f4   :  { %v6365_v14 = vpop.eup %6364  ;;  %v4036_v3 = vadd.f32 1.0, %v6363_v5 }
0x24f5   :  { %v4042_v10 = vadd.f32 1.0, %v6365_v14  ;;  %v6367_v6 = vpop.eup %6366 }
0x24f6   :  { %6370 = vrcp.f32 %v4036_v3  ;;  %v6369_v16 = vpop.eup %6368  ;;  %v4049_v30 = vadd.f32 1.0, %v6367_v6 }
0x24f7   :  { %6372 = vrcp.f32 %v4042_v10 }
0x24f8   :  { %6374 = vrcp.f32 %v4049_v30 }
0x2500   :  { %v6371_v9 = vpop.eup %6370 }
0x2501   :  { %v6373_v42 = vpop.eup %6372  ;;  %v4053_v22 = vmul.f32 %v6371_v9, %v6369_v16 }
0x2502   :  { %v4052_v41 = vmul.f32 %v6373_v42, %v8175_v7  ;;  %v6375_v57 = vpop.eup %6374 }
0x2504   :  { %v4054_v25 = vadd.f32 %v4053_v22, %v4052_v41 }
0x2506   :  { %6376 = vtanh.f32 %v4054_v25 }
0x2510   :  { %v6377_v51 = vpop.eup %6376 }
0x2511   :  { %v4056_v36 = vmul.f32 %v6377_v51, %v6375_v57 }
0x2513   :  { %4831 = vmatmul.mubr.f32.vlgmr.msra.gmra.mrb[42].mxu1 %v4056_v36 }
0x2514   :  { %6544 = shalt.err (!%p6541_p4)
}
0x2515   :  { %s6545_s18 = scalar_lea.hbm %s8283_s16, 16 }
0x2516   :  { %p6546_p5 = scmp.ne.s32.totalorder %s8283_s16, %s6545_s18  ;;  %p6549_p6 = scmp.lt.u32.totalorder %s6545_s18, %s8283_s16 }
0x2518   :  { %p6551_p7 = pnand %p6549_p6, %p6546_p5 }
0x251a   :  { %6554 = shalt.err (!%p6551_p7)
}
0x251b   :  { %4182 = dma.vmem_to_hbm [thread:$0]  %s4180_s11, 16, %s8283_s16, [#allocation18]  }
0x251c   :  { %s6629_s1 = smov [#allocation19]  }
0x251d   :  { %s4189_s20 = sshll.u32 %s6629_s1, 4  ;;  %s4190_s20 = int_to_ptr.vmem [resolvable:$true] %s4189_s20 }
0x251e   :  { %s6555_s21 = scalar_lea.vmem %s4190_s20, 16  ;;  %s6559_s23 = scalar_lea.vmem %s4190_s20, 32 }
0x251f   :  { %p6556_p8 = scmp.ne.s32.totalorder %s4190_s20, %s6555_s21  ;;  %p6560_p9 = scmp.lt.s32.totalorder %s4190_s20, %s4190_s20 }
0x2520   :  { %p6561_p10 = scmp.lt.s32.totalorder %s6559_s23, %s6555_s21 }
0x2522   :  { %p6562_p11 = por %p6561_p10, %p6560_p9 }
0x2524   :  { %p6563_p12 = pnand %p6562_p11, %p6556_p8 }
0x2526   :  { %6566 = shalt.err (!%p6563_p12)
}
0x2527   :  { %s6567_s24 = scalar_lea.hbm %s8284_s17, 16 }
0x2528   :  { %p6568_p13 = scmp.ne.s32.totalorder %s8284_s17, %s6567_s24  ;;  %p6571_p0 = scmp.lt.u32.totalorder %s6567_s24, %s8284_s17 }
0x252a   :  { %p6573_p1 = pnand %p6571_p0, %p6568_p13 }
0x252c   :  { %6576 = shalt.err (!%p6573_p1)
}
0x252d   :  { %4192 = dma.vmem_to_hbm [thread:$0]  %s4190_s20, 16, %s8284_s17, [#allocation18]   ;;  %v4128_v32 = vrot.slane %v7864_v28, 7  ;;  %vm4148_vm2 = vcmask 1040384   ;;  %v4131_v56 = vrot.slane %v7930_v24, 6  ;;  %vm4150_vm4 = vcmask 1041408  }
0x252e   :  { %v8313_v15 = vld [vmem:[#allocation34_spill] sm:$0xff]  ;;  %vm4152_vm14 = vcmask 1042432   ;;  %v4137_v31 = vrot.slane %v8062_v20, 4  ;;  %v8314_v34 = vld [vmem:[#allocation33_spill] sm:$0xff]  ;;  %v4140_v48 = vrot.slane %v8130_v52, 3  ;;  %vm4154_vm15 = vcmask 1043456  }
0x252f   :  { %v4134_v39 = vrot.slane %v8313_v15, 5  ;;  %v4149_v35 = vsel %vm4148_vm2, %v8314_v34, %v4128_v32  ;;  %v4143_v21 = vrot.slane %v8195_v46, 2  ;;  %vm4156_vm0 = vcmask 1044480   ;;  %s6630_s17 = smov [#allocation16]  }
0x2530   :  { %v4151_v17 = vsel %vm4150_vm4, %v4149_v35, %v4131_v56  ;;  %vm4158_vm1 = vcmask 1045504   ;;  %s4169_s7 = sshll.u32 %s6630_s17, 4  ;;  %vm4160_vm3 = vcmask 1046528   ;;  %s4170_s7 = int_to_ptr.vmem [resolvable:$true] %s4169_s7 }
0x2531   :  { %v4153_v28 = vsel %vm4152_vm14, %v4151_v17, %v4134_v39  ;;  %s6577_s29 = scalar_lea.vmem %s4170_s7, 128  ;;  %p6582_p3 = scmp.lt.s32.totalorder %s4170_s7, %s4170_s7 }
0x2532   :  { %v4155_v7 = vsel %vm4154_vm15, %v4153_v28, %v4137_v31  ;;  %p6578_p2 = scmp.ne.s32.totalorder %s4170_s7, %s6577_s29  ;;  %p6583_p4 = scmp.lt.s32.totalorder %s6577_s29, %s6577_s29 }
0x2533   :  { %v4157_v55 = vsel %vm4156_vm0, %v4155_v7, %v4140_v48 }
0x2534   :  { %v4159_v50 = vsel %vm4158_vm1, %v4157_v55, %v4143_v21  ;;  %p6584_p5 = por %p6583_p4, %p6582_p3 }
0x2536   :  { %p6585_p6 = pnand %p6584_p5, %p6578_p2 }
0x25e6   :  { %v4123_v19 = vpop.f32.mrb[42].mxu1 }
0x25e7   :  { %v4124_v8 = vadd.f32 %v8127_v2, %v4123_v19  ;;  %v4832_v24 = vpop.f32.mrb[43].mxu1 }
0x25e9   :  { %v4146_v20 = vrot.slane %v4124_v8, 1 }
0x25eb   :  { %v4161_v52 = vsel %vm4160_vm3, %v4159_v50, %v4146_v20 }
0x25ec   :  { %4162 = vst.msk [vmem:[#allocation16] sm:$0xff] %vm1896_vm5, %v4161_v52 }
0x25ed   :  { %6588 = shalt.err (!%p6585_p6)
}
0x25ee   :  { %s6589_s11 = scalar_lea.hbm %s8282_s15, 128 }
0x25ef   :  { %p6590_p7 = scmp.ne.s32.totalorder %s8282_s15, %s6589_s11  ;;  %p6593_p8 = scmp.lt.u32.totalorder %s6589_s11, %s8282_s15 }
0x25f1   :  { %p6595_p9 = pnand %p6593_p8, %p6590_p7 }
0x25f3   :  { %6598 = shalt.err (!%p6595_p9)
}
0x25f4   :  { %4172 = dma.vmem_to_hbm [thread:$0]  %s4170_s7, 128, %s8282_s15, [#allocation7]  }
0x25f5   :  { %6611 = dma.done.wait [#allocation7], 128  }
0x25f6   :  { %6612 = vsyncadd [#allocation7], 4294967168 }
0x25f7   :  { %6613 = dma.done.wait [#allocation18], 32  }
0x25f8   :  { %6614 = vsyncadd [#allocation18], 4294967264 }
0x25f9   :  { %4202 = vsyncpa [#allocation6], 1 }
0x25fa   :  { %4203 = vsyncpa [#allocation9], 1 }
0x25fb   :  { %4204 = vsyncpa [#allocation12], 1 }
0x25fc   :  { %4205 = vsyncpa [#allocation15], 1 }
0x25fd   :  { %4206 = vsyncpa [#allocation7], 1 }
0x25fe   :  { %4207 = vsyncpa [#allocation18], 1 }
0x25ff   :  { %4208 = vsyncmov [#allocation4] }
0x2602   :  { %s4209_s6 = vpop.sfrf %4208 }
0x2603   :  { %p4288_p10 = scmp.ne.s32.totalorder %s4209_s6, 0 }
0x2605   :  { %4213 = shalt.err (%p4288_p10)  }
0x2606   :  { %4215 = vsyncmov [#allocation4 + $0x1] }
0x2609   :  { %s4216_s25 = vpop.sfrf %4215 }
0x260a   :  { %p4289_p11 = scmp.ne.s32.totalorder %s4216_s25, 0 }
0x260c   :  { %4220 = shalt.err (%p4289_p11)  }

</bundles_post_ra>
